<compile_context>
chip_gen: v6e
topology: v6e:2x2x1
jax: 0.10.0
libtpu: 0.0.40
codegen_flags: <defaults>
</compile_context>

<pallas_src>
import functools
import math

import jax
import jax.numpy as jnp
import numpy as np
from jax import lax
from jax.experimental import pallas as pl
from jax.experimental.pallas import tpu as pltpu

_LN_EPS = 1e-5  # torch.nn.LayerNorm default


# --------------------------------------------------------------------------
# High-pass operator construction (built once in plain JAX; tiny).
# --------------------------------------------------------------------------
def _lowpass_dft_operator(n: int, rate: int):
    """A = F^H diag(m) F (ortho DFT) keeping the fftshift-ed centre block."""
    j = jnp.arange(n)
    F = jnp.exp(-2j * jnp.pi * jnp.outer(j, j).astype(jnp.float32) / n) / jnp.sqrt(
        jnp.float32(n)
    )
    m = ((j < rate) | (j >= n - rate)).astype(F.dtype)
    A = jnp.conj(F).T @ (m[:, None] * F)
    return jnp.real(A).astype(jnp.float32), jnp.imag(A).astype(jnp.float32)


def _highpass_matrix(patch: int, rate: int, channels: int) -> jax.Array:
    """M with vec(highpass(C,P,P image)) = M @ vec(image) (row-major flatten).

    For real x:  Re(A x A^T) row-vec = (Re(A)⊗Re(A) − Im(A)⊗Im(A)) vec(x),
    so M = I − that, block-diagonal over channels.  Shape (C*P*P, C*P*P) f32.
    """
    ar, ai = _lowpass_dft_operator(patch, rate)
    low = jnp.kron(ar, ar) - jnp.kron(ai, ai)
    m_img = jnp.eye(patch * patch, dtype=jnp.float32) - low
    return jnp.kron(jnp.eye(channels, dtype=jnp.float32), m_img)


# --------------------------------------------------------------------------
# Shared LayerNorm helper (traced both inside kernels and in the reference).
# --------------------------------------------------------------------------
def _layernorm(x, g, b):
    mu = jnp.mean(x, axis=-1, keepdims=True)
    d = x - mu
    var = jnp.mean(d * d, axis=-1, keepdims=True)
    return d * lax.rsqrt(var + _LN_EPS) * g + b


# --------------------------------------------------------------------------
# Fused EncoderBlock kernel:
#   highpass -> LN_before (+pos) -> QKV -> per-head attention -> residual
#   -> LN_att -> MLP(ReLU) -> residual -> LN_mlp, all in one grid step.
# --------------------------------------------------------------------------
def _encoder_block_kernel(*refs, num_heads, add_pos):
    it = iter(refs)
    x_ref = next(it)                       # (1, N, D)
    hp_ref = next(it)                      # (D, D)  = M^T (resident operator)
    pos_ref = next(it) if add_pos else None
    (ln1_g, ln1_b, wq, bq, wk, bk, wv, bv, ln2_g, ln2_b,
     w1, b1, w2, b2, ln3_g, ln3_b, o_ref, attn_ref) = it

    x = x_ref[0]                                                   # (N, D)
    # LocalHighPass as a single fused (N, D) @ (D, D) MXU matmul.
    xhp = jnp.dot(x, hp_ref[...], preferred_element_type=jnp.float32)

    # layernorm_before (+ position embeddings on the first block).
    h = _layernorm(xhp, ln1_g[...], ln1_b[...])
    if add_pos:
        h = h + pos_ref[...]

    # Q / K / V projections (full-width D=256 matmuls).
    q = jnp.dot(h, wq[...], preferred_element_type=jnp.float32) + bq[...]
    k = jnp.dot(h, wk[...], preferred_element_type=jnp.float32) + bk[...]
    v = jnp.dot(h, wv[...], preferred_element_type=jnp.float32) + bv[...]

    # Multi-head attention: unrolled loop over static 64-column head slices.
    # K consumed untransposed via dot_general; per-head context accumulated
    # into the (N, D) VMEM scratch -> lane-dense 256-wide layout downstream.
    n, d = x.shape
    hd = d // num_heads
    scale = 1.0 / math.sqrt(hd)
    for hh in range(num_heads):
        lo, hi = hh * hd, (hh + 1) * hd
        qh, kh, vh = q[:, lo:hi], k[:, lo:hi], v[:, lo:hi]
        s = lax.dot_general(qh, kh, (((1,), (1,)), ((), ())),
                            preferred_element_type=jnp.float32) * scale
        s = s - jnp.max(s, axis=-1, keepdims=True)
        e = jnp.exp(s)
        p = e * pl.reciprocal(jnp.sum(e, axis=-1, keepdims=True), approx=True)
        attn_ref[:, lo:hi] = jnp.dot(p, vh, preferred_element_type=jnp.float32)

    # Residual + layernorm_att, MLP (ReLU), residual + layernorm_mlp.
    r = xhp + _layernorm(attn_ref[...], ln2_g[...], ln2_b[...])
    m = jnp.dot(r, w1[...], preferred_element_type=jnp.float32) + b1[...]
    m = jnp.maximum(m, 0.0)
    m = jnp.dot(m, w2[...], preferred_element_type=jnp.float32) + b2[...]
    o_ref[0] = r + _layernorm(m, ln3_g[...], ln3_b[...])


def encoder_block(x, blk, hp_mt, *, num_heads, add_pos):
    """One EncoderBlock forward.  x: (B, N, D) f32 -> (B, N, D) f32."""
    B, N, D = x.shape
    I = blk["w1"].shape[1]

    spec_x = pl.BlockSpec((1, N, D), lambda i: (i, 0, 0))
    spec_dd = pl.BlockSpec((D, D), lambda i: (0, 0))
    spec_di = pl.BlockSpec((D, I), lambda i: (0, 0))
    spec_id = pl.BlockSpec((I, D), lambda i: (0, 0))
    spec_pos = pl.BlockSpec((N, D), lambda i: (0, 0))
    vec_d = pl.BlockSpec((1, D), lambda i: (0, 0))
    vec_i = pl.BlockSpec((1, I), lambda i: (0, 0))

    in_specs = [spec_x, spec_dd]
    inputs = [x, hp_mt]
    if add_pos:
        in_specs.append(spec_pos)
        inputs.append(blk["pos"])
    in_specs += [vec_d, vec_d,               # ln1 g/b
                 spec_dd, vec_d,             # wq, bq
                 spec_dd, vec_d,             # wk, bk
                 spec_dd, vec_d,             # wv, bv
                 vec_d, vec_d,               # ln2 g/b
                 spec_di, vec_i,             # w1, b1
                 spec_id, vec_d,             # w2, b2
                 vec_d, vec_d]               # ln3 g/b
    inputs += [blk["ln1_g"], blk["ln1_b"],
               blk["wq"], blk["bq"], blk["wk"], blk["bk"], blk["wv"], blk["bv"],
               blk["ln2_g"], blk["ln2_b"],
               blk["w1"], blk["b1"], blk["w2"], blk["b2"],
               blk["ln3_g"], blk["ln3_b"]]

    return pl.pallas_call(
        functools.partial(_encoder_block_kernel,
                          num_heads=num_heads, add_pos=add_pos),
        out_shape=jax.ShapeDtypeStruct((B, N, D), jnp.float32),
        grid_spec=pltpu.PrefetchScalarGridSpec(
            num_scalar_prefetch=0,
            grid=(B,),
            in_specs=in_specs,
            out_specs=spec_x,
            scratch_shapes=[pltpu.VMEM((N, D), jnp.float32)],  # attn context
        ),
        compiler_params=pltpu.CompilerParams(dimension_semantics=("parallel",)),
    )(*inputs)


# --------------------------------------------------------------------------
# PatchEmbadding: pure data movement -> JAX layout glue (no kernel needed).
# --------------------------------------------------------------------------
def patch_embed(batch, patch_size):
    B, C, H, W = batch.shape
    pln = H // patch_size
    x = batch.reshape(B, C, pln, patch_size, pln, patch_size)
    x = x.transpose(0, 2, 4, 1, 3, 5)  # (B, pi, pj, C, P, P)
    return x.reshape(B, pln * pln, C * patch_size * patch_size)


# --------------------------------------------------------------------------
# Full VitEncoder forward (Pallas path): one fused pallas_call per block.
# --------------------------------------------------------------------------
def vit_encoder_forward(batch, params, hp_mt, *, patch_size, num_heads):
    x = patch_embed(batch, patch_size).astype(jnp.float32)
    for bi, blk in enumerate(params):
        x = encoder_block(x, blk, hp_mt, num_heads=num_heads, add_pos=(bi == 0))
    return x


# --------------------------------------------------------------------------
# Pure-JAX reference mirroring the PyTorch module (FFT-based high-pass).
# --------------------------------------------------------------------------
def reference_local_highpass(hidden, channels, patch_size, highpass_rate):
    B, N, D = hidden.shape
    imgs = hidden.reshape(B, N, channels, patch_size, patch_size)
    mid = patch_size // 2
    rate = patch_size // highpass_rate
    f = jnp.fft.fftshift(jnp.fft.fft2(imgs, axes=(-2, -1), norm="ortho"), axes=(-2, -1))
    f = f.at[..., mid - rate:mid + rate, mid - rate:mid + rate].set(0.0)
    out = jnp.fft.ifft2(jnp.fft.ifftshift(f, axes=(-2, -1)), axes=(-2, -1), norm="ortho")
    return jnp.real(out).reshape(B, N, D)


def reference_encoder(batch, params, patch_size, channels, highpass_rate, num_heads):
    HI = jax.lax.Precision.HIGHEST
    x = patch_embed(batch, patch_size).astype(jnp.float32)
    B, N, D = x.shape
    hd = D // num_heads
    for blk in params:
        x = reference_local_highpass(x, channels, patch_size, highpass_rate)
        h = _layernorm(x, blk["ln1_g"], blk["ln1_b"]) + blk["pos"]
        q = jnp.dot(h, blk["wq"], precision=HI) + blk["bq"]
        k = jnp.dot(h, blk["wk"], precision=HI) + blk["bk"]
        v = jnp.dot(h, blk["wv"], precision=HI) + blk["bv"]

        def sp(t):
            return t.reshape(B, N, num_heads, hd).transpose(0, 2, 1, 3)

        qh, kh, vh = sp(q), sp(k), sp(v)
        s = jnp.einsum("bhnd,bhmd->bhnm", qh, kh, precision=HI) / math.sqrt(hd)
        p = jax.nn.softmax(s, axis=-1)
        ctx = jnp.einsum("bhnm,bhmd->bhnd", p, vh, precision=HI)
        attn = ctx.transpose(0, 2, 1, 3).reshape(B, N, D)

        x = x + _layernorm(attn, blk["ln2_g"], blk["ln2_b"])
        m = jnp.maximum(jnp.dot(x, blk["w1"], precision=HI) + blk["b1"], 0.0)
        m = jnp.dot(m, blk["w2"], precision=HI) + blk["b2"]
        x = x + _layernorm(m, blk["ln3_g"], blk["ln3_b"])
    return x


# --------------------------------------------------------------------------
# Parameter init (weights stored in (in, out) layout so kernels do x @ W + b).
# --------------------------------------------------------------------------
def init_params(key, num_blocks, N, D, I):
    blocks = []
    bkeys = jax.random.split(key, num_blocks)
    for bi in range(num_blocks):
        ks = jax.random.split(bkeys[bi], 12)

        def rnd(k, shape, s=0.05):
            return jax.random.normal(k, shape, dtype=jnp.float32) * s

        blocks.append(dict(
            # position embeddings only used by the first block (first_block=True)
            pos=(jax.random.normal(ks[0], (N, D), dtype=jnp.float32)
                 if bi == 0 else jnp.zeros((N, D), jnp.float32)),
            ln1_g=jnp.ones((1, D), jnp.float32), ln1_b=jnp.zeros((1, D), jnp.float32),
            wq=rnd(ks[1], (D, D)), bq=rnd(ks[2], (1, D)),
            wk=rnd(ks[3], (D, D)), bk=rnd(ks[4], (1, D)),
            wv=rnd(ks[5], (D, D)), bv=rnd(ks[6], (1, D)),
            ln2_g=jnp.ones((1, D), jnp.float32), ln2_b=jnp.zeros((1, D), jnp.float32),
            w1=rnd(ks[7], (D, I)), b1=rnd(ks[8], (1, I)),
            w2=rnd(ks[9], (I, D)), b2=rnd(ks[10], (1, D)),
            ln3_g=jnp.ones((1, D), jnp.float32), ln3_b=jnp.zeros((1, D), jnp.float32),
        ))
    return blocks


if __name__ == "__main__":
    # VitConfig-equivalent small shapes.
    image_size, patch_size, channels = 32, 8, 4
    highpass_rate, num_heads, inter, num_hidden_layers = 4, 4, 512, 1
    num_patches = (image_size // patch_size) ** 2          # 16
    hidden = channels * patch_size * patch_size            # 256
    B = 2

    key = jax.random.PRNGKey(0)
    k_img, k_par = jax.random.split(key)
    batch = jax.random.normal(
        k_img, (B, channels, image_size, image_size), dtype=jnp.float32)
    params = init_params(k_par, 1 + num_hidden_layers, num_patches, hidden, inter)

    rate = patch_size // highpass_rate
    hp_m = _highpass_matrix(patch_size, rate, channels)     # (hidden, hidden)
    hp_mt = hp_m.T                                           # kernels compute x @ M^T

    # (1) Sanity check of the linear high-pass operator vs the FFT reference
    #     (pure JAX, HIGHEST precision -- validates the operator construction).
    hidden0 = patch_embed(batch, patch_size)
    hp_lin = jnp.einsum("bnd,de->bne", hidden0, hp_mt,
                        precision=jax.lax.Precision.HIGHEST)
    hp_ref = reference_local_highpass(hidden0, channels, patch_size, highpass_rate)
    assert np.allclose(np.asarray(hp_lin), np.asarray(hp_ref), atol=2e-3, rtol=1e-3), (
        "fused high-pass operator mismatch vs FFT reference")

    # (2) Full VitEncoder forward via the fused per-block Pallas kernel.
    #     Tolerance covers Mosaic multi-pass f32 MXU + EUP approx reciprocal
    #     vs XLA HIGHEST-precision dots across 2 blocks.
    fwd = jax.jit(functools.partial(vit_encoder_forward,
                                    patch_size=patch_size, num_heads=num_heads))
    out = jax.block_until_ready(fwd(batch, params, hp_mt))
    ref = reference_encoder(batch, params, patch_size, channels,
                            highpass_rate, num_heads)
    assert out.shape == (B, num_patches, hidden) and out.dtype == jnp.float32
    assert np.allclose(np.asarray(out), np.asarray(ref), atol=1e-2, rtol=1e-2), (
        "Pallas VitEncoder mismatch vs pure-JAX reference")
    print("KERNEL_OK")
</pallas_src>

<mosaic_0001>
module attributes {stable_mosaic.version = 11 : i64} {
  func.func @_encoder_block_kernel(%arg0: i32, %arg1: memref<1x16x256xf32, #tpu.memory_space<vmem>>, %arg2: memref<256x256xf32, #tpu.memory_space<vmem>>, %arg3: memref<16x256xf32, #tpu.memory_space<vmem>>, %arg4: memref<1x256xf32, #tpu.memory_space<vmem>>, %arg5: memref<1x256xf32, #tpu.memory_space<vmem>>, %arg6: memref<256x256xf32, #tpu.memory_space<vmem>>, %arg7: memref<1x256xf32, #tpu.memory_space<vmem>>, %arg8: memref<256x256xf32, #tpu.memory_space<vmem>>, %arg9: memref<1x256xf32, #tpu.memory_space<vmem>>, %arg10: memref<256x256xf32, #tpu.memory_space<vmem>>, %arg11: memref<1x256xf32, #tpu.memory_space<vmem>>, %arg12: memref<1x256xf32, #tpu.memory_space<vmem>>, %arg13: memref<1x256xf32, #tpu.memory_space<vmem>>, %arg14: memref<256x512xf32, #tpu.memory_space<vmem>>, %arg15: memref<1x512xf32, #tpu.memory_space<vmem>>, %arg16: memref<512x256xf32, #tpu.memory_space<vmem>>, %arg17: memref<1x256xf32, #tpu.memory_space<vmem>>, %arg18: memref<1x256xf32, #tpu.memory_space<vmem>>, %arg19: memref<1x256xf32, #tpu.memory_space<vmem>>, %arg20: memref<1x16x256xf32, #tpu.memory_space<vmem>>, %arg21: memref<16x256xf32, #tpu.memory_space<vmem>>) attributes {dimension_semantics = [#tpu.dimension_semantics<parallel>], iteration_bounds = array<i64: 2>, scalar_prefetch = 0 : i64, scratch_operands = 1 : i64, tpu.core_type = #tpu.core_type<tc>, window_params = [{transform_indices = @transform_0, window_bounds = array<i64: 1, 16, 256>}, {pipeline_mode = #tpu.pipeline_mode<synchronous>, transform_indices = @transform_1, window_bounds = array<i64: 256, 256>}, {pipeline_mode = #tpu.pipeline_mode<synchronous>, transform_indices = @transform_2, window_bounds = array<i64: 16, 256>}, {pipeline_mode = #tpu.pipeline_mode<synchronous>, transform_indices = @transform_3, window_bounds = array<i64: 1, 256>}, {pipeline_mode = #tpu.pipeline_mode<synchronous>, transform_indices = @transform_4, window_bounds = array<i64: 1, 256>}, {pipeline_mode = #tpu.pipeline_mode<synchronous>, transform_indices = @transform_5, window_bounds = array<i64: 256, 256>}, {pipeline_mode = #tpu.pipeline_mode<synchronous>, transform_indices = @transform_6, window_bounds = array<i64: 1, 256>}, {pipeline_mode = #tpu.pipeline_mode<synchronous>, transform_indices = @transform_7, window_bounds = array<i64: 256, 256>}, {pipeline_mode = #tpu.pipeline_mode<synchronous>, transform_indices = @transform_8, window_bounds = array<i64: 1, 256>}, {pipeline_mode = #tpu.pipeline_mode<synchronous>, transform_indices = @transform_9, window_bounds = array<i64: 256, 256>}, {pipeline_mode = #tpu.pipeline_mode<synchronous>, transform_indices = @transform_10, window_bounds = array<i64: 1, 256>}, {pipeline_mode = #tpu.pipeline_mode<synchronous>, transform_indices = @transform_11, window_bounds = array<i64: 1, 256>}, {pipeline_mode = #tpu.pipeline_mode<synchronous>, transform_indices = @transform_12, window_bounds = array<i64: 1, 256>}, {pipeline_mode = #tpu.pipeline_mode<synchronous>, transform_indices = @transform_13, window_bounds = array<i64: 256, 512>}, {pipeline_mode = #tpu.pipeline_mode<synchronous>, transform_indices = @transform_14, window_bounds = array<i64: 1, 512>}, {pipeline_mode = #tpu.pipeline_mode<synchronous>, transform_indices = @transform_15, window_bounds = array<i64: 512, 256>}, {pipeline_mode = #tpu.pipeline_mode<synchronous>, transform_indices = @transform_16, window_bounds = array<i64: 1, 256>}, {pipeline_mode = #tpu.pipeline_mode<synchronous>, transform_indices = @transform_17, window_bounds = array<i64: 1, 256>}, {pipeline_mode = #tpu.pipeline_mode<synchronous>, transform_indices = @transform_18, window_bounds = array<i64: 1, 256>}, {transform_indices = @transform_19, window_bounds = array<i64: 1, 16, 256>}]} {
    %c0 = arith.constant 0 : index
    %c0_0 = arith.constant 0 : index
    %c0_1 = arith.constant 0 : index
    %0 = vector.load %arg1[%c0, %c0_0, %c0_1] : memref<1x16x256xf32, #tpu.memory_space<vmem>>, vector<1x16x256xf32>
    %1 = vector.shape_cast %0 : vector<1x16x256xf32> to vector<16x256xf32>
    %c0_2 = arith.constant 0 : index
    %c0_3 = arith.constant 0 : index
    %2 = vector.load %arg2[%c0_2, %c0_3] : memref<256x256xf32, #tpu.memory_space<vmem>>, vector<256x256xf32>
    %cst = arith.constant dense<0.000000e+00> : vector<16x256xf32>
    %3 = tpu.matmul %1, %2, %cst {dimension_numbers = #tpu.dot_dimension_numbers<[1], [0], [0], [1], [0, 0, 1, 1], [], []>} : vector<16x256xf32>, vector<256x256xf32>, vector<16x256xf32> -> vector<16x256xf32>
    %c0_4 = arith.constant 0 : index
    %c0_5 = arith.constant 0 : index
    %4 = vector.load %arg4[%c0_4, %c0_5] : memref<1x256xf32, #tpu.memory_space<vmem>>, vector<1x256xf32>
    %c0_6 = arith.constant 0 : index
    %c0_7 = arith.constant 0 : index
    %5 = vector.load %arg5[%c0_6, %c0_7] : memref<1x256xf32, #tpu.memory_space<vmem>>, vector<1x256xf32>
    %cst_8 = arith.constant dense<0.000000e+00> : vector<16xf32>
    %6 = vector.multi_reduction <add>, %3, %cst_8 [1] : vector<16x256xf32> to vector<16xf32>
    %7 = vector.shape_cast %6 : vector<16xf32> to vector<16x1xf32>
    %cst_9 = arith.constant 2.560000e+02 : f32
    %8 = vector.broadcast %cst_9 : f32 to vector<16x1xf32>
    %9 = arith.divf %7, %8 : vector<16x1xf32>
    %10 = vector.broadcast %9 : vector<16x1xf32> to vector<16x256xf32>
    %11 = arith.subf %3, %10 : vector<16x256xf32>
    %12 = arith.mulf %11, %11 : vector<16x256xf32>
    %cst_10 = arith.constant dense<0.000000e+00> : vector<16xf32>
    %13 = vector.multi_reduction <add>, %12, %cst_10 [1] : vector<16x256xf32> to vector<16xf32>
    %14 = vector.shape_cast %13 : vector<16xf32> to vector<16x1xf32>
    %cst_11 = arith.constant 2.560000e+02 : f32
    %15 = vector.broadcast %cst_11 : f32 to vector<16x1xf32>
    %16 = arith.divf %14, %15 : vector<16x1xf32>
    %cst_12 = arith.constant 9.99999974E-6 : f32
    %17 = vector.broadcast %cst_12 : f32 to vector<16x1xf32>
    %18 = arith.addf %16, %17 : vector<16x1xf32>
    %19 = math.rsqrt %18 : vector<16x1xf32>
    %20 = vector.broadcast %19 : vector<16x1xf32> to vector<16x256xf32>
    %21 = arith.mulf %11, %20 : vector<16x256xf32>
    %22 = vector.broadcast %4 : vector<1x256xf32> to vector<16x256xf32>
    %23 = arith.mulf %21, %22 : vector<16x256xf32>
    %24 = vector.broadcast %5 : vector<1x256xf32> to vector<16x256xf32>
    %25 = arith.addf %23, %24 : vector<16x256xf32>
    %c0_13 = arith.constant 0 : index
    %c0_14 = arith.constant 0 : index
    %26 = vector.load %arg3[%c0_13, %c0_14] : memref<16x256xf32, #tpu.memory_space<vmem>>, vector<16x256xf32>
    %27 = arith.addf %25, %26 : vector<16x256xf32>
    %c0_15 = arith.constant 0 : index
    %c0_16 = arith.constant 0 : index
    %28 = vector.load %arg6[%c0_15, %c0_16] : memref<256x256xf32, #tpu.memory_space<vmem>>, vector<256x256xf32>
    %cst_17 = arith.constant dense<0.000000e+00> : vector<16x256xf32>
    %29 = tpu.matmul %27, %28, %cst_17 {dimension_numbers = #tpu.dot_dimension_numbers<[1], [0], [0], [1], [0, 0, 1, 1], [], []>} : vector<16x256xf32>, vector<256x256xf32>, vector<16x256xf32> -> vector<16x256xf32>
    %c0_18 = arith.constant 0 : index
    %c0_19 = arith.constant 0 : index
    %30 = vector.load %arg7[%c0_18, %c0_19] : memref<1x256xf32, #tpu.memory_space<vmem>>, vector<1x256xf32>
    %31 = vector.broadcast %30 : vector<1x256xf32> to vector<16x256xf32>
    %32 = arith.addf %29, %31 : vector<16x256xf32>
    %c0_20 = arith.constant 0 : index
    %c0_21 = arith.constant 0 : index
    %33 = vector.load %arg8[%c0_20, %c0_21] : memref<256x256xf32, #tpu.memory_space<vmem>>, vector<256x256xf32>
    %cst_22 = arith.constant dense<0.000000e+00> : vector<16x256xf32>
    %34 = tpu.matmul %27, %33, %cst_22 {dimension_numbers = #tpu.dot_dimension_numbers<[1], [0], [0], [1], [0, 0, 1, 1], [], []>} : vector<16x256xf32>, vector<256x256xf32>, vector<16x256xf32> -> vector<16x256xf32>
    %c0_23 = arith.constant 0 : index
    %c0_24 = arith.constant 0 : index
    %35 = vector.load %arg9[%c0_23, %c0_24] : memref<1x256xf32, #tpu.memory_space<vmem>>, vector<1x256xf32>
    %36 = vector.broadcast %35 : vector<1x256xf32> to vector<16x256xf32>
    %37 = arith.addf %34, %36 : vector<16x256xf32>
    %c0_25 = arith.constant 0 : index
    %c0_26 = arith.constant 0 : index
    %38 = vector.load %arg10[%c0_25, %c0_26] : memref<256x256xf32, #tpu.memory_space<vmem>>, vector<256x256xf32>
    %cst_27 = arith.constant dense<0.000000e+00> : vector<16x256xf32>
    %39 = tpu.matmul %27, %38, %cst_27 {dimension_numbers = #tpu.dot_dimension_numbers<[1], [0], [0], [1], [0, 0, 1, 1], [], []>} : vector<16x256xf32>, vector<256x256xf32>, vector<16x256xf32> -> vector<16x256xf32>
    %c0_28 = arith.constant 0 : index
    %c0_29 = arith.constant 0 : index
    %40 = vector.load %arg11[%c0_28, %c0_29] : memref<1x256xf32, #tpu.memory_space<vmem>>, vector<1x256xf32>
    %41 = vector.broadcast %40 : vector<1x256xf32> to vector<16x256xf32>
    %42 = arith.addf %39, %41 : vector<16x256xf32>
    %43 = vector.extract_strided_slice %32 {offsets = [0, 0], sizes = [16, 64], strides = [1, 1]} : vector<16x256xf32> to vector<16x64xf32>
    %44 = vector.extract_strided_slice %37 {offsets = [0, 0], sizes = [16, 64], strides = [1, 1]} : vector<16x256xf32> to vector<16x64xf32>
    %45 = vector.extract_strided_slice %42 {offsets = [0, 0], sizes = [16, 64], strides = [1, 1]} : vector<16x256xf32> to vector<16x64xf32>
    %cst_30 = arith.constant dense<0.000000e+00> : vector<16x16xf32>
    %46 = tpu.matmul %43, %44, %cst_30 {dimension_numbers = #tpu.dot_dimension_numbers<[1], [1], [0], [0], [0, 0, 1, 0], [], []>} : vector<16x64xf32>, vector<16x64xf32>, vector<16x16xf32> -> vector<16x16xf32>
    %cst_31 = arith.constant 1.250000e-01 : f32
    %47 = vector.broadcast %cst_31 : f32 to vector<16x16xf32>
    %48 = arith.mulf %46, %47 : vector<16x16xf32>
    %cst_32 = arith.constant dense<0xFF800000> : vector<16xf32>
    %49 = vector.multi_reduction <maximumf>, %48, %cst_32 [1] : vector<16x16xf32> to vector<16xf32>
    %50 = vector.shape_cast %49 : vector<16xf32> to vector<16x1xf32>
    %51 = vector.broadcast %50 : vector<16x1xf32> to vector<16x16xf32>
    %52 = arith.subf %48, %51 : vector<16x16xf32>
    %53 = math.exp %52 : vector<16x16xf32>
    %cst_33 = arith.constant dense<0.000000e+00> : vector<16xf32>
    %54 = vector.multi_reduction <add>, %53, %cst_33 [1] : vector<16x16xf32> to vector<16xf32>
    %55 = vector.shape_cast %54 : vector<16xf32> to vector<16x1xf32>
    %56 = tpu.reciprocal %55 {approx = true} : vector<16x1xf32> -> vector<16x1xf32>
    %57 = vector.broadcast %56 : vector<16x1xf32> to vector<16x16xf32>
    %58 = arith.mulf %53, %57 : vector<16x16xf32>
    %cst_34 = arith.constant dense<0.000000e+00> : vector<16x64xf32>
    %59 = tpu.matmul %58, %45, %cst_34 {dimension_numbers = #tpu.dot_dimension_numbers<[1], [0], [0], [1], [0, 0, 1, 1], [], []>} : vector<16x16xf32>, vector<16x64xf32>, vector<16x64xf32> -> vector<16x64xf32>
    %c0_35 = arith.constant 0 : index
    %c0_36 = arith.constant 0 : index
    %60 = vector.load %arg21[%c0_35, %c0_36] : memref<16x256xf32, #tpu.memory_space<vmem>>, vector<16x64xf32>
    tpu.vector_store %arg21[%c0_35, %c0_36], %59 {strides = array<i32>} : memref<16x256xf32, #tpu.memory_space<vmem>>, vector<16x64xf32>,
    %61 = vector.extract_strided_slice %32 {offsets = [0, 64], sizes = [16, 64], strides = [1, 1]} : vector<16x256xf32> to vector<16x64xf32>
    %62 = vector.extract_strided_slice %37 {offsets = [0, 64], sizes = [16, 64], strides = [1, 1]} : vector<16x256xf32> to vector<16x64xf32>
    %63 = vector.extract_strided_slice %42 {offsets = [0, 64], sizes = [16, 64], strides = [1, 1]} : vector<16x256xf32> to vector<16x64xf32>
    %cst_37 = arith.constant dense<0.000000e+00> : vector<16x16xf32>
    %64 = tpu.matmul %61, %62, %cst_37 {dimension_numbers = #tpu.dot_dimension_numbers<[1], [1], [0], [0], [0, 0, 1, 0], [], []>} : vector<16x64xf32>, vector<16x64xf32>, vector<16x16xf32> -> vector<16x16xf32>
    %cst_38 = arith.constant 1.250000e-01 : f32
    %65 = vector.broadcast %cst_38 : f32 to vector<16x16xf32>
    %66 = arith.mulf %64, %65 : vector<16x16xf32>
    %cst_39 = arith.constant dense<0xFF800000> : vector<16xf32>
    %67 = vector.multi_reduction <maximumf>, %66, %cst_39 [1] : vector<16x16xf32> to vector<16xf32>
    %68 = vector.shape_cast %67 : vector<16xf32> to vector<16x1xf32>
    %69 = vector.broadcast %68 : vector<16x1xf32> to vector<16x16xf32>
    %70 = arith.subf %66, %69 : vector<16x16xf32>
    %71 = math.exp %70 : vector<16x16xf32>
    %cst_40 = arith.constant dense<0.000000e+00> : vector<16xf32>
    %72 = vector.multi_reduction <add>, %71, %cst_40 [1] : vector<16x16xf32> to vector<16xf32>
    %73 = vector.shape_cast %72 : vector<16xf32> to vector<16x1xf32>
    %74 = tpu.reciprocal %73 {approx = true} : vector<16x1xf32> -> vector<16x1xf32>
    %75 = vector.broadcast %74 : vector<16x1xf32> to vector<16x16xf32>
    %76 = arith.mulf %71, %75 : vector<16x16xf32>
    %cst_41 = arith.constant dense<0.000000e+00> : vector<16x64xf32>
    %77 = tpu.matmul %76, %63, %cst_41 {dimension_numbers = #tpu.dot_dimension_numbers<[1], [0], [0], [1], [0, 0, 1, 1], [], []>} : vector<16x16xf32>, vector<16x64xf32>, vector<16x64xf32> -> vector<16x64xf32>
    %c0_42 = arith.constant 0 : index
    %c64 = arith.constant 64 : index
    %78 = vector.load %arg21[%c0_42, %c64] : memref<16x256xf32, #tpu.memory_space<vmem>>, vector<16x64xf32>
    tpu.vector_store %arg21[%c0_42, %c64], %77 {strides = array<i32>} : memref<16x256xf32, #tpu.memory_space<vmem>>, vector<16x64xf32>,
    %79 = vector.extract_strided_slice %32 {offsets = [0, 128], sizes = [16, 64], strides = [1, 1]} : vector<16x256xf32> to vector<16x64xf32>
    %80 = vector.extract_strided_slice %37 {offsets = [0, 128], sizes = [16, 64], strides = [1, 1]} : vector<16x256xf32> to vector<16x64xf32>
    %81 = vector.extract_strided_slice %42 {offsets = [0, 128], sizes = [16, 64], strides = [1, 1]} : vector<16x256xf32> to vector<16x64xf32>
    %cst_43 = arith.constant dense<0.000000e+00> : vector<16x16xf32>
    %82 = tpu.matmul %79, %80, %cst_43 {dimension_numbers = #tpu.dot_dimension_numbers<[1], [1], [0], [0], [0, 0, 1, 0], [], []>} : vector<16x64xf32>, vector<16x64xf32>, vector<16x16xf32> -> vector<16x16xf32>
    %cst_44 = arith.constant 1.250000e-01 : f32
    %83 = vector.broadcast %cst_44 : f32 to vector<16x16xf32>
    %84 = arith.mulf %82, %83 : vector<16x16xf32>
    %cst_45 = arith.constant dense<0xFF800000> : vector<16xf32>
    %85 = vector.multi_reduction <maximumf>, %84, %cst_45 [1] : vector<16x16xf32> to vector<16xf32>
    %86 = vector.shape_cast %85 : vector<16xf32> to vector<16x1xf32>
    %87 = vector.broadcast %86 : vector<16x1xf32> to vector<16x16xf32>
    %88 = arith.subf %84, %87 : vector<16x16xf32>
    %89 = math.exp %88 : vector<16x16xf32>
    %cst_46 = arith.constant dense<0.000000e+00> : vector<16xf32>
    %90 = vector.multi_reduction <add>, %89, %cst_46 [1] : vector<16x16xf32> to vector<16xf32>
    %91 = vector.shape_cast %90 : vector<16xf32> to vector<16x1xf32>
    %92 = tpu.reciprocal %91 {approx = true} : vector<16x1xf32> -> vector<16x1xf32>
    %93 = vector.broadcast %92 : vector<16x1xf32> to vector<16x16xf32>
    %94 = arith.mulf %89, %93 : vector<16x16xf32>
    %cst_47 = arith.constant dense<0.000000e+00> : vector<16x64xf32>
    %95 = tpu.matmul %94, %81, %cst_47 {dimension_numbers = #tpu.dot_dimension_numbers<[1], [0], [0], [1], [0, 0, 1, 1], [], []>} : vector<16x16xf32>, vector<16x64xf32>, vector<16x64xf32> -> vector<16x64xf32>
    %c0_48 = arith.constant 0 : index
    %c128 = arith.constant 128 : index
    %96 = vector.load %arg21[%c0_48, %c128] : memref<16x256xf32, #tpu.memory_space<vmem>>, vector<16x64xf32>
    tpu.vector_store %arg21[%c0_48, %c128], %95 {strides = array<i32>} : memref<16x256xf32, #tpu.memory_space<vmem>>, vector<16x64xf32>,
    %97 = vector.extract_strided_slice %32 {offsets = [0, 192], sizes = [16, 64], strides = [1, 1]} : vector<16x256xf32> to vector<16x64xf32>
    %98 = vector.extract_strided_slice %37 {offsets = [0, 192], sizes = [16, 64], strides = [1, 1]} : vector<16x256xf32> to vector<16x64xf32>
    %99 = vector.extract_strided_slice %42 {offsets = [0, 192], sizes = [16, 64], strides = [1, 1]} : vector<16x256xf32> to vector<16x64xf32>
    %cst_49 = arith.constant dense<0.000000e+00> : vector<16x16xf32>
    %100 = tpu.matmul %97, %98, %cst_49 {dimension_numbers = #tpu.dot_dimension_numbers<[1], [1], [0], [0], [0, 0, 1, 0], [], []>} : vector<16x64xf32>, vector<16x64xf32>, vector<16x16xf32> -> vector<16x16xf32>
    %cst_50 = arith.constant 1.250000e-01 : f32
    %101 = vector.broadcast %cst_50 : f32 to vector<16x16xf32>
    %102 = arith.mulf %100, %101 : vector<16x16xf32>
    %cst_51 = arith.constant dense<0xFF800000> : vector<16xf32>
    %103 = vector.multi_reduction <maximumf>, %102, %cst_51 [1] : vector<16x16xf32> to vector<16xf32>
    %104 = vector.shape_cast %103 : vector<16xf32> to vector<16x1xf32>
    %105 = vector.broadcast %104 : vector<16x1xf32> to vector<16x16xf32>
    %106 = arith.subf %102, %105 : vector<16x16xf32>
    %107 = math.exp %106 : vector<16x16xf32>
    %cst_52 = arith.constant dense<0.000000e+00> : vector<16xf32>
    %108 = vector.multi_reduction <add>, %107, %cst_52 [1] : vector<16x16xf32> to vector<16xf32>
    %109 = vector.shape_cast %108 : vector<16xf32> to vector<16x1xf32>
    %110 = tpu.reciprocal %109 {approx = true} : vector<16x1xf32> -> vector<16x1xf32>
    %111 = vector.broadcast %110 : vector<16x1xf32> to vector<16x16xf32>
    %112 = arith.mulf %107, %111 : vector<16x16xf32>
    %cst_53 = arith.constant dense<0.000000e+00> : vector<16x64xf32>
    %113 = tpu.matmul %112, %99, %cst_53 {dimension_numbers = #tpu.dot_dimension_numbers<[1], [0], [0], [1], [0, 0, 1, 1], [], []>} : vector<16x16xf32>, vector<16x64xf32>, vector<16x64xf32> -> vector<16x64xf32>
    %c0_54 = arith.constant 0 : index
    %c192 = arith.constant 192 : index
    %114 = vector.load %arg21[%c0_54, %c192] : memref<16x256xf32, #tpu.memory_space<vmem>>, vector<16x64xf32>
    tpu.vector_store %arg21[%c0_54, %c192], %113 {strides = array<i32>} : memref<16x256xf32, #tpu.memory_space<vmem>>, vector<16x64xf32>,
    %c0_55 = arith.constant 0 : index
    %c0_56 = arith.constant 0 : index
    %115 = vector.load %arg21[%c0_55, %c0_56] : memref<16x256xf32, #tpu.memory_space<vmem>>, vector<16x256xf32>
    %c0_57 = arith.constant 0 : index
    %c0_58 = arith.constant 0 : index
    %116 = vector.load %arg12[%c0_57, %c0_58] : memref<1x256xf32, #tpu.memory_space<vmem>>, vector<1x256xf32>
    %c0_59 = arith.constant 0 : index
    %c0_60 = arith.constant 0 : index
    %117 = vector.load %arg13[%c0_59, %c0_60] : memref<1x256xf32, #tpu.memory_space<vmem>>, vector<1x256xf32>
    %cst_61 = arith.constant dense<0.000000e+00> : vector<16xf32>
    %118 = vector.multi_reduction <add>, %115, %cst_61 [1] : vector<16x256xf32> to vector<16xf32>
    %119 = vector.shape_cast %118 : vector<16xf32> to vector<16x1xf32>
    %cst_62 = arith.constant 2.560000e+02 : f32
    %120 = vector.broadcast %cst_62 : f32 to vector<16x1xf32>
    %121 = arith.divf %119, %120 : vector<16x1xf32>
    %122 = vector.broadcast %121 : vector<16x1xf32> to vector<16x256xf32>
    %123 = arith.subf %115, %122 : vector<16x256xf32>
    %124 = arith.mulf %123, %123 : vector<16x256xf32>
    %cst_63 = arith.constant dense<0.000000e+00> : vector<16xf32>
    %125 = vector.multi_reduction <add>, %124, %cst_63 [1] : vector<16x256xf32> to vector<16xf32>
    %126 = vector.shape_cast %125 : vector<16xf32> to vector<16x1xf32>
    %cst_64 = arith.constant 2.560000e+02 : f32
    %127 = vector.broadcast %cst_64 : f32 to vector<16x1xf32>
    %128 = arith.divf %126, %127 : vector<16x1xf32>
    %cst_65 = arith.constant 9.99999974E-6 : f32
    %129 = vector.broadcast %cst_65 : f32 to vector<16x1xf32>
    %130 = arith.addf %128, %129 : vector<16x1xf32>
    %131 = math.rsqrt %130 : vector<16x1xf32>
    %132 = vector.broadcast %131 : vector<16x1xf32> to vector<16x256xf32>
    %133 = arith.mulf %123, %132 : vector<16x256xf32>
    %134 = vector.broadcast %116 : vector<1x256xf32> to vector<16x256xf32>
    %135 = arith.mulf %133, %134 : vector<16x256xf32>
    %136 = vector.broadcast %117 : vector<1x256xf32> to vector<16x256xf32>
    %137 = arith.addf %135, %136 : vector<16x256xf32>
    %138 = arith.addf %3, %137 : vector<16x256xf32>
    %c0_66 = arith.constant 0 : index
    %c0_67 = arith.constant 0 : index
    %139 = vector.load %arg14[%c0_66, %c0_67] : memref<256x512xf32, #tpu.memory_space<vmem>>, vector<256x512xf32>
    %cst_68 = arith.constant dense<0.000000e+00> : vector<16x512xf32>
    %140 = tpu.matmul %138, %139, %cst_68 {dimension_numbers = #tpu.dot_dimension_numbers<[1], [0], [0], [1], [0, 0, 1, 1], [], []>} : vector<16x256xf32>, vector<256x512xf32>, vector<16x512xf32> -> vector<16x512xf32>
    %c0_69 = arith.constant 0 : index
    %c0_70 = arith.constant 0 : index
    %141 = vector.load %arg15[%c0_69, %c0_70] : memref<1x512xf32, #tpu.memory_space<vmem>>, vector<1x512xf32>
    %142 = vector.broadcast %141 : vector<1x512xf32> to vector<16x512xf32>
    %143 = arith.addf %140, %142 : vector<16x512xf32>
    %cst_71 = arith.constant 0.000000e+00 : f32
    %144 = vector.broadcast %cst_71 : f32 to vector<16x512xf32>
    %145 = arith.maximumf %143, %144 : vector<16x512xf32>
    %c0_72 = arith.constant 0 : index
    %c0_73 = arith.constant 0 : index
    %146 = vector.load %arg16[%c0_72, %c0_73] : memref<512x256xf32, #tpu.memory_space<vmem>>, vector<512x256xf32>
    %cst_74 = arith.constant dense<0.000000e+00> : vector<16x256xf32>
    %147 = tpu.matmul %145, %146, %cst_74 {dimension_numbers = #tpu.dot_dimension_numbers<[1], [0], [0], [1], [0, 0, 1, 1], [], []>} : vector<16x512xf32>, vector<512x256xf32>, vector<16x256xf32> -> vector<16x256xf32>
    %c0_75 = arith.constant 0 : index
    %c0_76 = arith.constant 0 : index
    %148 = vector.load %arg17[%c0_75, %c0_76] : memref<1x256xf32, #tpu.memory_space<vmem>>, vector<1x256xf32>
    %149 = vector.broadcast %148 : vector<1x256xf32> to vector<16x256xf32>
    %150 = arith.addf %147, %149 : vector<16x256xf32>
    %c0_77 = arith.constant 0 : index
    %c0_78 = arith.constant 0 : index
    %151 = vector.load %arg18[%c0_77, %c0_78] : memref<1x256xf32, #tpu.memory_space<vmem>>, vector<1x256xf32>
    %c0_79 = arith.constant 0 : index
    %c0_80 = arith.constant 0 : index
    %152 = vector.load %arg19[%c0_79, %c0_80] : memref<1x256xf32, #tpu.memory_space<vmem>>, vector<1x256xf32>
    %cst_81 = arith.constant dense<0.000000e+00> : vector<16xf32>
    %153 = vector.multi_reduction <add>, %150, %cst_81 [1] : vector<16x256xf32> to vector<16xf32>
    %154 = vector.shape_cast %153 : vector<16xf32> to vector<16x1xf32>
    %cst_82 = arith.constant 2.560000e+02 : f32
    %155 = vector.broadcast %cst_82 : f32 to vector<16x1xf32>
    %156 = arith.divf %154, %155 : vector<16x1xf32>
    %157 = vector.broadcast %156 : vector<16x1xf32> to vector<16x256xf32>
    %158 = arith.subf %150, %157 : vector<16x256xf32>
    %159 = arith.mulf %158, %158 : vector<16x256xf32>
    %cst_83 = arith.constant dense<0.000000e+00> : vector<16xf32>
    %160 = vector.multi_reduction <add>, %159, %cst_83 [1] : vector<16x256xf32> to vector<16xf32>
    %161 = vector.shape_cast %160 : vector<16xf32> to vector<16x1xf32>
    %cst_84 = arith.constant 2.560000e+02 : f32
    %162 = vector.broadcast %cst_84 : f32 to vector<16x1xf32>
    %163 = arith.divf %161, %162 : vector<16x1xf32>
    %cst_85 = arith.constant 9.99999974E-6 : f32
    %164 = vector.broadcast %cst_85 : f32 to vector<16x1xf32>
    %165 = arith.addf %163, %164 : vector<16x1xf32>
    %166 = math.rsqrt %165 : vector<16x1xf32>
    %167 = vector.broadcast %166 : vector<16x1xf32> to vector<16x256xf32>
    %168 = arith.mulf %158, %167 : vector<16x256xf32>
    %169 = vector.broadcast %151 : vector<1x256xf32> to vector<16x256xf32>
    %170 = arith.mulf %168, %169 : vector<16x256xf32>
    %171 = vector.broadcast %152 : vector<1x256xf32> to vector<16x256xf32>
    %172 = arith.addf %170, %171 : vector<16x256xf32>
    %173 = arith.addf %138, %172 : vector<16x256xf32>
    %c0_86 = arith.constant 0 : index
    %c0_87 = arith.constant 0 : index
    %c0_88 = arith.constant 0 : index
    %174 = vector.load %arg20[%c0_86, %c0_87, %c0_88] : memref<1x16x256xf32, #tpu.memory_space<vmem>>, vector<1x16x256xf32>
    %175 = vector.shape_cast %174 : vector<1x16x256xf32> to vector<16x256xf32>
    %176 = vector.shape_cast %173 : vector<16x256xf32> to vector<1x16x256xf32>
    tpu.vector_store %arg20[%c0_86, %c0_87, %c0_88], %176 {strides = array<i32>} : memref<1x16x256xf32, #tpu.memory_space<vmem>>, vector<1x16x256xf32>,
    return
  }
  func.func @transform_0(%arg0: i32) -> (i32, i32, i32) {
    %c0_i32 = arith.constant 0 : i32
    %c0_i32_0 = arith.constant 0 : i32
    %c0_i32_1 = arith.constant 0 : i32
    return %arg0, %c0_i32, %c0_i32_0 : i32, i32, i32
  }
  func.func @transform_1(%arg0: i32) -> (i32, i32) {
    %c0_i32 = arith.constant 0 : i32
    %c0_i32_0 = arith.constant 0 : i32
    %c0_i32_1 = arith.constant 0 : i32
    return %c0_i32, %c0_i32_0 : i32, i32
  }
  func.func @transform_2(%arg0: i32) -> (i32, i32) {
    %c0_i32 = arith.constant 0 : i32
    %c0_i32_0 = arith.constant 0 : i32
    %c0_i32_1 = arith.constant 0 : i32
    return %c0_i32, %c0_i32_0 : i32, i32
  }
  func.func @transform_3(%arg0: i32) -> (i32, i32) {
    %c0_i32 = arith.constant 0 : i32
    %c0_i32_0 = arith.constant 0 : i32
    %c0_i32_1 = arith.constant 0 : i32
    return %c0_i32, %c0_i32_0 : i32, i32
  }
  func.func @transform_4(%arg0: i32) -> (i32, i32) {
    %c0_i32 = arith.constant 0 : i32
    %c0_i32_0 = arith.constant 0 : i32
    %c0_i32_1 = arith.constant 0 : i32
    return %c0_i32, %c0_i32_0 : i32, i32
  }
  func.func @transform_5(%arg0: i32) -> (i32, i32) {
    %c0_i32 = arith.constant 0 : i32
    %c0_i32_0 = arith.constant 0 : i32
    %c0_i32_1 = arith.constant 0 : i32
    return %c0_i32, %c0_i32_0 : i32, i32
  }
  func.func @transform_6(%arg0: i32) -> (i32, i32) {
    %c0_i32 = arith.constant 0 : i32
    %c0_i32_0 = arith.constant 0 : i32
    %c0_i32_1 = arith.constant 0 : i32
    return %c0_i32, %c0_i32_0 : i32, i32
  }
  func.func @transform_7(%arg0: i32) -> (i32, i32) {
    %c0_i32 = arith.constant 0 : i32
    %c0_i32_0 = arith.constant 0 : i32
    %c0_i32_1 = arith.constant 0 : i32
    return %c0_i32, %c0_i32_0 : i32, i32
  }
  func.func @transform_8(%arg0: i32) -> (i32, i32) {
    %c0_i32 = arith.constant 0 : i32
    %c0_i32_0 = arith.constant 0 : i32
    %c0_i32_1 = arith.constant 0 : i32
    return %c0_i32, %c0_i32_0 : i32, i32
  }
  func.func @transform_9(%arg0: i32) -> (i32, i32) {
    %c0_i32 = arith.constant 0 : i32
    %c0_i32_0 = arith.constant 0 : i32
    %c0_i32_1 = arith.constant 0 : i32
    return %c0_i32, %c0_i32_0 : i32, i32
  }
  func.func @transform_10(%arg0: i32) -> (i32, i32) {
    %c0_i32 = arith.constant 0 : i32
    %c0_i32_0 = arith.constant 0 : i32
    %c0_i32_1 = arith.constant 0 : i32
    return %c0_i32, %c0_i32_0 : i32, i32
  }
  func.func @transform_11(%arg0: i32) -> (i32, i32) {
    %c0_i32 = arith.constant 0 : i32
    %c0_i32_0 = arith.constant 0 : i32
    %c0_i32_1 = arith.constant 0 : i32
    return %c0_i32, %c0_i32_0 : i32, i32
  }
  func.func @transform_12(%arg0: i32) -> (i32, i32) {
    %c0_i32 = arith.constant 0 : i32
    %c0_i32_0 = arith.constant 0 : i32
    %c0_i32_1 = arith.constant 0 : i32
    return %c0_i32, %c0_i32_0 : i32, i32
  }
  func.func @transform_13(%arg0: i32) -> (i32, i32) {
    %c0_i32 = arith.constant 0 : i32
    %c0_i32_0 = arith.constant 0 : i32
    %c0_i32_1 = arith.constant 0 : i32
    return %c0_i32, %c0_i32_0 : i32, i32
  }
  func.func @transform_14(%arg0: i32) -> (i32, i32) {
    %c0_i32 = arith.constant 0 : i32
    %c0_i32_0 = arith.constant 0 : i32
    %c0_i32_1 = arith.constant 0 : i32
    return %c0_i32, %c0_i32_0 : i32, i32
  }
  func.func @transform_15(%arg0: i32) -> (i32, i32) {
    %c0_i32 = arith.constant 0 : i32
    %c0_i32_0 = arith.constant 0 : i32
    %c0_i32_1 = arith.constant 0 : i32
    return %c0_i32, %c0_i32_0 : i32, i32
  }
  func.func @transform_16(%arg0: i32) -> (i32, i32) {
    %c0_i32 = arith.constant 0 : i32
    %c0_i32_0 = arith.constant 0 : i32
    %c0_i32_1 = arith.constant 0 : i32
    return %c0_i32, %c0_i32_0 : i32, i32
  }
  func.func @transform_17(%arg0: i32) -> (i32, i32) {
    %c0_i32 = arith.constant 0 : i32
    %c0_i32_0 = arith.constant 0 : i32
    %c0_i32_1 = arith.constant 0 : i32
    return %c0_i32, %c0_i32_0 : i32, i32
  }
  func.func @transform_18(%arg0: i32) -> (i32, i32) {
    %c0_i32 = arith.constant 0 : i32
    %c0_i32_0 = arith.constant 0 : i32
    %c0_i32_1 = arith.constant 0 : i32
    return %c0_i32, %c0_i32_0 : i32, i32
  }
  func.func @transform_19(%arg0: i32) -> (i32, i32, i32) {
    %c0_i32 = arith.constant 0 : i32
    %c0_i32_0 = arith.constant 0 : i32
    %c0_i32_1 = arith.constant 0 : i32
    return %arg0, %c0_i32, %c0_i32_0 : i32, i32, i32
  }
}

module attributes {stable_mosaic.version = 11 : i64} {
  func.func @_encoder_block_kernel(%arg0: i32, %arg1: memref<1x16x256xf32, #tpu.memory_space<vmem>>, %arg2: memref<256x256xf32, #tpu.memory_space<vmem>>, %arg3: memref<1x256xf32, #tpu.memory_space<vmem>>, %arg4: memref<1x256xf32, #tpu.memory_space<vmem>>, %arg5: memref<256x256xf32, #tpu.memory_space<vmem>>, %arg6: memref<1x256xf32, #tpu.memory_space<vmem>>, %arg7: memref<256x256xf32, #tpu.memory_space<vmem>>, %arg8: memref<1x256xf32, #tpu.memory_space<vmem>>, %arg9: memref<256x256xf32, #tpu.memory_space<vmem>>, %arg10: memref<1x256xf32, #tpu.memory_space<vmem>>, %arg11: memref<1x256xf32, #tpu.memory_space<vmem>>, %arg12: memref<1x256xf32, #tpu.memory_space<vmem>>, %arg13: memref<256x512xf32, #tpu.memory_space<vmem>>, %arg14: memref<1x512xf32, #tpu.memory_space<vmem>>, %arg15: memref<512x256xf32, #tpu.memory_space<vmem>>, %arg16: memref<1x256xf32, #tpu.memory_space<vmem>>, %arg17: memref<1x256xf32, #tpu.memory_space<vmem>>, %arg18: memref<1x256xf32, #tpu.memory_space<vmem>>, %arg19: memref<1x16x256xf32, #tpu.memory_space<vmem>>, %arg20: memref<16x256xf32, #tpu.memory_space<vmem>>) attributes {dimension_semantics = [#tpu.dimension_semantics<parallel>], iteration_bounds = array<i64: 2>, scalar_prefetch = 0 : i64, scratch_operands = 1 : i64, tpu.core_type = #tpu.core_type<tc>, window_params = [{transform_indices = @transform_0, window_bounds = array<i64: 1, 16, 256>}, {pipeline_mode = #tpu.pipeline_mode<synchronous>, transform_indices = @transform_1, window_bounds = array<i64: 256, 256>}, {pipeline_mode = #tpu.pipeline_mode<synchronous>, transform_indices = @transform_2, window_bounds = array<i64: 1, 256>}, {pipeline_mode = #tpu.pipeline_mode<synchronous>, transform_indices = @transform_3, window_bounds = array<i64: 1, 256>}, {pipeline_mode = #tpu.pipeline_mode<synchronous>, transform_indices = @transform_4, window_bounds = array<i64: 256, 256>}, {pipeline_mode = #tpu.pipeline_mode<synchronous>, transform_indices = @transform_5, window_bounds = array<i64: 1, 256>}, {pipeline_mode = #tpu.pipeline_mode<synchronous>, transform_indices = @transform_6, window_bounds = array<i64: 256, 256>}, {pipeline_mode = #tpu.pipeline_mode<synchronous>, transform_indices = @transform_7, window_bounds = array<i64: 1, 256>}, {pipeline_mode = #tpu.pipeline_mode<synchronous>, transform_indices = @transform_8, window_bounds = array<i64: 256, 256>}, {pipeline_mode = #tpu.pipeline_mode<synchronous>, transform_indices = @transform_9, window_bounds = array<i64: 1, 256>}, {pipeline_mode = #tpu.pipeline_mode<synchronous>, transform_indices = @transform_10, window_bounds = array<i64: 1, 256>}, {pipeline_mode = #tpu.pipeline_mode<synchronous>, transform_indices = @transform_11, window_bounds = array<i64: 1, 256>}, {pipeline_mode = #tpu.pipeline_mode<synchronous>, transform_indices = @transform_12, window_bounds = array<i64: 256, 512>}, {pipeline_mode = #tpu.pipeline_mode<synchronous>, transform_indices = @transform_13, window_bounds = array<i64: 1, 512>}, {pipeline_mode = #tpu.pipeline_mode<synchronous>, transform_indices = @transform_14, window_bounds = array<i64: 512, 256>}, {pipeline_mode = #tpu.pipeline_mode<synchronous>, transform_indices = @transform_15, window_bounds = array<i64: 1, 256>}, {pipeline_mode = #tpu.pipeline_mode<synchronous>, transform_indices = @transform_16, window_bounds = array<i64: 1, 256>}, {pipeline_mode = #tpu.pipeline_mode<synchronous>, transform_indices = @transform_17, window_bounds = array<i64: 1, 256>}, {transform_indices = @transform_18, window_bounds = array<i64: 1, 16, 256>}]} {
    %c0 = arith.constant 0 : index
    %c0_0 = arith.constant 0 : index
    %c0_1 = arith.constant 0 : index
    %0 = vector.load %arg1[%c0, %c0_0, %c0_1] : memref<1x16x256xf32, #tpu.memory_space<vmem>>, vector<1x16x256xf32>
    %1 = vector.shape_cast %0 : vector<1x16x256xf32> to vector<16x256xf32>
    %c0_2 = arith.constant 0 : index
    %c0_3 = arith.constant 0 : index
    %2 = vector.load %arg2[%c0_2, %c0_3] : memref<256x256xf32, #tpu.memory_space<vmem>>, vector<256x256xf32>
    %cst = arith.constant dense<0.000000e+00> : vector<16x256xf32>
    %3 = tpu.matmul %1, %2, %cst {dimension_numbers = #tpu.dot_dimension_numbers<[1], [0], [0], [1], [0, 0, 1, 1], [], []>} : vector<16x256xf32>, vector<256x256xf32>, vector<16x256xf32> -> vector<16x256xf32>
    %c0_4 = arith.constant 0 : index
    %c0_5 = arith.constant 0 : index
    %4 = vector.load %arg3[%c0_4, %c0_5] : memref<1x256xf32, #tpu.memory_space<vmem>>, vector<1x256xf32>
    %c0_6 = arith.constant 0 : index
    %c0_7 = arith.constant 0 : index
    %5 = vector.load %arg4[%c0_6, %c0_7] : memref<1x256xf32, #tpu.memory_space<vmem>>, vector<1x256xf32>
    %cst_8 = arith.constant dense<0.000000e+00> : vector<16xf32>
    %6 = vector.multi_reduction <add>, %3, %cst_8 [1] : vector<16x256xf32> to vector<16xf32>
    %7 = vector.shape_cast %6 : vector<16xf32> to vector<16x1xf32>
    %cst_9 = arith.constant 2.560000e+02 : f32
    %8 = vector.broadcast %cst_9 : f32 to vector<16x1xf32>
    %9 = arith.divf %7, %8 : vector<16x1xf32>
    %10 = vector.broadcast %9 : vector<16x1xf32> to vector<16x256xf32>
    %11 = arith.subf %3, %10 : vector<16x256xf32>
    %12 = arith.mulf %11, %11 : vector<16x256xf32>
    %cst_10 = arith.constant dense<0.000000e+00> : vector<16xf32>
    %13 = vector.multi_reduction <add>, %12, %cst_10 [1] : vector<16x256xf32> to vector<16xf32>
    %14 = vector.shape_cast %13 : vector<16xf32> to vector<16x1xf32>
    %cst_11 = arith.constant 2.560000e+02 : f32
    %15 = vector.broadcast %cst_11 : f32 to vector<16x1xf32>
    %16 = arith.divf %14, %15 : vector<16x1xf32>
    %cst_12 = arith.constant 9.99999974E-6 : f32
    %17 = vector.broadcast %cst_12 : f32 to vector<16x1xf32>
    %18 = arith.addf %16, %17 : vector<16x1xf32>
    %19 = math.rsqrt %18 : vector<16x1xf32>
    %20 = vector.broadcast %19 : vector<16x1xf32> to vector<16x256xf32>
    %21 = arith.mulf %11, %20 : vector<16x256xf32>
    %22 = vector.broadcast %4 : vector<1x256xf32> to vector<16x256xf32>
    %23 = arith.mulf %21, %22 : vector<16x256xf32>
    %24 = vector.broadcast %5 : vector<1x256xf32> to vector<16x256xf32>
    %25 = arith.addf %23, %24 : vector<16x256xf32>
    %c0_13 = arith.constant 0 : index
    %c0_14 = arith.constant 0 : index
    %26 = vector.load %arg5[%c0_13, %c0_14] : memref<256x256xf32, #tpu.memory_space<vmem>>, vector<256x256xf32>
    %cst_15 = arith.constant dense<0.000000e+00> : vector<16x256xf32>
    %27 = tpu.matmul %25, %26, %cst_15 {dimension_numbers = #tpu.dot_dimension_numbers<[1], [0], [0], [1], [0, 0, 1, 1], [], []>} : vector<16x256xf32>, vector<256x256xf32>, vector<16x256xf32> -> vector<16x256xf32>
    %c0_16 = arith.constant 0 : index
    %c0_17 = arith.constant 0 : index
    %28 = vector.load %arg6[%c0_16, %c0_17] : memref<1x256xf32, #tpu.memory_space<vmem>>, vector<1x256xf32>
    %29 = vector.broadcast %28 : vector<1x256xf32> to vector<16x256xf32>
    %30 = arith.addf %27, %29 : vector<16x256xf32>
    %c0_18 = arith.constant 0 : index
    %c0_19 = arith.constant 0 : index
    %31 = vector.load %arg7[%c0_18, %c0_19] : memref<256x256xf32, #tpu.memory_space<vmem>>, vector<256x256xf32>
    %cst_20 = arith.constant dense<0.000000e+00> : vector<16x256xf32>
    %32 = tpu.matmul %25, %31, %cst_20 {dimension_numbers = #tpu.dot_dimension_numbers<[1], [0], [0], [1], [0, 0, 1, 1], [], []>} : vector<16x256xf32>, vector<256x256xf32>, vector<16x256xf32> -> vector<16x256xf32>
    %c0_21 = arith.constant 0 : index
    %c0_22 = arith.constant 0 : index
    %33 = vector.load %arg8[%c0_21, %c0_22] : memref<1x256xf32, #tpu.memory_space<vmem>>, vector<1x256xf32>
    %34 = vector.broadcast %33 : vector<1x256xf32> to vector<16x256xf32>
    %35 = arith.addf %32, %34 : vector<16x256xf32>
    %c0_23 = arith.constant 0 : index
    %c0_24 = arith.constant 0 : index
    %36 = vector.load %arg9[%c0_23, %c0_24] : memref<256x256xf32, #tpu.memory_space<vmem>>, vector<256x256xf32>
    %cst_25 = arith.constant dense<0.000000e+00> : vector<16x256xf32>
    %37 = tpu.matmul %25, %36, %cst_25 {dimension_numbers = #tpu.dot_dimension_numbers<[1], [0], [0], [1], [0, 0, 1, 1], [], []>} : vector<16x256xf32>, vector<256x256xf32>, vector<16x256xf32> -> vector<16x256xf32>
    %c0_26 = arith.constant 0 : index
    %c0_27 = arith.constant 0 : index
    %38 = vector.load %arg10[%c0_26, %c0_27] : memref<1x256xf32, #tpu.memory_space<vmem>>, vector<1x256xf32>
    %39 = vector.broadcast %38 : vector<1x256xf32> to vector<16x256xf32>
    %40 = arith.addf %37, %39 : vector<16x256xf32>
    %41 = vector.extract_strided_slice %30 {offsets = [0, 0], sizes = [16, 64], strides = [1, 1]} : vector<16x256xf32> to vector<16x64xf32>
    %42 = vector.extract_strided_slice %35 {offsets = [0, 0], sizes = [16, 64], strides = [1, 1]} : vector<16x256xf32> to vector<16x64xf32>
    %43 = vector.extract_strided_slice %40 {offsets = [0, 0], sizes = [16, 64], strides = [1, 1]} : vector<16x256xf32> to vector<16x64xf32>
    %cst_28 = arith.constant dense<0.000000e+00> : vector<16x16xf32>
    %44 = tpu.matmul %41, %42, %cst_28 {dimension_numbers = #tpu.dot_dimension_numbers<[1], [1], [0], [0], [0, 0, 1, 0], [], []>} : vector<16x64xf32>, vector<16x64xf32>, vector<16x16xf32> -> vector<16x16xf32>
    %cst_29 = arith.constant 1.250000e-01 : f32
    %45 = vector.broadcast %cst_29 : f32 to vector<16x16xf32>
    %46 = arith.mulf %44, %45 : vector<16x16xf32>
    %cst_30 = arith.constant dense<0xFF800000> : vector<16xf32>
    %47 = vector.multi_reduction <maximumf>, %46, %cst_30 [1] : vector<16x16xf32> to vector<16xf32>
    %48 = vector.shape_cast %47 : vector<16xf32> to vector<16x1xf32>
    %49 = vector.broadcast %48 : vector<16x1xf32> to vector<16x16xf32>
    %50 = arith.subf %46, %49 : vector<16x16xf32>
    %51 = math.exp %50 : vector<16x16xf32>
    %cst_31 = arith.constant dense<0.000000e+00> : vector<16xf32>
    %52 = vector.multi_reduction <add>, %51, %cst_31 [1] : vector<16x16xf32> to vector<16xf32>
    %53 = vector.shape_cast %52 : vector<16xf32> to vector<16x1xf32>
    %54 = tpu.reciprocal %53 {approx = true} : vector<16x1xf32> -> vector<16x1xf32>
    %55 = vector.broadcast %54 : vector<16x1xf32> to vector<16x16xf32>
    %56 = arith.mulf %51, %55 : vector<16x16xf32>
    %cst_32 = arith.constant dense<0.000000e+00> : vector<16x64xf32>
    %57 = tpu.matmul %56, %43, %cst_32 {dimension_numbers = #tpu.dot_dimension_numbers<[1], [0], [0], [1], [0, 0, 1, 1], [], []>} : vector<16x16xf32>, vector<16x64xf32>, vector<16x64xf32> -> vector<16x64xf32>
    %c0_33 = arith.constant 0 : index
    %c0_34 = arith.constant 0 : index
    %58 = vector.load %arg20[%c0_33, %c0_34] : memref<16x256xf32, #tpu.memory_space<vmem>>, vector<16x64xf32>
    tpu.vector_store %arg20[%c0_33, %c0_34], %57 {strides = array<i32>} : memref<16x256xf32, #tpu.memory_space<vmem>>, vector<16x64xf32>,
    %59 = vector.extract_strided_slice %30 {offsets = [0, 64], sizes = [16, 64], strides = [1, 1]} : vector<16x256xf32> to vector<16x64xf32>
    %60 = vector.extract_strided_slice %35 {offsets = [0, 64], sizes = [16, 64], strides = [1, 1]} : vector<16x256xf32> to vector<16x64xf32>
    %61 = vector.extract_strided_slice %40 {offsets = [0, 64], sizes = [16, 64], strides = [1, 1]} : vector<16x256xf32> to vector<16x64xf32>
    %cst_35 = arith.constant dense<0.000000e+00> : vector<16x16xf32>
    %62 = tpu.matmul %59, %60, %cst_35 {dimension_numbers = #tpu.dot_dimension_numbers<[1], [1], [0], [0], [0, 0, 1, 0], [], []>} : vector<16x64xf32>, vector<16x64xf32>, vector<16x16xf32> -> vector<16x16xf32>
    %cst_36 = arith.constant 1.250000e-01 : f32
    %63 = vector.broadcast %cst_36 : f32 to vector<16x16xf32>
    %64 = arith.mulf %62, %63 : vector<16x16xf32>
    %cst_37 = arith.constant dense<0xFF800000> : vector<16xf32>
    %65 = vector.multi_reduction <maximumf>, %64, %cst_37 [1] : vector<16x16xf32> to vector<16xf32>
    %66 = vector.shape_cast %65 : vector<16xf32> to vector<16x1xf32>
    %67 = vector.broadcast %66 : vector<16x1xf32> to vector<16x16xf32>
    %68 = arith.subf %64, %67 : vector<16x16xf32>
    %69 = math.exp %68 : vector<16x16xf32>
    %cst_38 = arith.constant dense<0.000000e+00> : vector<16xf32>
    %70 = vector.multi_reduction <add>, %69, %cst_38 [1] : vector<16x16xf32> to vector<16xf32>
    %71 = vector.shape_cast %70 : vector<16xf32> to vector<16x1xf32>
    %72 = tpu.reciprocal %71 {approx = true} : vector<16x1xf32> -> vector<16x1xf32>
    %73 = vector.broadcast %72 : vector<16x1xf32> to vector<16x16xf32>
    %74 = arith.mulf %69, %73 : vector<16x16xf32>
    %cst_39 = arith.constant dense<0.000000e+00> : vector<16x64xf32>
    %75 = tpu.matmul %74, %61, %cst_39 {dimension_numbers = #tpu.dot_dimension_numbers<[1], [0], [0], [1], [0, 0, 1, 1], [], []>} : vector<16x16xf32>, vector<16x64xf32>, vector<16x64xf32> -> vector<16x64xf32>
    %c0_40 = arith.constant 0 : index
    %c64 = arith.constant 64 : index
    %76 = vector.load %arg20[%c0_40, %c64] : memref<16x256xf32, #tpu.memory_space<vmem>>, vector<16x64xf32>
    tpu.vector_store %arg20[%c0_40, %c64], %75 {strides = array<i32>} : memref<16x256xf32, #tpu.memory_space<vmem>>, vector<16x64xf32>,
    %77 = vector.extract_strided_slice %30 {offsets = [0, 128], sizes = [16, 64], strides = [1, 1]} : vector<16x256xf32> to vector<16x64xf32>
    %78 = vector.extract_strided_slice %35 {offsets = [0, 128], sizes = [16, 64], strides = [1, 1]} : vector<16x256xf32> to vector<16x64xf32>
    %79 = vector.extract_strided_slice %40 {offsets = [0, 128], sizes = [16, 64], strides = [1, 1]} : vector<16x256xf32> to vector<16x64xf32>
    %cst_41 = arith.constant dense<0.000000e+00> : vector<16x16xf32>
    %80 = tpu.matmul %77, %78, %cst_41 {dimension_numbers = #tpu.dot_dimension_numbers<[1], [1], [0], [0], [0, 0, 1, 0], [], []>} : vector<16x64xf32>, vector<16x64xf32>, vector<16x16xf32> -> vector<16x16xf32>
    %cst_42 = arith.constant 1.250000e-01 : f32
    %81 = vector.broadcast %cst_42 : f32 to vector<16x16xf32>
    %82 = arith.mulf %80, %81 : vector<16x16xf32>
    %cst_43 = arith.constant dense<0xFF800000> : vector<16xf32>
    %83 = vector.multi_reduction <maximumf>, %82, %cst_43 [1] : vector<16x16xf32> to vector<16xf32>
    %84 = vector.shape_cast %83 : vector<16xf32> to vector<16x1xf32>
    %85 = vector.broadcast %84 : vector<16x1xf32> to vector<16x16xf32>
    %86 = arith.subf %82, %85 : vector<16x16xf32>
    %87 = math.exp %86 : vector<16x16xf32>
    %cst_44 = arith.constant dense<0.000000e+00> : vector<16xf32>
    %88 = vector.multi_reduction <add>, %87, %cst_44 [1] : vector<16x16xf32> to vector<16xf32>
    %89 = vector.shape_cast %88 : vector<16xf32> to vector<16x1xf32>
    %90 = tpu.reciprocal %89 {approx = true} : vector<16x1xf32> -> vector<16x1xf32>
    %91 = vector.broadcast %90 : vector<16x1xf32> to vector<16x16xf32>
    %92 = arith.mulf %87, %91 : vector<16x16xf32>
    %cst_45 = arith.constant dense<0.000000e+00> : vector<16x64xf32>
    %93 = tpu.matmul %92, %79, %cst_45 {dimension_numbers = #tpu.dot_dimension_numbers<[1], [0], [0], [1], [0, 0, 1, 1], [], []>} : vector<16x16xf32>, vector<16x64xf32>, vector<16x64xf32> -> vector<16x64xf32>
    %c0_46 = arith.constant 0 : index
    %c128 = arith.constant 128 : index
    %94 = vector.load %arg20[%c0_46, %c128] : memref<16x256xf32, #tpu.memory_space<vmem>>, vector<16x64xf32>
    tpu.vector_store %arg20[%c0_46, %c128], %93 {strides = array<i32>} : memref<16x256xf32, #tpu.memory_space<vmem>>, vector<16x64xf32>,
    %95 = vector.extract_strided_slice %30 {offsets = [0, 192], sizes = [16, 64], strides = [1, 1]} : vector<16x256xf32> to vector<16x64xf32>
    %96 = vector.extract_strided_slice %35 {offsets = [0, 192], sizes = [16, 64], strides = [1, 1]} : vector<16x256xf32> to vector<16x64xf32>
    %97 = vector.extract_strided_slice %40 {offsets = [0, 192], sizes = [16, 64], strides = [1, 1]} : vector<16x256xf32> to vector<16x64xf32>
    %cst_47 = arith.constant dense<0.000000e+00> : vector<16x16xf32>
    %98 = tpu.matmul %95, %96, %cst_47 {dimension_numbers = #tpu.dot_dimension_numbers<[1], [1], [0], [0], [0, 0, 1, 0], [], []>} : vector<16x64xf32>, vector<16x64xf32>, vector<16x16xf32> -> vector<16x16xf32>
    %cst_48 = arith.constant 1.250000e-01 : f32
    %99 = vector.broadcast %cst_48 : f32 to vector<16x16xf32>
    %100 = arith.mulf %98, %99 : vector<16x16xf32>
    %cst_49 = arith.constant dense<0xFF800000> : vector<16xf32>
    %101 = vector.multi_reduction <maximumf>, %100, %cst_49 [1] : vector<16x16xf32> to vector<16xf32>
    %102 = vector.shape_cast %101 : vector<16xf32> to vector<16x1xf32>
    %103 = vector.broadcast %102 : vector<16x1xf32> to vector<16x16xf32>
    %104 = arith.subf %100, %103 : vector<16x16xf32>
    %105 = math.exp %104 : vector<16x16xf32>
    %cst_50 = arith.constant dense<0.000000e+00> : vector<16xf32>
    %106 = vector.multi_reduction <add>, %105, %cst_50 [1] : vector<16x16xf32> to vector<16xf32>
    %107 = vector.shape_cast %106 : vector<16xf32> to vector<16x1xf32>
    %108 = tpu.reciprocal %107 {approx = true} : vector<16x1xf32> -> vector<16x1xf32>
    %109 = vector.broadcast %108 : vector<16x1xf32> to vector<16x16xf32>
    %110 = arith.mulf %105, %109 : vector<16x16xf32>
    %cst_51 = arith.constant dense<0.000000e+00> : vector<16x64xf32>
    %111 = tpu.matmul %110, %97, %cst_51 {dimension_numbers = #tpu.dot_dimension_numbers<[1], [0], [0], [1], [0, 0, 1, 1], [], []>} : vector<16x16xf32>, vector<16x64xf32>, vector<16x64xf32> -> vector<16x64xf32>
    %c0_52 = arith.constant 0 : index
    %c192 = arith.constant 192 : index
    %112 = vector.load %arg20[%c0_52, %c192] : memref<16x256xf32, #tpu.memory_space<vmem>>, vector<16x64xf32>
    tpu.vector_store %arg20[%c0_52, %c192], %111 {strides = array<i32>} : memref<16x256xf32, #tpu.memory_space<vmem>>, vector<16x64xf32>,
    %c0_53 = arith.constant 0 : index
    %c0_54 = arith.constant 0 : index
    %113 = vector.load %arg20[%c0_53, %c0_54] : memref<16x256xf32, #tpu.memory_space<vmem>>, vector<16x256xf32>
    %c0_55 = arith.constant 0 : index
    %c0_56 = arith.constant 0 : index
    %114 = vector.load %arg11[%c0_55, %c0_56] : memref<1x256xf32, #tpu.memory_space<vmem>>, vector<1x256xf32>
    %c0_57 = arith.constant 0 : index
    %c0_58 = arith.constant 0 : index
    %115 = vector.load %arg12[%c0_57, %c0_58] : memref<1x256xf32, #tpu.memory_space<vmem>>, vector<1x256xf32>
    %cst_59 = arith.constant dense<0.000000e+00> : vector<16xf32>
    %116 = vector.multi_reduction <add>, %113, %cst_59 [1] : vector<16x256xf32> to vector<16xf32>
    %117 = vector.shape_cast %116 : vector<16xf32> to vector<16x1xf32>
    %cst_60 = arith.constant 2.560000e+02 : f32
    %118 = vector.broadcast %cst_60 : f32 to vector<16x1xf32>
    %119 = arith.divf %117, %118 : vector<16x1xf32>
    %120 = vector.broadcast %119 : vector<16x1xf32> to vector<16x256xf32>
    %121 = arith.subf %113, %120 : vector<16x256xf32>
    %122 = arith.mulf %121, %121 : vector<16x256xf32>
    %cst_61 = arith.constant dense<0.000000e+00> : vector<16xf32>
    %123 = vector.multi_reduction <add>, %122, %cst_61 [1] : vector<16x256xf32> to vector<16xf32>
    %124 = vector.shape_cast %123 : vector<16xf32> to vector<16x1xf32>
    %cst_62 = arith.constant 2.560000e+02 : f32
    %125 = vector.broadcast %cst_62 : f32 to vector<16x1xf32>
    %126 = arith.divf %124, %125 : vector<16x1xf32>
    %cst_63 = arith.constant 9.99999974E-6 : f32
    %127 = vector.broadcast %cst_63 : f32 to vector<16x1xf32>
    %128 = arith.addf %126, %127 : vector<16x1xf32>
    %129 = math.rsqrt %128 : vector<16x1xf32>
    %130 = vector.broadcast %129 : vector<16x1xf32> to vector<16x256xf32>
    %131 = arith.mulf %121, %130 : vector<16x256xf32>
    %132 = vector.broadcast %114 : vector<1x256xf32> to vector<16x256xf32>
    %133 = arith.mulf %131, %132 : vector<16x256xf32>
    %134 = vector.broadcast %115 : vector<1x256xf32> to vector<16x256xf32>
    %135 = arith.addf %133, %134 : vector<16x256xf32>
    %136 = arith.addf %3, %135 : vector<16x256xf32>
    %c0_64 = arith.constant 0 : index
    %c0_65 = arith.constant 0 : index
    %137 = vector.load %arg13[%c0_64, %c0_65] : memref<256x512xf32, #tpu.memory_space<vmem>>, vector<256x512xf32>
    %cst_66 = arith.constant dense<0.000000e+00> : vector<16x512xf32>
    %138 = tpu.matmul %136, %137, %cst_66 {dimension_numbers = #tpu.dot_dimension_numbers<[1], [0], [0], [1], [0, 0, 1, 1], [], []>} : vector<16x256xf32>, vector<256x512xf32>, vector<16x512xf32> -> vector<16x512xf32>
    %c0_67 = arith.constant 0 : index
    %c0_68 = arith.constant 0 : index
    %139 = vector.load %arg14[%c0_67, %c0_68] : memref<1x512xf32, #tpu.memory_space<vmem>>, vector<1x512xf32>
    %140 = vector.broadcast %139 : vector<1x512xf32> to vector<16x512xf32>
    %141 = arith.addf %138, %140 : vector<16x512xf32>
    %cst_69 = arith.constant 0.000000e+00 : f32
    %142 = vector.broadcast %cst_69 : f32 to vector<16x512xf32>
    %143 = arith.maximumf %141, %142 : vector<16x512xf32>
    %c0_70 = arith.constant 0 : index
    %c0_71 = arith.constant 0 : index
    %144 = vector.load %arg15[%c0_70, %c0_71] : memref<512x256xf32, #tpu.memory_space<vmem>>, vector<512x256xf32>
    %cst_72 = arith.constant dense<0.000000e+00> : vector<16x256xf32>
    %145 = tpu.matmul %143, %144, %cst_72 {dimension_numbers = #tpu.dot_dimension_numbers<[1], [0], [0], [1], [0, 0, 1, 1], [], []>} : vector<16x512xf32>, vector<512x256xf32>, vector<16x256xf32> -> vector<16x256xf32>
    %c0_73 = arith.constant 0 : index
    %c0_74 = arith.constant 0 : index
    %146 = vector.load %arg16[%c0_73, %c0_74] : memref<1x256xf32, #tpu.memory_space<vmem>>, vector<1x256xf32>
    %147 = vector.broadcast %146 : vector<1x256xf32> to vector<16x256xf32>
    %148 = arith.addf %145, %147 : vector<16x256xf32>
    %c0_75 = arith.constant 0 : index
    %c0_76 = arith.constant 0 : index
    %149 = vector.load %arg17[%c0_75, %c0_76] : memref<1x256xf32, #tpu.memory_space<vmem>>, vector<1x256xf32>
    %c0_77 = arith.constant 0 : index
    %c0_78 = arith.constant 0 : index
    %150 = vector.load %arg18[%c0_77, %c0_78] : memref<1x256xf32, #tpu.memory_space<vmem>>, vector<1x256xf32>
    %cst_79 = arith.constant dense<0.000000e+00> : vector<16xf32>
    %151 = vector.multi_reduction <add>, %148, %cst_79 [1] : vector<16x256xf32> to vector<16xf32>
    %152 = vector.shape_cast %151 : vector<16xf32> to vector<16x1xf32>
    %cst_80 = arith.constant 2.560000e+02 : f32
    %153 = vector.broadcast %cst_80 : f32 to vector<16x1xf32>
    %154 = arith.divf %152, %153 : vector<16x1xf32>
    %155 = vector.broadcast %154 : vector<16x1xf32> to vector<16x256xf32>
    %156 = arith.subf %148, %155 : vector<16x256xf32>
    %157 = arith.mulf %156, %156 : vector<16x256xf32>
    %cst_81 = arith.constant dense<0.000000e+00> : vector<16xf32>
    %158 = vector.multi_reduction <add>, %157, %cst_81 [1] : vector<16x256xf32> to vector<16xf32>
    %159 = vector.shape_cast %158 : vector<16xf32> to vector<16x1xf32>
    %cst_82 = arith.constant 2.560000e+02 : f32
    %160 = vector.broadcast %cst_82 : f32 to vector<16x1xf32>
    %161 = arith.divf %159, %160 : vector<16x1xf32>
    %cst_83 = arith.constant 9.99999974E-6 : f32
    %162 = vector.broadcast %cst_83 : f32 to vector<16x1xf32>
    %163 = arith.addf %161, %162 : vector<16x1xf32>
    %164 = math.rsqrt %163 : vector<16x1xf32>
    %165 = vector.broadcast %164 : vector<16x1xf32> to vector<16x256xf32>
    %166 = arith.mulf %156, %165 : vector<16x256xf32>
    %167 = vector.broadcast %149 : vector<1x256xf32> to vector<16x256xf32>
    %168 = arith.mulf %166, %167 : vector<16x256xf32>
    %169 = vector.broadcast %150 : vector<1x256xf32> to vector<16x256xf32>
    %170 = arith.addf %168, %169 : vector<16x256xf32>
    %171 = arith.addf %136, %170 : vector<16x256xf32>
    %c0_84 = arith.constant 0 : index
    %c0_85 = arith.constant 0 : index
    %c0_86 = arith.constant 0 : index
    %172 = vector.load %arg19[%c0_84, %c0_85, %c0_86] : memref<1x16x256xf32, #tpu.memory_space<vmem>>, vector<1x16x256xf32>
    %173 = vector.shape_cast %172 : vector<1x16x256xf32> to vector<16x256xf32>
    %174 = vector.shape_cast %171 : vector<16x256xf32> to vector<1x16x256xf32>
    tpu.vector_store %arg19[%c0_84, %c0_85, %c0_86], %174 {strides = array<i32>} : memref<1x16x256xf32, #tpu.memory_space<vmem>>, vector<1x16x256xf32>,
    return
  }
  func.func @transform_0(%arg0: i32) -> (i32, i32, i32) {
    %c0_i32 = arith.constant 0 : i32
    %c0_i32_0 = arith.constant 0 : i32
    %c0_i32_1 = arith.constant 0 : i32
    return %arg0, %c0_i32, %c0_i32_0 : i32, i32, i32
  }
  func.func @transform_1(%arg0: i32) -> (i32, i32) {
    %c0_i32 = arith.constant 0 : i32
    %c0_i32_0 = arith.constant 0 : i32
    %c0_i32_1 = arith.constant 0 : i32
    return %c0_i32, %c0_i32_0 : i32, i32
  }
  func.func @transform_2(%arg0: i32) -> (i32, i32) {
    %c0_i32 = arith.constant 0 : i32
    %c0_i32_0 = arith.constant 0 : i32
    %c0_i32_1 = arith.constant 0 : i32
    return %c0_i32, %c0_i32_0 : i32, i32
  }
  func.func @transform_3(%arg0: i32) -> (i32, i32) {
    %c0_i32 = arith.constant 0 : i32
    %c0_i32_0 = arith.constant 0 : i32
    %c0_i32_1 = arith.constant 0 : i32
    return %c0_i32, %c0_i32_0 : i32, i32
  }
  func.func @transform_4(%arg0: i32) -> (i32, i32) {
    %c0_i32 = arith.constant 0 : i32
    %c0_i32_0 = arith.constant 0 : i32
    %c0_i32_1 = arith.constant 0 : i32
    return %c0_i32, %c0_i32_0 : i32, i32
  }
  func.func @transform_5(%arg0: i32) -> (i32, i32) {
    %c0_i32 = arith.constant 0 : i32
    %c0_i32_0 = arith.constant 0 : i32
    %c0_i32_1 = arith.constant 0 : i32
    return %c0_i32, %c0_i32_0 : i32, i32
  }
  func.func @transform_6(%arg0: i32) -> (i32, i32) {
    %c0_i32 = arith.constant 0 : i32
    %c0_i32_0 = arith.constant 0 : i32
    %c0_i32_1 = arith.constant 0 : i32
    return %c0_i32, %c0_i32_0 : i32, i32
  }
  func.func @transform_7(%arg0: i32) -> (i32, i32) {
    %c0_i32 = arith.constant 0 : i32
    %c0_i32_0 = arith.constant 0 : i32
    %c0_i32_1 = arith.constant 0 : i32
    return %c0_i32, %c0_i32_0 : i32, i32
  }
  func.func @transform_8(%arg0: i32) -> (i32, i32) {
    %c0_i32 = arith.constant 0 : i32
    %c0_i32_0 = arith.constant 0 : i32
    %c0_i32_1 = arith.constant 0 : i32
    return %c0_i32, %c0_i32_0 : i32, i32
  }
  func.func @transform_9(%arg0: i32) -> (i32, i32) {
    %c0_i32 = arith.constant 0 : i32
    %c0_i32_0 = arith.constant 0 : i32
    %c0_i32_1 = arith.constant 0 : i32
    return %c0_i32, %c0_i32_0 : i32, i32
  }
  func.func @transform_10(%arg0: i32) -> (i32, i32) {
    %c0_i32 = arith.constant 0 : i32
    %c0_i32_0 = arith.constant 0 : i32
    %c0_i32_1 = arith.constant 0 : i32
    return %c0_i32, %c0_i32_0 : i32, i32
  }
  func.func @transform_11(%arg0: i32) -> (i32, i32) {
    %c0_i32 = arith.constant 0 : i32
    %c0_i32_0 = arith.constant 0 : i32
    %c0_i32_1 = arith.constant 0 : i32
    return %c0_i32, %c0_i32_0 : i32, i32
  }
  func.func @transform_12(%arg0: i32) -> (i32, i32) {
    %c0_i32 = arith.constant 0 : i32
    %c0_i32_0 = arith.constant 0 : i32
    %c0_i32_1 = arith.constant 0 : i32
    return %c0_i32, %c0_i32_0 : i32, i32
  }
  func.func @transform_13(%arg0: i32) -> (i32, i32) {
    %c0_i32 = arith.constant 0 : i32
    %c0_i32_0 = arith.constant 0 : i32
    %c0_i32_1 = arith.constant 0 : i32
    return %c0_i32, %c0_i32_0 : i32, i32
  }
  func.func @transform_14(%arg0: i32) -> (i32, i32) {
    %c0_i32 = arith.constant 0 : i32
    %c0_i32_0 = arith.constant 0 : i32
    %c0_i32_1 = arith.constant 0 : i32
    return %c0_i32, %c0_i32_0 : i32, i32
  }
  func.func @transform_15(%arg0: i32) -> (i32, i32) {
    %c0_i32 = arith.constant 0 : i32
    %c0_i32_0 = arith.constant 0 : i32
    %c0_i32_1 = arith.constant 0 : i32
    return %c0_i32, %c0_i32_0 : i32, i32
  }
  func.func @transform_16(%arg0: i32) -> (i32, i32) {
    %c0_i32 = arith.constant 0 : i32
    %c0_i32_0 = arith.constant 0 : i32
    %c0_i32_1 = arith.constant 0 : i32
    return %c0_i32, %c0_i32_0 : i32, i32
  }
  func.func @transform_17(%arg0: i32) -> (i32, i32) {
    %c0_i32 = arith.constant 0 : i32
    %c0_i32_0 = arith.constant 0 : i32
    %c0_i32_1 = arith.constant 0 : i32
    return %c0_i32, %c0_i32_0 : i32, i32
  }
  func.func @transform_18(%arg0: i32) -> (i32, i32, i32) {
    %c0_i32 = arith.constant 0 : i32
    %c0_i32_0 = arith.constant 0 : i32
    %c0_i32_1 = arith.constant 0 : i32
    return %arg0, %c0_i32, %c0_i32_0 : i32, i32, i32
  }
}

</mosaic_0001>

<bundles_post_ra>
// kernel: vit_encoder_forward.2
= control target key start
LH: loop header
LB: loop body
LE: loop exit
PB: predicated region body
PF: predicated region fallthrough
CT: control target
= control target key end

     0   :  { %s5066_s0 = inlined_call_operand.vmem [shape: f32[2,16,256], index: 0, kind: input, shape index: {}]   ;;  %s5067_s1 = inlined_call_operand.vmem [shape: f32[256,256], index: 1, kind: input, shape index: {}]   ;;  %s5068_s2 = inlined_call_operand.vmem [shape: f32[16,256], index: 2, kind: input, shape index: {}]   ;;  %s5069_s3 = inlined_call_operand.vmem [shape: f32[1,256], index: 3, kind: input, shape index: {}]   ;;  %s5070_s4 = inlined_call_operand.vmem [shape: f32[1,256], index: 4, kind: input, shape index: {}]   ;;  %s5071_s5 = inlined_call_operand.vmem [shape: f32[256,256], index: 5, kind: input, shape index: {}]   ;;  %s5072_s6 = inlined_call_operand.vmem [shape: f32[1,256], index: 6, kind: input, shape index: {}]   ;;  %s5073_s7 = inlined_call_operand.vmem [shape: f32[256,256], index: 7, kind: input, shape index: {}]   ;;  %s5074_s8 = inlined_call_operand.vmem [shape: f32[1,256], index: 8, kind: input, shape index: {}]   ;;  %s5075_s9 = inlined_call_operand.vmem [shape: f32[256,256], index: 9, kind: input, shape index: {}]   ;;  %s5076_s10 = inlined_call_operand.vmem [shape: f32[1,256], index: 10, kind: input, shape index: {}]   ;;  %s5077_s11 = inlined_call_operand.vmem [shape: f32[1,256], index: 11, kind: input, shape index: {}]   ;;  %s5078_s12 = inlined_call_operand.vmem [shape: f32[1,256], index: 12, kind: input, shape index: {}]   ;;  %s5079_s13 = inlined_call_operand.vmem [shape: f32[256,512], index: 13, kind: input, shape index: {}]   ;;  %s5080_s14 = inlined_call_operand.vmem [shape: f32[1,512], index: 14, kind: input, shape index: {}]   ;;  %s5081_s15 = inlined_call_operand.vmem [shape: f32[512,256], index: 15, kind: input, shape index: {}]   ;;  %s5082_s16 = inlined_call_operand.vmem [shape: f32[1,256], index: 16, kind: input, shape index: {}]   ;;  %s5083_s17 = inlined_call_operand.vmem [shape: f32[1,256], index: 17, kind: input, shape index: {}]   ;;  %s5084_s18 = inlined_call_operand.vmem [shape: f32[1,256], index: 18, kind: input, shape index: {}]   ;;  %s5085_s19 = inlined_call_operand.vmem [shape: f32[2,16,256], index: 19, kind: output, shape index: {}]  }
   0x1   :  { %5088 = sst [smem:[#allocation3_spill]] %s5066_s0  ;;  %s3191_s0 = smov 0  }
   0x2   :  { %5089 = sst [smem:[#allocation4_spill]] %s5067_s1 }
   0x3   :  { %5090 = sst [smem:[#allocation5_spill]] %s5068_s2 }
   0x4   :  { %5091 = sst [smem:[#allocation6_spill]] %s5069_s3 }
   0x5 LB: > { %s2904_s30 = sadd.s32 4294967295, %s3088_s0   ;;  %p2908_p0 = scmp.ge.s32.totalorder %s3088_s0, 1  ;;  %s3088_s0 = sphi %s3191_s0, %s29_s0  }
   0x6   : > { %p537_p1 = scmp.lt.s32.totalorder %s3088_s0, 3 }
   0x8   : > { %p538_p2 = pnand %p2908_p0, %p537_p1 }
   0x9   : > { %s5092_s1 = sld [smem:[#allocation4_spill]] (!%p538_p2)  ;;  %p593_p3 = scmp.lt.s32.totalorder (!%p538_p2), %s2904_s30, 1 }
   0xa   : > { %541 = sbr.rel (%p538_p2) target bundleno = 3809 (0xee1), region = 96  ;;  %s5093_s27 = sld [smem:[#allocation3_spill]] (!%p538_p2) }
   0xb   : > { %s5094_s22 = sld [smem:[#allocation6_spill]] (!%p538_p2)  ;;  %s3090_s2 = smov (!%p538_p2), 64  }
   0xc   : > { %s5095_s3 = sld [smem:[#allocation5_spill]] (!%p538_p2) }
   0xf   : > { %v638_v0 = vld [vmem:[%s5092_s1 + $0xf8] sm:$0xff]  ;;  %v637_v1 = vld [vmem:[%s5092_s1 + $0xf0] sm:$0xff]  ;;  %v636_v2 = vld [vmem:[%s5092_s1 + $0xe8] sm:$0xff]  ;;  %s5097_s30 = smov (!%p593_p3, %s2904_s30), 1  ;;  %vm1280_vm0 = vcmask 523264   ;;  %vm1370_vm1 = vcmask 130048  }
  0x10   : > { %671 = vmatprep.subr.mxu0 %v638_v0  ;;  %v635_v3 = vld [vmem:[%s5092_s1 + $0xe0] sm:$0xff]  ;;  %v634_v4 = vld [vmem:[%s5092_s1 + $0xd8] sm:$0xff]  ;;  %v633_v5 = vld [vmem:[%s5092_s1 + $0xd0] sm:$0xff]  ;;  %s2939_s20 = sshll.u32 %s5097_s30, 5  ;;  %vm1688_vm2 = vcmask 1048064  }
  0x11   : > { %672 = vmatpush1.msra.mxu0 %v637_v1  ;;  %v632_v6 = vld [vmem:[%s5092_s1 + $0xc8] sm:$0xff]  ;;  %v631_v7 = vld [vmem:[%s5092_s1 + $0xc0] sm:$0xff]  ;;  %v630_v8 = vld [vmem:[%s5092_s1 + $0xb8] sm:$0xff]  ;;  %s3274_s28 = scalar_lea.vmem %s5093_s27, %s2939_s20 }
  0x12   : > { %673 = vmatprep.subr.mxu0 %v636_v2  ;;  %v629_v9 = vld [vmem:[%s5092_s1 + $0xb0] sm:$0xff]  ;;  %v628_v10 = vld [vmem:[%s5092_s1 + $0xa8] sm:$0xff]  ;;  %v627_v11 = vld [vmem:[%s5092_s1 + $0xa0] sm:$0xff] }
  0x13   : > { %674 = vmatpush1.msra.mxu0 %v635_v3  ;;  %v626_v12 = vld [vmem:[%s5092_s1 + $0x98] sm:$0xff]  ;;  %v625_v13 = vld [vmem:[%s5092_s1 + $0x90] sm:$0xff]  ;;  %v624_v14 = vld [vmem:[%s5092_s1 + $0x88] sm:$0xff] }
  0x14   : > { %675 = vmatprep.subr.mxu0 %v634_v4  ;;  %v623_v15 = vld [vmem:[%s5092_s1 + $0x80] sm:$0xff]  ;;  %v622_v16 = vld [vmem:[%s5092_s1 + $0x78] sm:$0xff]  ;;  %v621_v17 = vld [vmem:[%s5092_s1 + $0x70] sm:$0xff] }
  0x15   : > { %676 = vmatpush1.msra.mxu0 %v633_v5  ;;  %v620_v18 = vld [vmem:[%s5092_s1 + $0x68] sm:$0xff]  ;;  %v619_v19 = vld [vmem:[%s5092_s1 + $0x60] sm:$0xff]  ;;  %v618_v20 = vld [vmem:[%s5092_s1 + $0x58] sm:$0xff] }
  0x16   : > { %677 = vmatprep.subr.mxu0 %v632_v6  ;;  %v617_v21 = vld [vmem:[%s5092_s1 + $0x50] sm:$0xff]  ;;  %v616_v22 = vld [vmem:[%s5092_s1 + $0x48] sm:$0xff]  ;;  %v615_v23 = vld [vmem:[%s5092_s1 + $0x40] sm:$0xff] }
  0x17   : > { %678 = vmatpush1.msra.mxu0 %v631_v7  ;;  %v604_v24 = vld [vmem:[%s3274_s28 + $0x8] sm:$0xff]  ;;  %v614_v25 = vld [vmem:[%s5092_s1 + $0x38] sm:$0xff]  ;;  %v613_v26 = vld [vmem:[%s5092_s1 + $0x30] sm:$0xff] }
  0x18   : > { %679 = vmatprep.subr.mxu0 %v630_v8  ;;  %735 = vmatprep.mubr.f32.mxu0 %v604_v24  ;;  %v612_v27 = vld [vmem:[%s5092_s1 + $0x28] sm:$0xff]  ;;  %v611_v28 = vld [vmem:[%s5092_s1 + $0x20] sm:$0xff]  ;;  %v610_v29 = vld [vmem:[%s5092_s1 + $0x18] sm:$0xff] }
  0x19   : > { %680 = vmatpush1.msra.mxu0 %v629_v9  ;;  %v609_v30 = vld [vmem:[%s5092_s1 + $0x10] sm:$0xff]  ;;  %v608_v31 = vld [vmem:[%s5092_s1 + $0x8] sm:$0xff]  ;;  %v607_v32 = vld [vmem:[%s5092_s1] sm:$0xff] }
  0x1a   : > { %681 = vmatprep.subr.mxu0 %v628_v10  ;;  %v670_v33 = vld [vmem:[%s5092_s1 + $0x1f8] sm:$0xff]  ;;  %v669_v34 = vld [vmem:[%s5092_s1 + $0x1f0] sm:$0xff]  ;;  %v668_v35 = vld [vmem:[%s5092_s1 + $0x1e8] sm:$0xff] }
  0x1b   : > { %682 = vmatpush1.msra.mxu0 %v627_v11  ;;  %v667_v36 = vld [vmem:[%s5092_s1 + $0x1e0] sm:$0xff]  ;;  %v666_v37 = vld [vmem:[%s5092_s1 + $0x1d8] sm:$0xff]  ;;  %v665_v38 = vld [vmem:[%s5092_s1 + $0x1d0] sm:$0xff] }
  0x1c   : > { %683 = vmatprep.subr.mxu0 %v626_v12  ;;  %v664_v39 = vld [vmem:[%s5092_s1 + $0x1c8] sm:$0xff]  ;;  %v663_v40 = vld [vmem:[%s5092_s1 + $0x1c0] sm:$0xff]  ;;  %v662_v41 = vld [vmem:[%s5092_s1 + $0x1b8] sm:$0xff] }
  0x1d   : > { %684 = vmatpush1.msra.mxu0 %v625_v13  ;;  %v661_v42 = vld [vmem:[%s5092_s1 + $0x1b0] sm:$0xff]  ;;  %v660_v43 = vld [vmem:[%s5092_s1 + $0x1a8] sm:$0xff]  ;;  %v659_v44 = vld [vmem:[%s5092_s1 + $0x1a0] sm:$0xff] }
  0x1e   : > { %685 = vmatprep.subr.mxu0 %v624_v14  ;;  %v658_v45 = vld [vmem:[%s5092_s1 + $0x198] sm:$0xff]  ;;  %v657_v46 = vld [vmem:[%s5092_s1 + $0x190] sm:$0xff]  ;;  %v656_v47 = vld [vmem:[%s5092_s1 + $0x188] sm:$0xff] }
  0x1f   : > { %686 = vmatpush1.msra.mxu0 %v623_v15  ;;  %v655_v48 = vld [vmem:[%s5092_s1 + $0x180] sm:$0xff]  ;;  %v654_v49 = vld [vmem:[%s5092_s1 + $0x178] sm:$0xff]  ;;  %v653_v50 = vld [vmem:[%s5092_s1 + $0x170] sm:$0xff] }
  0x20   : > { %687 = vmatprep.subr.mxu0 %v622_v16  ;;  %v652_v51 = vld [vmem:[%s5092_s1 + $0x168] sm:$0xff]  ;;  %v651_v52 = vld [vmem:[%s5092_s1 + $0x160] sm:$0xff]  ;;  %v650_v53 = vld [vmem:[%s5092_s1 + $0x158] sm:$0xff] }
  0x21   : > { %688 = vmatpush1.msra.mxu0 %v621_v17  ;;  %v649_v54 = vld [vmem:[%s5092_s1 + $0x150] sm:$0xff]  ;;  %v648_v55 = vld [vmem:[%s5092_s1 + $0x148] sm:$0xff]  ;;  %v647_v56 = vld [vmem:[%s5092_s1 + $0x140] sm:$0xff] }
  0x22   : > { %689 = vmatprep.subr.mxu0 %v620_v18  ;;  %v646_v57 = vld [vmem:[%s5092_s1 + $0x138] sm:$0xff]  ;;  %v645_v58 = vld [vmem:[%s5092_s1 + $0x130] sm:$0xff]  ;;  %v644_v59 = vld [vmem:[%s5092_s1 + $0x128] sm:$0xff] }
  0x23   : > { %690 = vmatpush1.msra.mxu0 %v619_v19  ;;  %v643_v60 = vld [vmem:[%s5092_s1 + $0x120] sm:$0xff]  ;;  %v642_v61 = vld [vmem:[%s5092_s1 + $0x118] sm:$0xff]  ;;  %v641_v62 = vld [vmem:[%s5092_s1 + $0x110] sm:$0xff] }
  0x24   : > { %691 = vmatprep.subr.mxu0 %v618_v20  ;;  %v640_v63 = vld [vmem:[%s5092_s1 + $0x108] sm:$0xff]  ;;  %v639_v0 = vld [vmem:[%s5092_s1 + $0x100] sm:$0xff]  ;;  %v606_v2 = vld [vmem:[%s3274_s28 + $0x18] sm:$0xff] }
  0x25   : > { %692 = vmatpush1.msra.mxu0 %v617_v21  ;;  %v603_v1 = vld [vmem:[%s3274_s28] sm:$0xff]  ;;  %v605_v3 = vld [vmem:[%s3274_s28 + $0x10] sm:$0xff]  ;;  %v852_v10 = vld [vmem:[%s5071_s5 + $0xf8] sm:$0xff] }
  0x26   : > { %693 = vmatprep.subr.mxu0 %v616_v22  ;;  %v851_v11 = vld [vmem:[%s5071_s5 + $0xf0] sm:$0xff]  ;;  %v1005_v12 = vld [vmem:[%s5073_s7 + $0xf8] sm:$0xff]  ;;  %897 = vmatprep.subr.mxu1 %v852_v10  ;;  %v850_v13 = vld [vmem:[%s5071_s5 + $0xe8] sm:$0xff] }
  0x27   : > { %694 = vmatpush1.msra.mxu0 %v615_v23  ;;  %v1004_v14 = vld [vmem:[%s5073_s7 + $0xf0] sm:$0xff]  ;;  %v849_v15 = vld [vmem:[%s5071_s5 + $0xe0] sm:$0xff]  ;;  %898 = vmatpush1.msra.mxu1 %v851_v11  ;;  %v1003_v16 = vld [vmem:[%s5073_s7 + $0xe8] sm:$0xff] }
  0x28   : > { %695 = vmatprep.subr.mxu0 %v614_v25  ;;  %v848_v17 = vld [vmem:[%s5071_s5 + $0xd8] sm:$0xff]  ;;  %v1002_v18 = vld [vmem:[%s5073_s7 + $0xe0] sm:$0xff]  ;;  %899 = vmatprep.subr.mxu1 %v850_v13  ;;  %v847_v19 = vld [vmem:[%s5071_s5 + $0xd0] sm:$0xff] }
  0x29   : > { %696 = vmatpush1.msra.mxu0 %v613_v26  ;;  %v1001_v20 = vld [vmem:[%s5073_s7 + $0xd8] sm:$0xff]  ;;  %900 = vmatpush1.msra.mxu1 %v849_v15  ;;  %v846_v21 = vld [vmem:[%s5071_s5 + $0xc8] sm:$0xff]  ;;  %v1000_v22 = vld [vmem:[%s5073_s7 + $0xd0] sm:$0xff] }
  0x2a   : > { %697 = vmatprep.subr.mxu0 %v612_v27  ;;  %v999_v23 = vld [vmem:[%s5073_s7 + $0xc8] sm:$0xff]  ;;  %901 = vmatprep.subr.mxu1 %v848_v17  ;;  %v845_v24 = vld [vmem:[%s5071_s5 + $0xc0] sm:$0xff]  ;;  %v844_v26 = vld [vmem:[%s5071_s5 + $0xb8] sm:$0xff] }
  0x2b   : > { %698 = vmatpush1.msra.mxu0 %v611_v28  ;;  %v998_v25 = vld [vmem:[%s5073_s7 + $0xc0] sm:$0xff]  ;;  %902 = vmatpush1.msra.mxu1 %v847_v19  ;;  %v997_v27 = vld [vmem:[%s5073_s7 + $0xb8] sm:$0xff]  ;;  %v843_v28 = vld [vmem:[%s5071_s5 + $0xb0] sm:$0xff] }
  0x2c   : > { %699 = vmatprep.subr.mxu0 %v610_v29  ;;  %903 = vmatprep.subr.mxu1 %v846_v21  ;;  %v996_v29 = vld [vmem:[%s5073_s7 + $0xb0] sm:$0xff]  ;;  %v822_v10 = vld [vmem:[%s5071_s5 + $0x8] sm:$0xff]  ;;  %v974_v13 = vld [vmem:[%s5073_s7] sm:$0xff] }
  0x2d   : > { %700 = vmatpush1.msra.mxu0 %v609_v30  ;;  %904 = vmatpush1.msra.mxu1 %v845_v24  ;;  %v842_v30 = vld [vmem:[%s5071_s5 + $0xa8] sm:$0xff]  ;;  %v1037_v15 = vld [vmem:[%s5073_s7 + $0x1f8] sm:$0xff]  ;;  %v1036_v17 = vld [vmem:[%s5073_s7 + $0x1f0] sm:$0xff] }
  0x2e   : > { %701 = vmatprep.subr.mxu0 %v608_v31  ;;  %v995_v31 = vld [vmem:[%s5073_s7 + $0xa8] sm:$0xff]  ;;  %905 = vmatprep.subr.mxu1 %v844_v26  ;;  %v1034_v21 = vld [vmem:[%s5073_s7 + $0x1e0] sm:$0xff]  ;;  %v879_v24 = vld [vmem:[%s5071_s5 + $0x1d0] sm:$0xff] }
  0x2f   : > { %702 = vmatpush1.msra.mxu0 %v607_v32  ;;  %v841_v32 = vld [vmem:[%s5071_s5 + $0xa0] sm:$0xff]  ;;  %906 = vmatpush1.msra.mxu1 %v843_v28  ;;  %v975_v11 = vld [vmem:[%s5073_s7 + $0x8] sm:$0xff] }
  0x30   : > { %703 = vmatprep.subr.mxu0 %v670_v33  ;;  %v994_v33 = vld [vmem:[%s5073_s7 + $0xa0] sm:$0xff]  ;;  %907 = vmatprep.subr.mxu1 %v842_v30  ;;  %v1035_v19 = vld [vmem:[%s5073_s7 + $0x1e8] sm:$0xff] }
  0x31   : > { %704 = vmatpush2.msra.mxu0 %v669_v34  ;;  %v840_v34 = vld [vmem:[%s5071_s5 + $0x98] sm:$0xff]  ;;  %908 = vmatpush1.msra.mxu1 %v841_v32 }
  0x32   : > { %705 = vmatprep.subr.mxu0 %v668_v35  ;;  %v993_v35 = vld [vmem:[%s5073_s7 + $0x98] sm:$0xff]  ;;  %909 = vmatprep.subr.mxu1 %v840_v34 }
  0x33   : > { %706 = vmatpush2.msra.mxu0 %v667_v36  ;;  %v839_v36 = vld [vmem:[%s5071_s5 + $0x90] sm:$0xff] }
  0x34   : > { %707 = vmatprep.subr.mxu0 %v666_v37  ;;  %v992_v37 = vld [vmem:[%s5073_s7 + $0x90] sm:$0xff]  ;;  %910 = vmatpush1.msra.mxu1 %v839_v36 }
  0x35   : > { %708 = vmatpush2.msra.mxu0 %v665_v38  ;;  %v838_v38 = vld [vmem:[%s5071_s5 + $0x88] sm:$0xff] }
  0x36   : > { %709 = vmatprep.subr.mxu0 %v664_v39  ;;  %v991_v39 = vld [vmem:[%s5073_s7 + $0x88] sm:$0xff]  ;;  %911 = vmatprep.subr.mxu1 %v838_v38 }
  0x37   : > { %710 = vmatpush2.msra.mxu0 %v663_v40  ;;  %v837_v40 = vld [vmem:[%s5071_s5 + $0x80] sm:$0xff] }
  0x38   : > { %711 = vmatprep.subr.mxu0 %v662_v41  ;;  %v990_v41 = vld [vmem:[%s5073_s7 + $0x80] sm:$0xff]  ;;  %912 = vmatpush1.msra.mxu1 %v837_v40  ;;  %v1032_v40 = vld [vmem:[%s5073_s7 + $0x1d0] sm:$0xff] }
  0x39   : > { %712 = vmatpush2.msra.mxu0 %v661_v42  ;;  %v836_v42 = vld [vmem:[%s5071_s5 + $0x78] sm:$0xff] }
  0x3a   : > { %713 = vmatprep.subr.mxu0 %v660_v43  ;;  %v989_v43 = vld [vmem:[%s5073_s7 + $0x78] sm:$0xff]  ;;  %913 = vmatprep.subr.mxu1 %v836_v42  ;;  %v1031_v42 = vld [vmem:[%s5073_s7 + $0x1c8] sm:$0xff] }
  0x3b   : > { %714 = vmatpush2.msra.mxu0 %v659_v44  ;;  %v835_v44 = vld [vmem:[%s5071_s5 + $0x70] sm:$0xff] }
  0x3c   : > { %715 = vmatprep.subr.mxu0 %v658_v45  ;;  %v988_v45 = vld [vmem:[%s5073_s7 + $0x70] sm:$0xff]  ;;  %914 = vmatpush1.msra.mxu1 %v835_v44  ;;  %v1030_v44 = vld [vmem:[%s5073_s7 + $0x1c0] sm:$0xff] }
  0x3d   : > { %716 = vmatpush2.msra.mxu0 %v657_v46  ;;  %v834_v46 = vld [vmem:[%s5071_s5 + $0x68] sm:$0xff] }
  0x3e   : > { %717 = vmatprep.subr.mxu0 %v656_v47  ;;  %v987_v47 = vld [vmem:[%s5073_s7 + $0x68] sm:$0xff]  ;;  %915 = vmatprep.subr.mxu1 %v834_v46  ;;  %v1029_v46 = vld [vmem:[%s5073_s7 + $0x1b8] sm:$0xff] }
  0x3f   : > { %718 = vmatpush2.msra.mxu0 %v655_v48  ;;  %v833_v48 = vld [vmem:[%s5071_s5 + $0x60] sm:$0xff] }
  0x40   : > { %719 = vmatprep.subr.mxu0 %v654_v49  ;;  %v986_v49 = vld [vmem:[%s5073_s7 + $0x60] sm:$0xff]  ;;  %916 = vmatpush1.msra.mxu1 %v833_v48  ;;  %v1028_v48 = vld [vmem:[%s5073_s7 + $0x1b0] sm:$0xff] }
  0x41   : > { %720 = vmatpush2.msra.mxu0 %v653_v50  ;;  %v832_v50 = vld [vmem:[%s5071_s5 + $0x58] sm:$0xff] }
  0x42   : > { %721 = vmatprep.subr.mxu0 %v652_v51  ;;  %v985_v51 = vld [vmem:[%s5073_s7 + $0x58] sm:$0xff]  ;;  %917 = vmatprep.subr.mxu1 %v832_v50  ;;  %v1027_v50 = vld [vmem:[%s5073_s7 + $0x1a8] sm:$0xff] }
  0x43   : > { %722 = vmatpush2.msra.mxu0 %v651_v52  ;;  %v831_v52 = vld [vmem:[%s5071_s5 + $0x50] sm:$0xff] }
  0x44   : > { %723 = vmatprep.subr.mxu0 %v650_v53  ;;  %v984_v53 = vld [vmem:[%s5073_s7 + $0x50] sm:$0xff]  ;;  %918 = vmatpush1.msra.mxu1 %v831_v52  ;;  %v1026_v52 = vld [vmem:[%s5073_s7 + $0x1a0] sm:$0xff] }
  0x45   : > { %724 = vmatpush2.msra.mxu0 %v649_v54  ;;  %v830_v54 = vld [vmem:[%s5071_s5 + $0x48] sm:$0xff] }
  0x46   : > { %725 = vmatprep.subr.mxu0 %v648_v55  ;;  %v983_v55 = vld [vmem:[%s5073_s7 + $0x48] sm:$0xff]  ;;  %919 = vmatprep.subr.mxu1 %v830_v54  ;;  %v1025_v54 = vld [vmem:[%s5073_s7 + $0x198] sm:$0xff] }
  0x47   : > { %726 = vmatpush2.msra.mxu0 %v647_v56  ;;  %v829_v56 = vld [vmem:[%s5071_s5 + $0x40] sm:$0xff] }
  0x48   : > { %727 = vmatprep.subr.mxu0 %v646_v57  ;;  %v982_v57 = vld [vmem:[%s5073_s7 + $0x40] sm:$0xff]  ;;  %920 = vmatpush1.msra.mxu1 %v829_v56  ;;  %v1024_v56 = vld [vmem:[%s5073_s7 + $0x190] sm:$0xff] }
  0x49   : > { %728 = vmatpush2.msra.mxu0 %v645_v58  ;;  %v828_v58 = vld [vmem:[%s5071_s5 + $0x38] sm:$0xff] }
  0x4a   : > { %729 = vmatprep.subr.mxu0 %v644_v59  ;;  %v981_v59 = vld [vmem:[%s5073_s7 + $0x38] sm:$0xff]  ;;  %921 = vmatprep.subr.mxu1 %v828_v58  ;;  %v1023_v58 = vld [vmem:[%s5073_s7 + $0x188] sm:$0xff] }
  0x4b   : > { %730 = vmatpush2.msra.mxu0 %v643_v60  ;;  %v827_v60 = vld [vmem:[%s5071_s5 + $0x30] sm:$0xff] }
  0x4c   : > { %731 = vmatprep.subr.mxu0 %v642_v61  ;;  %v980_v61 = vld [vmem:[%s5073_s7 + $0x30] sm:$0xff]  ;;  %922 = vmatpush1.msra.mxu1 %v827_v60  ;;  %v1022_v60 = vld [vmem:[%s5073_s7 + $0x180] sm:$0xff] }
  0x4d   : > { %732 = vmatpush2.msra.mxu0 %v641_v62  ;;  %v826_v62 = vld [vmem:[%s5071_s5 + $0x28] sm:$0xff] }
  0x4e   : > { %733 = vmatprep.subr.mxu0 %v640_v63  ;;  %v979_v63 = vld [vmem:[%s5073_s7 + $0x28] sm:$0xff]  ;;  %923 = vmatprep.subr.mxu1 %v826_v62  ;;  %v1021_v62 = vld [vmem:[%s5073_s7 + $0x178] sm:$0xff] }
  0x4f   : > { %734 = vmatpush2.msra.mxu0 %v639_v0  ;;  %v825_v0 = vld [vmem:[%s5071_s5 + $0x20] sm:$0xff] }
  0x50   : > { %736 = vmatmul.mubr.f32.vlgmr.msra.gmra.mxu0 %v603_v1  ;;  %1050 = vmatprep.subr.mxu0 %v1005_v12  ;;  %v978_v1 = vld [vmem:[%s5073_s7 + $0x20] sm:$0xff] }
  0x51   : > { %741 = vmatprep.mubr.f32.mxu0 %v606_v2  ;;  %1051 = vmatpush1.msra.mxu0 %v1004_v14  ;;  %v824_v2 = vld [vmem:[%s5071_s5 + $0x18] sm:$0xff]  ;;  %v821_v12 = vld [vmem:[%s5071_s5] sm:$0xff] }
  0x52   : > { %1052 = vmatprep.subr.mxu0 %v1003_v16  ;;  %924 = vmatpush1.msra.mxu1 %v825_v0  ;;  %v884_v14 = vld [vmem:[%s5071_s5 + $0x1f8] sm:$0xff]  ;;  %v883_v16 = vld [vmem:[%s5071_s5 + $0x1f0] sm:$0xff] }
  0x53   : > { %1053 = vmatpush1.msra.mxu0 %v1002_v18  ;;  %925 = vmatprep.subr.mxu1 %v824_v2  ;;  %v882_v18 = vld [vmem:[%s5071_s5 + $0x1e8] sm:$0xff]  ;;  %v1020_v0 = vld [vmem:[%s5073_s7 + $0x170] sm:$0xff] }
  0x54   : > { %742 = vmatmul.mubr.f32.gmra.mxu0 %v605_v3  ;;  %1054 = vmatprep.subr.mxu0 %v1001_v20  ;;  %v977_v3 = vld [vmem:[%s5073_s7 + $0x18] sm:$0xff]  ;;  %v881_v20 = vld [vmem:[%s5071_s5 + $0x1e0] sm:$0xff]  ;;  %v1019_v2 = vld [vmem:[%s5073_s7 + $0x168] sm:$0xff] }
  0x55   : > { %1055 = vmatpush1.msra.mxu0 %v1000_v22  ;;  %v880_v22 = vld [vmem:[%s5071_s5 + $0x1d8] sm:$0xff] }
  0x56   : > { %1056 = vmatprep.subr.mxu0 %v999_v23  ;;  %v1033_v23 = vld [vmem:[%s5073_s7 + $0x1d8] sm:$0xff] }
  0x57   : > { %1057 = vmatpush1.msra.mxu0 %v998_v25 }
  0x58   : > { %1058 = vmatprep.subr.mxu0 %v997_v27 }
  0x59   : > { %1059 = vmatpush1.msra.mxu0 %v996_v29 }
  0x5a   : > { %1060 = vmatprep.subr.mxu0 %v995_v31 }
  0x5b   : > { %1061 = vmatpush1.msra.mxu0 %v994_v33 }
  0x5c   : > { %1062 = vmatprep.subr.mxu0 %v993_v35 }
  0x5d   : > { %1063 = vmatpush1.msra.mxu0 %v992_v37 }
  0x5e   : > { %1064 = vmatprep.subr.mxu0 %v991_v39  ;;  %v878_v39 = vld [vmem:[%s5071_s5 + $0x1c8] sm:$0xff] }
  0x5f   : > { %1065 = vmatpush1.msra.mxu0 %v990_v41  ;;  %v877_v41 = vld [vmem:[%s5071_s5 + $0x1c0] sm:$0xff] }
  0x60   : > { %1066 = vmatprep.subr.mxu0 %v989_v43  ;;  %v876_v43 = vld [vmem:[%s5071_s5 + $0x1b8] sm:$0xff] }
  0x61   : > { %1067 = vmatpush1.msra.mxu0 %v988_v45  ;;  %v875_v45 = vld [vmem:[%s5071_s5 + $0x1b0] sm:$0xff] }
  0x62   : > { %1068 = vmatprep.subr.mxu0 %v987_v47  ;;  %v874_v47 = vld [vmem:[%s5071_s5 + $0x1a8] sm:$0xff] }
  0x63   : > { %1069 = vmatpush1.msra.mxu0 %v986_v49  ;;  %v873_v49 = vld [vmem:[%s5071_s5 + $0x1a0] sm:$0xff] }
  0x64   : > { %1070 = vmatprep.subr.mxu0 %v985_v51  ;;  %v872_v51 = vld [vmem:[%s5071_s5 + $0x198] sm:$0xff] }
  0x65   : > { %1071 = vmatpush1.msra.mxu0 %v984_v53  ;;  %v871_v53 = vld [vmem:[%s5071_s5 + $0x190] sm:$0xff] }
  0x66   : > { %1072 = vmatprep.subr.mxu0 %v983_v55  ;;  %v870_v55 = vld [vmem:[%s5071_s5 + $0x188] sm:$0xff] }
  0x67   : > { %1073 = vmatpush1.msra.mxu0 %v982_v57  ;;  %v869_v57 = vld [vmem:[%s5071_s5 + $0x180] sm:$0xff] }
  0x68   : > { %1074 = vmatprep.subr.mxu0 %v981_v59  ;;  %v868_v59 = vld [vmem:[%s5071_s5 + $0x178] sm:$0xff] }
  0x69   : > { %1075 = vmatpush1.msra.mxu0 %v980_v61  ;;  %v867_v61 = vld [vmem:[%s5071_s5 + $0x170] sm:$0xff] }
  0x6a   : > { %1076 = vmatprep.subr.mxu0 %v979_v63  ;;  %v866_v63 = vld [vmem:[%s5071_s5 + $0x168] sm:$0xff] }
  0x6b   : > { %1077 = vmatpush1.msra.mxu0 %v978_v1  ;;  %v865_v1 = vld [vmem:[%s5071_s5 + $0x160] sm:$0xff] }
  0x6c   : > { %1078 = vmatprep.subr.mxu0 %v977_v3  ;;  %v864_v3 = vld [vmem:[%s5071_s5 + $0x158] sm:$0xff] }
 0x110   : > { %v3409_v4 = vpop.f32.mrf.mxu0 }
 0x112   : > { %v3411_v5 = vpop.f32.mrf.mxu0 }
 0x113   : > { %v750_v6 = vadd.f32 %v3411_v5, %v3409_v4 }
 0x114   : > { %v3415_v7 = vpop.f32.mrf.mxu0 }
 0x115   : > { %751 = vadd.xlane.f32.xlu0 %v750_v6  ;;  %v823_v6 = vld [vmem:[%s5071_s5 + $0x10] sm:$0xff] }
 0x116   : > { %v3417_v8 = vpop.f32.mrf.mxu0  ;;  %926 = vmatpush1.msra.mxu1 %v823_v6  ;;  %v1018_v6 = vld [vmem:[%s5073_s7 + $0x160] sm:$0xff] }
 0x117   : > { %v753_v9 = vadd.f32 %v3417_v8, %v3415_v7  ;;  %927 = vmatprep.subr.mxu1 %v822_v10  ;;  %v1017_v10 = vld [vmem:[%s5073_s7 + $0x158] sm:$0xff] }
 0x118   : > { %928 = vmatpush1.msra.mxu1 %v821_v12  ;;  %v1016_v12 = vld [vmem:[%s5073_s7 + $0x150] sm:$0xff] }
 0x119   : > { %754 = vadd.xlane.f32.xlu0 %v753_v9  ;;  %v976_v9 = vld [vmem:[%s5073_s7 + $0x10] sm:$0xff]  ;;  %929 = vmatprep.subr.mxu1 %v884_v14  ;;  %v1015_v14 = vld [vmem:[%s5073_s7 + $0x148] sm:$0xff] }
 0x11a   : > { %1079 = vmatpush1.msra.mxu0 %v976_v9  ;;  %930 = vmatpush2.msra.mxu1 %v883_v16  ;;  %v863_v9 = vld [vmem:[%s5071_s5 + $0x150] sm:$0xff]  ;;  %v1014_v16 = vld [vmem:[%s5073_s7 + $0x140] sm:$0xff] }
 0x11b   : > { %1080 = vmatprep.subr.mxu0 %v975_v11  ;;  %931 = vmatprep.subr.mxu1 %v882_v18  ;;  %v862_v11 = vld [vmem:[%s5071_s5 + $0x148] sm:$0xff]  ;;  %v1013_v18 = vld [vmem:[%s5073_s7 + $0x138] sm:$0xff] }
 0x11c   : > { %1081 = vmatpush1.msra.mxu0 %v974_v13  ;;  %932 = vmatpush2.msra.mxu1 %v881_v20  ;;  %v861_v13 = vld [vmem:[%s5071_s5 + $0x140] sm:$0xff]  ;;  %v1012_v20 = vld [vmem:[%s5073_s7 + $0x130] sm:$0xff] }
 0x11d   : > { %1082 = vmatprep.subr.mxu0 %v1037_v15  ;;  %933 = vmatprep.subr.mxu1 %v880_v22  ;;  %v860_v15 = vld [vmem:[%s5071_s5 + $0x138] sm:$0xff]  ;;  %v1011_v22 = vld [vmem:[%s5073_s7 + $0x128] sm:$0xff] }
 0x11e   : > { %1083 = vmatpush2.msra.mxu0 %v1036_v17  ;;  %934 = vmatpush2.msra.mxu1 %v879_v24  ;;  %v859_v17 = vld [vmem:[%s5071_s5 + $0x130] sm:$0xff]  ;;  %v1010_v24 = vld [vmem:[%s5073_s7 + $0x120] sm:$0xff] }
 0x11f   : > { %1084 = vmatprep.subr.mxu0 %v1035_v19  ;;  %935 = vmatprep.subr.mxu1 %v878_v39  ;;  %v858_v19 = vld [vmem:[%s5071_s5 + $0x128] sm:$0xff] }
 0x120   : > { %1085 = vmatpush2.msra.mxu0 %v1034_v21  ;;  %936 = vmatpush2.msra.mxu1 %v877_v41  ;;  %v857_v21 = vld [vmem:[%s5071_s5 + $0x120] sm:$0xff] }
 0x121   : > { %1086 = vmatprep.subr.mxu0 %v1033_v23  ;;  %937 = vmatprep.subr.mxu1 %v876_v43  ;;  %v856_v23 = vld [vmem:[%s5071_s5 + $0x118] sm:$0xff] }
 0x122   : > { %1087 = vmatpush2.msra.mxu0 %v1032_v40  ;;  %938 = vmatpush2.msra.mxu1 %v875_v45 }
 0x123   : > { %1088 = vmatprep.subr.mxu0 %v1031_v42  ;;  %939 = vmatprep.subr.mxu1 %v874_v47  ;;  %v784_v42 = vlaneseq  ;;  %v748_v47 = vld [vmem:[%s5094_s22] sm:$0x3]  ;;  %s602_s22 = scalar_lea.vmem %s5085_s19, %s2939_s20 }
 0x124   : > { %1089 = vmatpush2.msra.mxu0 %v1030_v44  ;;  %940 = vmatpush2.msra.mxu1 %v873_v49 }
 0x125   : > { %1090 = vmatprep.subr.mxu0 %v1029_v46  ;;  %941 = vmatprep.subr.mxu1 %v872_v51  ;;  %v3828_v44 = vshrl.u32 %v784_v42, 7  ;;  %v1130_v42 = vld [vmem:[%s5075_s9 + $0x18] sm:$0xff] }
 0x126   : > { %1091 = vmatpush2.msra.mxu0 %v1028_v48  ;;  %942 = vmatpush2.msra.mxu1 %v871_v53  ;;  %v749_v48 = vld [vmem:[%s5070_s4] sm:$0x3] }
 0x127   : > { %1092 = vmatprep.subr.mxu0 %v1027_v50  ;;  %943 = vmatprep.subr.mxu1 %v870_v55  ;;  %v3831_v45 = vsub.s32 1, %v3828_v44  ;;  %v3834_v46 = vsub.s32 0, %v3828_v44 }
 0x128   : > { %1093 = vmatpush2.msra.mxu0 %v1026_v52  ;;  %944 = vmatpush2.msra.mxu1 %v869_v57 }
 0x129   : > { %1094 = vmatprep.subr.mxu0 %v1025_v54  ;;  %945 = vmatprep.subr.mxu1 %v868_v59  ;;  %v791_v49 = vrot.slane %v748_v47, %v3831_v45  ;;  %v787_v50 = vrot.slane %v748_v47, %v3834_v46  ;;  %v806_v53 = vrot.slane %v749_v48, %v3831_v45  ;;  %v814_v59 = vld [vmem:[%s5095_s3 + $0x8] sm:$0xff] }
 0x12a   : > { %1095 = vmatpush2.msra.mxu0 %v1024_v56  ;;  %946 = vmatpush2.msra.mxu1 %v867_v61  ;;  %v802_v55 = vrot.slane %v749_v48, %v3834_v46  ;;  %v1128_v47 = vld [vmem:[%s5075_s9 + $0x8] sm:$0xff]  ;;  %v1127_v48 = vld [vmem:[%s5075_s9] sm:$0xff] }
 0x12b   : > { %1096 = vmatprep.subr.mxu0 %v1023_v58  ;;  %947 = vmatprep.subr.mxu1 %v866_v63 }
 0x12c   : > { %1097 = vmatpush2.msra.mxu0 %v1022_v60  ;;  %948 = vmatpush2.msra.mxu1 %v865_v1  ;;  %v813_v60 = vld [vmem:[%s5095_s3] sm:$0xff] }
 0x12d   : > { %1098 = vmatprep.subr.mxu0 %v1021_v62  ;;  %949 = vmatprep.subr.mxu1 %v864_v3  ;;  %v1157_v3 = vld [vmem:[%s5075_s9 + $0xf0] sm:$0xff] }
 0x12e   : > { %1099 = vmatpush2.msra.mxu0 %v1020_v0  ;;  %950 = vmatpush2.msra.mxu1 %v863_v9  ;;  %v815_v9 = vld [vmem:[%s5095_s3 + $0x10] sm:$0xff] }
 0x12f   : > { %1100 = vmatprep.subr.mxu0 %v1019_v2  ;;  %951 = vmatprep.subr.mxu1 %v862_v11  ;;  %v1155_v11 = vld [vmem:[%s5075_s9 + $0xe0] sm:$0xff] }
 0x130   : > { %1101 = vmatpush2.msra.mxu0 %v1018_v6  ;;  %952 = vmatpush2.msra.mxu1 %v861_v13  ;;  %v816_v6 = vld [vmem:[%s5095_s3 + $0x18] sm:$0xff] }
 0x131   : > { %1102 = vmatprep.subr.mxu0 %v1017_v10  ;;  %953 = vmatprep.subr.mxu1 %v860_v15  ;;  %v1154_v13 = vld [vmem:[%s5075_s9 + $0xd8] sm:$0xff]  ;;  %v1153_v15 = vld [vmem:[%s5075_s9 + $0xd0] sm:$0xff] }
 0x132   : > { %1103 = vmatpush2.msra.mxu0 %v1016_v12  ;;  %954 = vmatpush2.msra.mxu1 %v859_v17  ;;  %v1151_v17 = vld [vmem:[%s5075_s9 + $0xc0] sm:$0xff] }
 0x133   : > { %1104 = vmatprep.subr.mxu0 %v1015_v14  ;;  %955 = vmatprep.subr.mxu1 %v858_v19  ;;  %v1149_v19 = vld [vmem:[%s5075_s9 + $0xb0] sm:$0xff] }
 0x134   : > { %1105 = vmatpush2.msra.mxu0 %v1014_v16  ;;  %956 = vmatpush2.msra.mxu1 %v857_v21  ;;  %v1152_v16 = vld [vmem:[%s5075_s9 + $0xc8] sm:$0xff]  ;;  %v1147_v21 = vld [vmem:[%s5075_s9 + $0xa0] sm:$0xff] }
 0x135   : > { %1106 = vmatprep.subr.mxu0 %v1013_v18  ;;  %957 = vmatprep.subr.mxu1 %v856_v23  ;;  %v1150_v18 = vld [vmem:[%s5075_s9 + $0xb8] sm:$0xff]  ;;  %v1145_v23 = vld [vmem:[%s5075_s9 + $0x90] sm:$0xff] }
 0x136   : > { %1107 = vmatpush2.msra.mxu0 %v1012_v20  ;;  %v1148_v20 = vld [vmem:[%s5075_s9 + $0xa8] sm:$0xff] }
 0x137   : > { %1108 = vmatprep.subr.mxu0 %v1011_v22  ;;  %v1146_v22 = vld [vmem:[%s5075_s9 + $0x98] sm:$0xff] }
 0x138   : > { %1109 = vmatpush2.msra.mxu0 %v1010_v24  ;;  %v1144_v24 = vld [vmem:[%s5075_s9 + $0x88] sm:$0xff] }
 0x19e   : > { %v752_v25 = vpop.xlane.xlu0 %751 }
 0x19f   : > { %v757_v26 = vmul.f32 0.00390625, %v752_v25  ;;  %v855_v25 = vld [vmem:[%s5071_s5 + $0x110] sm:$0xff] }
 0x1a0   : > { %958 = vmatpush2.msra.mxu1 %v855_v25  ;;  %v1143_v25 = vld [vmem:[%s5075_s9 + $0x80] sm:$0xff] }
 0x1a1   : > { %v3647_v27 = vsub.f32 %v3409_v4, %v757_v26  ;;  %v3650_v28 = vsub.f32 %v3411_v5, %v757_v26  ;;  %v1009_v26 = vld [vmem:[%s5073_s7 + $0x118] sm:$0xff] }
 0x1a2   : > { %v755_v29 = vpop.xlane.xlu0 %754  ;;  %1110 = vmatprep.subr.mxu0 %v1009_v26  ;;  %v1142_v26 = vld [vmem:[%s5075_s9 + $0x78] sm:$0xff] }
 0x1a3   : > { %v758_v30 = vmul.f32 0.00390625, %v755_v29  ;;  %v763_v31 = vmul.f32 %v3647_v27, %v3647_v27  ;;  %v764_v32 = vmul.f32 %v3650_v28, %v3650_v28  ;;  %v854_v29 = vld [vmem:[%s5071_s5 + $0x108] sm:$0xff] }
 0x1a4   : > { %959 = vmatprep.subr.mxu1 %v854_v29  ;;  %v1141_v29 = vld [vmem:[%s5075_s9 + $0x70] sm:$0xff] }
 0x1a5   : > { %v3657_v33 = vsub.f32 %v3415_v7, %v758_v30  ;;  %v3660_v34 = vsub.f32 %v3417_v8, %v758_v30  ;;  %v767_v35 = vadd.f32 %v764_v32, %v763_v31  ;;  %v1008_v30 = vld [vmem:[%s5073_s7 + $0x110] sm:$0xff]  ;;  %v853_v31 = vld [vmem:[%s5071_s5 + $0x100] sm:$0xff]  ;;  %v1007_v32 = vld [vmem:[%s5073_s7 + $0x108] sm:$0xff] }
 0x1a6   : > { %1111 = vmatpush2.msra.mxu0 %v1008_v30  ;;  %960 = vmatpush2.msra.mxu1 %v853_v31  ;;  %v1140_v30 = vld [vmem:[%s5075_s9 + $0x68] sm:$0xff]  ;;  %v1139_v31 = vld [vmem:[%s5075_s9 + $0x60] sm:$0xff] }
 0x1a7   : > { %768 = vadd.xlane.f32.xlu1 %v767_v35  ;;  %v765_v36 = vmul.f32 %v3657_v33, %v3657_v33  ;;  %v766_v37 = vmul.f32 %v3660_v34, %v3660_v34  ;;  %1112 = vmatprep.subr.mxu0 %v1007_v32  ;;  %v1006_v35 = vld [vmem:[%s5073_s7 + $0x100] sm:$0xff]  ;;  %v1138_v32 = vld [vmem:[%s5075_s9 + $0x58] sm:$0xff] }
 0x1a8   : > { %1113 = vmatpush2.msra.mxu0 %v1006_v35  ;;  %v1137_v35 = vld [vmem:[%s5075_s9 + $0x50] sm:$0xff] }
 0x1a9   : > { %v770_v38 = vadd.f32 %v766_v37, %v765_v36  ;;  %v1158_v36 = vld [vmem:[%s5075_s9 + $0xf8] sm:$0xff] }
 0x1aa   : > { %1203 = vmatprep.subr.mxu1 %v1158_v36  ;;  %v1136_v36 = vld [vmem:[%s5075_s9 + $0x48] sm:$0xff] }
 0x1ab   : > { %771 = vadd.xlane.f32.xlu1 %v770_v38 }
 0x230   : > { %v769_v37 = vpop.xlane.xlu1 %768 }
 0x231   : > { %v773_v38 = vmul.f32 0.00390625, %v769_v37  ;;  %v1135_v37 = vld [vmem:[%s5075_s9 + $0x40] sm:$0xff] }
 0x233   : > { %v775_v39 = vadd.f32 1e-05, %v773_v38  ;;  %v1134_v38 = vld [vmem:[%s5075_s9 + $0x38] sm:$0xff] }
 0x234   : > { %v772_v40 = vpop.xlane.xlu1 %771 }
 0x235   : > { %3038 = vrsqrt.f32 %v775_v39  ;;  %v774_v41 = vmul.f32 0.00390625, %v772_v40  ;;  %v1133_v39 = vld [vmem:[%s5075_s9 + $0x30] sm:$0xff]  ;;  %v1132_v40 = vld [vmem:[%s5075_s9 + $0x28] sm:$0xff] }
 0x237   : > { %v776_v43 = vadd.f32 1e-05, %v774_v41  ;;  %v1131_v41 = vld [vmem:[%s5075_s9 + $0x20] sm:$0xff] }
 0x239   : > { %3040 = vrsqrt.f32 %v776_v43  ;;  %v1129_v43 = vld [vmem:[%s5075_s9 + $0x10] sm:$0xff] }
 0x242   : > { %v3039_v51 = vpop.eup %3038 }
 0x243   : > { %v780_v52 = vmul.f32 %v3039_v51, %v3650_v28  ;;  %v779_v54 = vmul.f32 %v3039_v51, %v3647_v27  ;;  %v1188_v51 = vld [vmem:[%s5075_s9 + $0x1e8] sm:$0xff] }
 0x245   : > { %v795_v56 = vmul.f32 %v791_v49, %v780_v52  ;;  %v794_v57 = vmul.f32 %v787_v50, %v779_v54  ;;  %v1187_v52 = vld [vmem:[%s5075_s9 + $0x1e0] sm:$0xff]  ;;  %v1185_v54 = vld [vmem:[%s5075_s9 + $0x1d0] sm:$0xff] }
 0x246   : > { %v3041_v58 = vpop.eup %3040 }
 0x247   : > { %v810_v61 = vadd.f32 %v806_v53, %v795_v56  ;;  %v809_v62 = vadd.f32 %v802_v55, %v794_v57  ;;  %v782_v28 = vmul.f32 %v3041_v58, %v3660_v34  ;;  %v781_v63 = vmul.f32 %v3041_v58, %v3657_v33  ;;  %v1156_v33 = vld [vmem:[%s5075_s9 + $0xe8] sm:$0xff]  ;;  %v1183_v56 = vld [vmem:[%s5075_s9 + $0x1c0] sm:$0xff]  ;;  %v1182_v57 = vld [vmem:[%s5075_s9 + $0x1b8] sm:$0xff] }
 0x248   : > { %v1181_v58 = vld [vmem:[%s5075_s9 + $0x1b0] sm:$0xff] }
 0x249   : > { %v818_v27 = vadd.f32 %v814_v59, %v810_v61  ;;  %v3856_v0 = vadd.f32 %v813_v60, %v809_v62  ;;  %v797_v1 = vmul.f32 %v791_v49, %v782_v28  ;;  %v796_v2 = vmul.f32 %v787_v50, %v781_v63  ;;  %v1190_v49 = vld [vmem:[%s5075_s9 + $0x1f8] sm:$0xff]  ;;  %v1189_v50 = vld [vmem:[%s5075_s9 + $0x1f0] sm:$0xff]  ;;  %v1180_v59 = vld [vmem:[%s5075_s9 + $0x1a8] sm:$0xff] }
 0x24a   : > { %v1179_v60 = vld [vmem:[%s5075_s9 + $0x1a0] sm:$0xff]  ;;  %v1178_v61 = vld [vmem:[%s5075_s9 + $0x198] sm:$0xff]  ;;  %v1177_v62 = vld [vmem:[%s5075_s9 + $0x190] sm:$0xff] }
 0x24b   : > { %961 = vmatprep.mubr.f32.mxu1 %v818_v27  ;;  %1114 = vmatprep.mubr.f32.mxu0 %v818_v27  ;;  %v812_v34 = vadd.f32 %v806_v53, %v797_v1  ;;  %v811_v10 = vadd.f32 %v802_v55, %v796_v2  ;;  %v1186_v53 = vld [vmem:[%s5075_s9 + $0x1d8] sm:$0xff]  ;;  %v1184_v55 = vld [vmem:[%s5075_s9 + $0x1c8] sm:$0xff]  ;;  %v1175_v63 = vld [vmem:[%s5075_s9 + $0x180] sm:$0xff] }
 0x24c   : > { %962 = vmatmul.mubr.f32.vlgmr.msra.gmra.mxu1 %v3856_v0  ;;  %1115 = vmatmul.mubr.f32.vlgmr.msra.gmra.mxu0 %v3856_v0  ;;  %v1176_v28 = vld [vmem:[%s5075_s9 + $0x188] sm:$0xff]  ;;  %v1173_v1 = vld [vmem:[%s5075_s9 + $0x170] sm:$0xff] }
 0x24d   : > { %1204 = vmatpush1.msra.mxu1 %v1157_v3  ;;  %v3875_v12 = vadd.f32 %v816_v6, %v812_v34  ;;  %v3880_v14 = vadd.f32 %v815_v9, %v811_v10  ;;  %v1172_v2 = vld [vmem:[%s5075_s9 + $0x168] sm:$0xff]  ;;  %v1171_v3 = vld [vmem:[%s5075_s9 + $0x160] sm:$0xff]  ;;  %v1170_v6 = vld [vmem:[%s5075_s9 + $0x158] sm:$0xff] }
 0x24e   : > { %1205 = vmatprep.subr.mxu1 %v1156_v33  ;;  %v1169_v9 = vld [vmem:[%s5075_s9 + $0x150] sm:$0xff]  ;;  %v1168_v33 = vld [vmem:[%s5075_s9 + $0x148] sm:$0xff]  ;;  %v1167_v34 = vld [vmem:[%s5075_s9 + $0x140] sm:$0xff] }
 0x24f   : > { %1206 = vmatpush1.msra.mxu1 %v1155_v11  ;;  %967 = vmatprep.mubr.f32.mxu1 %v3875_v12  ;;  %v1166_v10 = vld [vmem:[%s5075_s9 + $0x138] sm:$0xff]  ;;  %v1165_v11 = vld [vmem:[%s5075_s9 + $0x130] sm:$0xff] }
 0x250   : > { %1120 = vmatprep.mubr.f32.mxu0 %v3875_v12  ;;  %1207 = vmatprep.subr.mxu1 %v1154_v13  ;;  %v1164_v13 = vld [vmem:[%s5075_s9 + $0x128] sm:$0xff] }
 0x251   : > { %968 = vmatmul.mubr.f32.gmra.mxu1 %v3880_v14  ;;  %1121 = vmatmul.mubr.f32.gmra.mxu0 %v3880_v14 }
 0x252   : > { %1208 = vmatpush1.msra.mxu1 %v1153_v15  ;;  %1267 = vmatprep.mubr.f32.mxu1 %v818_v27  ;;  %v1174_v27 = vld [vmem:[%s5075_s9 + $0x178] sm:$0xff]  ;;  %v1163_v15 = vld [vmem:[%s5075_s9 + $0x120] sm:$0xff] }
 0x253   : > { %1209 = vmatprep.subr.mxu1 %v1152_v16  ;;  %v1162_v16 = vld [vmem:[%s5075_s9 + $0x118] sm:$0xff] }
 0x254   : > { %1210 = vmatpush1.msra.mxu1 %v1151_v17  ;;  %v1161_v17 = vld [vmem:[%s5075_s9 + $0x110] sm:$0xff] }
 0x255   : > { %1211 = vmatprep.subr.mxu1 %v1150_v18  ;;  %v1160_v18 = vld [vmem:[%s5075_s9 + $0x108] sm:$0xff] }
 0x256   : > { %1212 = vmatpush1.msra.mxu1 %v1149_v19  ;;  %v1159_v19 = vld [vmem:[%s5075_s9 + $0x100] sm:$0xff] }
 0x257   : > { %1213 = vmatprep.subr.mxu1 %v1148_v20  ;;  %v4069_v20 = vld [vmem:[%s5072_s6] sm:$0x3] }
 0x258   : > { %1214 = vmatpush1.msra.mxu1 %v1147_v21  ;;  %v1038_v21 = vld [vmem:[%s5074_s8] sm:$0x3] }
 0x259   : > { %1215 = vmatprep.subr.mxu1 %v1146_v22  ;;  %v890_v22 = vrot.slane %v4069_v20, %v3834_v46 }
 0x25a   : > { %1216 = vmatpush1.msra.mxu1 %v1145_v23  ;;  %v1043_v23 = vrot.slane %v1038_v21, %v3834_v46 }
 0x25b   : > { %1217 = vmatprep.subr.mxu1 %v1144_v24 }
 0x25c   : > { %1218 = vmatpush1.msra.mxu1 %v1143_v25 }
 0x25d   : > { %1219 = vmatprep.subr.mxu1 %v1142_v26 }
 0x25e   : > { %1220 = vmatpush1.msra.mxu1 %v1141_v29 }
 0x25f   : > { %1221 = vmatprep.subr.mxu1 %v1140_v30 }
 0x260   : > { %1222 = vmatpush1.msra.mxu1 %v1139_v31 }
 0x261   : > { %1223 = vmatprep.subr.mxu1 %v1138_v32 }
 0x262   : > { %1224 = vmatpush1.msra.mxu1 %v1137_v35 }
 0x263   : > { %1225 = vmatprep.subr.mxu1 %v1136_v36 }
 0x264   : > { %1226 = vmatpush1.msra.mxu1 %v1135_v37 }
 0x265   : > { %1227 = vmatprep.subr.mxu1 %v1134_v38  ;;  %v1191_v38 = vld [vmem:[%s5076_s10] sm:$0x3] }
 0x266   : > { %1228 = vmatpush1.msra.mxu1 %v1133_v39 }
 0x267   : > { %1229 = vmatprep.subr.mxu1 %v1132_v40 }
 0x268   : > { %1230 = vmatpush1.msra.mxu1 %v1131_v41  ;;  %v1196_v41 = vrot.slane %v1191_v38, %v3834_v46 }
 0x269   : > { %1231 = vmatprep.subr.mxu1 %v1130_v42 }
 0x26a   : > { %1232 = vmatpush1.msra.mxu1 %v1129_v43 }
 0x26b   : > { %1233 = vmatprep.subr.mxu1 %v1128_v47 }
 0x26c   : > { %1234 = vmatpush1.msra.mxu1 %v1127_v48 }
 0x26d   : > { %1235 = vmatprep.subr.mxu1 %v1190_v49 }
 0x26e   : > { %1236 = vmatpush2.msra.mxu1 %v1189_v50 }
 0x26f   : > { %1237 = vmatprep.subr.mxu1 %v1188_v51 }
 0x270   : > { %1238 = vmatpush2.msra.mxu1 %v1187_v52  ;;  %v1200_v52 = vrot.slane %v1191_v38, %v3831_v45 }
 0x271   : > { %1239 = vmatprep.subr.mxu1 %v1186_v53 }
 0x272   : > { %1240 = vmatpush2.msra.mxu1 %v1185_v54 }
 0x273   : > { %1241 = vmatprep.subr.mxu1 %v1184_v55 }
 0x274   : > { %1242 = vmatpush2.msra.mxu1 %v1183_v56 }
 0x275   : > { %1243 = vmatprep.subr.mxu1 %v1182_v57 }
 0x276   : > { %1244 = vmatpush2.msra.mxu1 %v1181_v58 }
 0x277   : > { %1245 = vmatprep.subr.mxu1 %v1180_v59 }
 0x278   : > { %1246 = vmatpush2.msra.mxu1 %v1179_v60 }
 0x279   : > { %1247 = vmatprep.subr.mxu1 %v1178_v61 }
 0x27a   : > { %1248 = vmatpush2.msra.mxu1 %v1177_v62 }
 0x27b   : > { %1249 = vmatprep.subr.mxu1 %v1176_v28 }
 0x27c   : > { %1250 = vmatpush2.msra.mxu1 %v1175_v63 }
 0x27d   : > { %1251 = vmatprep.subr.mxu1 %v1174_v27 }
 0x27e   : > { %1252 = vmatpush2.msra.mxu1 %v1173_v1 }
 0x27f   : > { %1253 = vmatprep.subr.mxu1 %v1172_v2 }
 0x280   : > { %1254 = vmatpush2.msra.mxu1 %v1171_v3 }
 0x281   : > { %1255 = vmatprep.subr.mxu1 %v1170_v6 }
 0x282   : > { %1256 = vmatpush2.msra.mxu1 %v1169_v9 }
 0x283   : > { %1257 = vmatprep.subr.mxu1 %v1168_v33 }
 0x284   : > { %1258 = vmatpush2.msra.mxu1 %v1167_v34 }
 0x285   : > { %1259 = vmatprep.subr.mxu1 %v1166_v10 }
 0x286   : > { %1260 = vmatpush2.msra.mxu1 %v1165_v11 }
 0x287   : > { %1261 = vmatprep.subr.mxu1 %v1164_v13 }
 0x288   : > { %1262 = vmatpush2.msra.mxu1 %v1163_v15 }
 0x289   : > { %1263 = vmatprep.subr.mxu1 %v1162_v16 }
 0x28a   : > { %1264 = vmatpush2.msra.mxu1 %v1161_v17 }
 0x28b   : > { %1265 = vmatprep.subr.mxu1 %v1160_v18 }
 0x28c   : > { %1266 = vmatpush2.msra.mxu1 %v1159_v19 }
 0x28d   : > { %1268 = vmatmul.mubr.f32.vlgmr.msra.gmra.mxu1 %v3856_v0  ;;  %v4078_v0 = vrot.slane %v1038_v21, %v3831_v45 }
 0x28e   : > { %1273 = vmatprep.mubr.f32.mxu1 %v3875_v12 }
 0x291   : > { %1274 = vmatmul.mubr.f32.gmra.mxu1 %v3880_v14 }
 0x30c   : > { %v963_v12 = vpop.f32.mrf.mxu1  ;;  %v1116_v24 = vpop.f32.mrf.mxu0 }
 0x30d   : > { %v964_v14 = vadd.f32 %v963_v12, %v890_v22  ;;  %v1117_v25 = vadd.f32 %v1116_v24, %v1043_v23 }
 0x30e   : > { %v4080_v26 = vpop.f32.mrf.mxu1  ;;  %v1118_v29 = vpop.f32.mrf.mxu0 }
 0x30f   : > { %v4083_v30 = vadd.f32 %v1118_v29, %v4078_v0  ;;  %1480 = vrot.lane.b32.xlu1 %v1117_v25, %s3090_s2  ;;  %2977 = vmatprep.mubr.msk.f32.mxu0 %vm1280_vm0, %v964_v14 }
 0x311   : > { %v1122_v31 = vpop.f32.mrf.mxu0  ;;  %v969_v32 = vpop.f32.mrf.mxu1 }
 0x312   : > { %v1123_v35 = vadd.f32 %v1122_v31, %v1043_v23  ;;  %v970_v36 = vadd.f32 %v969_v32, %v890_v22 }
 0x313   : > { %1476 = vrot.lane.b32.xlu1 %v964_v14, %s3090_s2  ;;  %v4095_v37 = vpop.f32.mrf.mxu1  ;;  %v4124_v56 = vpop.f32.mrf.mxu0 }
 0x314   : > { %1482 = vrot.lane.b32.xlu0 %v1123_v35, %s3090_s2  ;;  %2973 = vmatprep.subr.msk.mxu0 %vm1280_vm0, %v1123_v35 }
 0x315   : > { %2974 = vmatpush3.xpose.msk.msra.mxu0 %vm1280_vm0, %v1123_v35 }
 0x316   : > { %2975 = vmatprep.subr.msk.mxu0 %vm1280_vm0, %v1117_v25 }
 0x317   : > { %1478 = vrot.lane.b32.xlu1 %v970_v36, %s3090_s2 }
 0x319   : > { %2976 = vmatpush3.xpose.msk.msra.mxu0 %vm1280_vm0, %v1117_v25 }
 0x31c   : > { %2978 = vmatmul.mubr.msk.f32.vlgmr.msra.gmra.mxu0 %vm1280_vm0, %v970_v36 }
 0x34d   : > { %v1269_v39 = vpop.f32.mrf.mxu1 }
 0x34e   : > { %v4103_v47 = vadd.f32 %v1269_v39, %v1196_v41 }
 0x34f   : > { %v1271_v40 = vpop.f32.mrf.mxu1 }
 0x350   : > { %v4118_v55 = vadd.f32 %v1271_v40, %v1200_v52 }
 0x351   : > { %v1275_v42 = vpop.f32.mrf.mxu1 }
 0x352   : > { %v4101_v43 = vadd.f32 %v1275_v42, %v1196_v41 }
 0x353   : > { %v1277_v51 = vpop.f32.mrf.mxu1 }
 0x354   : > { %2980 = vmatprep.subr.mxu1 %v4101_v43  ;;  %v4114_v53 = vadd.f32 %v1277_v51, %v1200_v52 }
 0x355   : > { %2981 = vmatpush3.msra.mxu1 %v4101_v43 }
 0x356   : > { %2982 = vmatprep.subr.mxu1 %v4103_v47 }
 0x357   : > { %2983 = vmatpush3.msra.mxu1 %v4103_v47 }
 0x381   : > { %v1481_v48 = vpop.permute.xlu1 %1480 }
 0x385   : > { %v1477_v49 = vpop.permute.xlu1 %1476 }
 0x386   : > { %v1483_v50 = vpop.permute.xlu0 %1482  ;;  %2991 = vmatprep.mubr.msk.f32.mxu0 %vm1280_vm0, %v1477_v49 }
 0x387   : > { %2987 = vmatprep.subr.msk.mxu0 %vm1280_vm0, %v1483_v50 }
 0x388   : > { %2988 = vmatpush3.xpose.msk.msra.mxu0 %vm1280_vm0, %v1483_v50  ;;  %v894_v50 = vrot.slane %v4069_v20, %v3831_v45 }
 0x389   : > { %2989 = vmatprep.subr.msk.mxu0 %vm1280_vm0, %v1481_v48  ;;  %v1479_v54 = vpop.permute.xlu1 %1478 }
 0x38a   : > { %v972_v20 = vadd.f32 %v4095_v37, %v894_v50 }
 0x38c   : > { %2990 = vmatpush3.xpose.msk.msra.mxu0 %vm1280_vm0, %v1481_v48 }
 0x38d   : > { %3008 = vmatprep.subr.mxu0 %v4114_v53 }
 0x38f   : > { %2992 = vmatmul.mubr.msk.f32.vlgmr.msra.gmra.mxu0 %vm1280_vm0, %v1479_v54  ;;  %v966_v54 = vadd.f32 %v4080_v26, %v894_v50 }
 0x390   : > { %3009 = vmatpush3.msra.mxu0 %v4114_v53 }
 0x391   : > { %3010 = vmatprep.subr.mxu0 %v4118_v55 }
 0x392   : > { %3011 = vmatpush3.msra.mxu0 %v4118_v55 }
 0x3dc   : > { %v2979_v57 = vpop.f32.mrf.mxu0 }
 0x3dd   : > { %v1369_v58 = vmul.f32 0.125, %v2979_v57 }
 0x3de   : > { %v1359_v59 = vpop.f32.mrf.mxu0 }
 0x3df   : > { %v1368_v60 = vmul.f32 0.125, %v1359_v59  ;;  %v1374_v61 = vsel %vm1370_vm1, %v1369_v58, -inf }
 0x3e0   : > { %1375 = vmax.xlane.f32.xlu1 %v1374_v61 }
 0x3e1   : > { %v1371_v62 = vsel %vm1370_vm1, %v1368_v60, -inf }
 0x3e2   : > { %1372 = vmax.xlane.f32.xlu0 %v1371_v62 }
 0x44f   : > { %v2993_v28 = vpop.f32.mrf.mxu0 }
 0x450   : > { %v1568_v1 = vmul.f32 0.125, %v2993_v28 }
 0x451   : > { %v1558_v63 = vpop.f32.mrf.mxu0 }
 0x452   : > { %v1567_v27 = vmul.f32 0.125, %v1558_v63  ;;  %v1572_v3 = vsel %vm1370_vm1, %v1568_v1, -inf }
 0x454   : > { %v1569_v2 = vsel %vm1370_vm1, %v1567_v27, -inf }
 0x455   : > { %1570 = vmax.xlane.f32.xlu0 %v1569_v2 }
 0x459   : > { %1573 = vmax.xlane.f32.xlu0 %v1572_v3 }
 0x469   : > { %v1376_v6 = vpop.xlane.xlu1 %1375 }
 0x46a   : > { %v1378_v9 = vsub.f32 %v1369_v58, %v1376_v6 }
 0x46b   : > { %v1373_v33 = vpop.xlane.xlu0 %1372 }
 0x46c   : > { %v1381_v34 = vmul.f32 1.442695, %v1378_v9  ;;  %v1377_v10 = vsub.f32 %v1368_v60, %v1373_v33 }
 0x46e   : > { %3042 = vpow2.f32 %v1381_v34  ;;  %v1379_v11 = vmul.f32 1.442695, %v1377_v10 }
 0x470   : > { %3044 = vpow2.f32 %v1379_v11 }
 0x47b   : > { %v3043_v13 = vpop.eup %3042 }
 0x47c   : > { %v1386_v15 = vsel %vm1370_vm1, %v3043_v13, 0.0 }
 0x47d   : > { %v3045_v16 = vpop.eup %3044  ;;  %1387 = vadd.xlane.f32.xlu1 %v1386_v15 }
 0x47e   : > { %v1383_v17 = vsel %vm1370_vm1, %v3045_v16, 0.0 }
 0x47f   : > { %1384 = vadd.xlane.f32.xlu0 %v1383_v17 }
 0x4de   : > { %v1571_v18 = vpop.xlane.xlu0 %1570 }
 0x4df   : > { %v1575_v19 = vsub.f32 %v1567_v27, %v1571_v18 }
 0x4e1   : > { %v1577_v21 = vmul.f32 1.442695, %v1575_v19 }
 0x4e2   : > { %v1574_v22 = vpop.xlane.xlu0 %1573 }
 0x4e3   : > { %3046 = vpow2.f32 %v1577_v21  ;;  %v1576_v23 = vsub.f32 %v1568_v1, %v1574_v22 }
 0x4e5   : > { %v1579_v12 = vmul.f32 1.442695, %v1576_v23 }
 0x4e7   : > { %3048 = vpow2.f32 %v1579_v12 }
 0x4f0   : > { %v3047_v24 = vpop.eup %3046 }
 0x4f1   : > { %v1581_v14 = vsel %vm1370_vm1, %v3047_v24, 0.0 }
 0x4f2   : > { %1582 = vadd.xlane.f32.xlu0 %v1581_v14 }
 0x4f4   : > { %v3049_v25 = vpop.eup %3048 }
 0x4f5   : > { %v1584_v29 = vsel %vm1370_vm1, %v3049_v25, 0.0 }
 0x4f6   : > { %1585 = vadd.xlane.f32.xlu1 %v1584_v29 }
 0x506   : > { %v1388_v31 = vpop.xlane.xlu1 %1387 }
 0x507   : > { %1593 = vrot.lane.b32.xlu1 %v4103_v47, %s3090_s2  ;;  %3050 = vrcp.f32 %v1388_v31 }
 0x508   : > { %1595 = vrot.lane.b32.xlu0 %v4101_v43, %s3090_s2  ;;  %v1385_v32 = vpop.xlane.xlu0 %1384  ;;  %v1125_v43 = vadd.f32 %v4124_v56, %v4078_v0 }
 0x509   : > { %3052 = vrcp.f32 %v1385_v32 }
 0x514   : > { %v3051_v35 = vpop.eup %3050 }
 0x515   : > { %v1392_v39 = vmul.f32 %v3051_v35, %v3043_v13 }
 0x516   : > { %v3053_v36 = vpop.eup %3052 }
 0x517   : > { %v1391_v38 = vmul.f32 %v3053_v36, %v3045_v16 }
 0x519   : > { %2984 = vmatprep.mubr.msk.f32.mxu1 %vm1370_vm1, %v1391_v38 }
 0x51a   : > { %2985 = vmatmul.mubr.msk.f32.vlgmr.msra.gmra.mxu1 %vm1370_vm1, %v1392_v39 }
 0x57b   : > { %v1583_v40 = vpop.xlane.xlu0 %1582 }
 0x57c   : > { %3054 = vrcp.f32 %v1583_v40 }
 0x57f   : > { %v1596_v41 = vpop.permute.xlu0 %1595  ;;  %v1586_v42 = vpop.xlane.xlu1 %1585 }
 0x580   : > { %3056 = vrcp.f32 %v1586_v42  ;;  %2994 = vmatprep.subr.mxu1 %v1596_v41 }
 0x581   : > { %2995 = vmatpush3.msra.mxu1 %v1596_v41 }
 0x583   : > { %v1594_v47 = vpop.permute.xlu1 %1593 }
 0x584   : > { %2996 = vmatprep.subr.mxu1 %v1594_v47 }
 0x585   : > { %2997 = vmatpush3.msra.mxu1 %v1594_v47 }
 0x586   : > { %3001 = vmatprep.subr.msk.mxu1 %vm1280_vm0, %v1125_v43 }
 0x589   : > { %v3055_v48 = vpop.eup %3054 }
 0x58a   : > { %v1589_v49 = vmul.f32 %v3055_v48, %v3047_v24 }
 0x58c   : > { %2998 = vmatprep.mubr.msk.f32.mxu1 %vm1370_vm1, %v1589_v49 }
 0x58d   : > { %v3057_v51 = vpop.eup %3056 }
 0x58e   : > { %v1590_v52 = vmul.f32 %v3057_v51, %v3049_v25 }
 0x590   : > { %2999 = vmatmul.mubr.msk.f32.vlgmr.msra.gmra.mxu1 %vm1370_vm1, %v1590_v52 }
 0x591   : > { %3002 = vmatpush3.xpose.msk.msra.mxu1 %vm1280_vm0, %v1125_v43  ;;  %3005 = vmatprep.mubr.msk.f32.mxu1 %vm1280_vm0, %v966_v54 }
 0x592   : > { %3003 = vmatprep.subr.msk.mxu1 %vm1280_vm0, %v4083_v30 }
 0x595   : > { %3004 = vmatpush3.xpose.msk.msra.mxu1 %vm1280_vm0, %v4083_v30 }
 0x598   : > { %3006 = vmatmul.mubr.msk.f32.vlgmr.msra.gmra.mxu1 %vm1280_vm0, %v972_v20 }
 0x5da   : > { %v2986_v0 = vpop.f32.mrf.mxu1 }
 0x5db   : > { %1475 = vst.msk [vmem:[#allocation2 + $0x10] sm:$0xff] %vm1280_vm0, %v2986_v0 }
 0x5dc   : > { %v1465_v26 = vpop.f32.mrf.mxu1 }
 0x5dd   : > { %1474 = vst.msk [vmem:[#allocation2] sm:$0xff] %vm1280_vm0, %v1465_v26 }
 0x650   : > { %v4158_v56 = vpop.f32.mrf.mxu1 }
 0x652   : > { %v1671_v57 = vpop.f32.mrf.mxu1 }
 0x658   : > { %v3007_v58 = vpop.f32.mrf.mxu1 }
 0x659   : > { %v1779_v59 = vmul.f32 0.125, %v3007_v58 }
 0x65a   : > { %v1769_v60 = vpop.f32.mrf.mxu1 }
 0x65b   : > { %v1778_v61 = vmul.f32 0.125, %v1769_v60  ;;  %v1783_v62 = vsel %vm1370_vm1, %v1779_v59, -inf }
 0x65c   : > { %1784 = vmax.xlane.f32.xlu0 %v1783_v62 }
 0x65d   : > { %v1780_v37 = vsel %vm1370_vm1, %v1778_v61, -inf }
 0x65e   : > { %1781 = vmax.xlane.f32.xlu1 %v1780_v37 }
 0x6e5   : > { %v1785_v28 = vpop.xlane.xlu0 %1784 }
 0x6e6   : > { %v1787_v63 = vsub.f32 %v1779_v59, %v1785_v28 }
 0x6e7   : > { %v1782_v27 = vpop.xlane.xlu1 %1781 }
 0x6e8   : > { %v1790_v1 = vmul.f32 1.442695, %v1787_v63  ;;  %v1786_v2 = vsub.f32 %v1778_v61, %v1782_v27  ;;  %v2232_v63 = vld [vmem:[%s5079_s13 + $0x1e8] sm:$0xff]  ;;  %v2234_v27 = vld [vmem:[%s5079_s13 + $0x1f8] sm:$0xff] }
 0x6ea   : > { %3058 = vpow2.f32 %v1790_v1  ;;  %v1788_v3 = vmul.f32 1.442695, %v1786_v2  ;;  %v2231_v1 = vld [vmem:[%s5079_s13 + $0x1e0] sm:$0xff]  ;;  %v2233_v2 = vld [vmem:[%s5079_s13 + $0x1f0] sm:$0xff] }
 0x6ec   : > { %3060 = vpow2.f32 %v1788_v3  ;;  %v2228_v3 = vld [vmem:[%s5079_s13 + $0x1c8] sm:$0xff] }
 0x6f7   : > { %v3059_v6 = vpop.eup %3058 }
 0x6f8   : > { %v1795_v9 = vsel %vm1370_vm1, %v3059_v6, 0.0 }
 0x6f9   : > { %v3061_v33 = vpop.eup %3060  ;;  %1796 = vadd.xlane.f32.xlu1 %v1795_v9  ;;  %v2227_v9 = vld [vmem:[%s5079_s13 + $0x1c0] sm:$0xff] }
 0x6fa   : > { %v1792_v34 = vsel %vm1370_vm1, %v3061_v33, 0.0 }
 0x6fb   : > { %1793 = vadd.xlane.f32.xlu0 %v1792_v34  ;;  %v2224_v34 = vld [vmem:[%s5079_s13 + $0x1a8] sm:$0xff] }
 0x70a   : > { %1889 = vrot.lane.b32.xlu1 %v4083_v30, %s3090_s2 }
 0x70e   : > { %1885 = vrot.lane.b32.xlu1 %v966_v54, %s3090_s2 }
 0x711   : > { %1891 = vrot.lane.b32.xlu0 %v1125_v43, %s3090_s2 }
 0x712   : > { %1887 = vrot.lane.b32.xlu1 %v972_v20, %s3090_s2 }
 0x782   : > { %v1797_v10 = vpop.xlane.xlu1 %1796 }
 0x783   : > { %3062 = vrcp.f32 %v1797_v10  ;;  %v2226_v10 = vld [vmem:[%s5079_s13 + $0x1b8] sm:$0xff] }
 0x784   : > { %v1794_v11 = vpop.xlane.xlu0 %1793 }
 0x785   : > { %3064 = vrcp.f32 %v1794_v11  ;;  %v2223_v11 = vld [vmem:[%s5079_s13 + $0x1a0] sm:$0xff] }
 0x786   : > { %v1890_v15 = vpop.permute.xlu1 %1889 }
 0x788   : > { %v1892_v13 = vpop.permute.xlu0 %1891 }
 0x789   : > { %3015 = vmatprep.subr.msk.mxu0 %vm1280_vm0, %v1892_v13 }
 0x78a   : > { %v1886_v30 = vpop.permute.xlu1 %1885 }
 0x78e   : > { %v1888_v21 = vpop.permute.xlu1 %1887 }
 0x790   : > { %v3063_v16 = vpop.eup %3062 }
 0x791   : > { %v1801_v19 = vmul.f32 %v3063_v16, %v3059_v6  ;;  %v2230_v6 = vld [vmem:[%s5079_s13 + $0x1d8] sm:$0xff] }
 0x792   : > { %v3065_v17 = vpop.eup %3064  ;;  %v2222_v16 = vld [vmem:[%s5079_s13 + $0x198] sm:$0xff] }
 0x793   : > { %v1800_v18 = vmul.f32 %v3065_v17, %v3061_v33  ;;  %v2229_v33 = vld [vmem:[%s5079_s13 + $0x1d0] sm:$0xff]  ;;  %v2219_v17 = vld [vmem:[%s5079_s13 + $0x180] sm:$0xff] }
 0x795   : > { %3012 = vmatprep.mubr.msk.f32.mxu0 %vm1370_vm1, %v1800_v18  ;;  %v2221_v18 = vld [vmem:[%s5079_s13 + $0x190] sm:$0xff] }
 0x796   : > { %3013 = vmatmul.mubr.msk.f32.vlgmr.msra.gmra.mxu0 %vm1370_vm1, %v1801_v19  ;;  %v2216_v19 = vld [vmem:[%s5079_s13 + $0x168] sm:$0xff] }
 0x797   : > { %3016 = vmatpush3.xpose.msk.msra.mxu0 %vm1280_vm0, %v1892_v13  ;;  %3019 = vmatprep.mubr.msk.f32.mxu0 %vm1280_vm0, %v1886_v30  ;;  %v2225_v13 = vld [vmem:[%s5079_s13 + $0x1b0] sm:$0xff]  ;;  %v2218_v30 = vld [vmem:[%s5079_s13 + $0x178] sm:$0xff] }
 0x798   : > { %3017 = vmatprep.subr.msk.mxu0 %vm1280_vm0, %v1890_v15 }
 0x79b   : > { %3018 = vmatpush3.xpose.msk.msra.mxu0 %vm1280_vm0, %v1890_v15  ;;  %v2220_v15 = vld [vmem:[%s5079_s13 + $0x188] sm:$0xff] }
 0x79c   : > { %2398 = vmatprep.subr.mxu0 %v2234_v27  ;;  %v2179_v27 = vld [vmem:[%s5079_s13 + $0x40] sm:$0xff] }
 0x79e   : > { %3020 = vmatmul.mubr.msk.f32.vlgmr.msra.gmra.mxu0 %vm1280_vm0, %v1888_v21  ;;  %v2215_v21 = vld [vmem:[%s5079_s13 + $0x160] sm:$0xff] }
 0x79f   : > { %2399 = vmatpush1.msra.mxu0 %v2233_v2  ;;  %v2176_v2 = vld [vmem:[%s5079_s13 + $0x28] sm:$0xff] }
 0x7a0   : > { %2400 = vmatprep.subr.mxu0 %v2230_v6  ;;  %v2175_v6 = vld [vmem:[%s5079_s13 + $0x20] sm:$0xff] }
 0x7a1   : > { %2401 = vmatpush1.msra.mxu0 %v2229_v33  ;;  %v2172_v33 = vld [vmem:[%s5079_s13 + $0x8] sm:$0xff] }
 0x7a2   : > { %2402 = vmatprep.subr.mxu0 %v2226_v10  ;;  %v2171_v10 = vld [vmem:[%s5079_s13] sm:$0xff] }
 0x7a3   : > { %2403 = vmatpush1.msra.mxu0 %v2225_v13  ;;  %v2296_v13 = vld [vmem:[%s5079_s13 + $0x3e8] sm:$0xff] }
 0x7a4   : > { %2404 = vmatprep.subr.mxu0 %v2222_v16  ;;  %v2295_v16 = vld [vmem:[%s5079_s13 + $0x3e0] sm:$0xff] }
 0x7a5   : > { %2405 = vmatpush1.msra.mxu0 %v2221_v18  ;;  %v2292_v18 = vld [vmem:[%s5079_s13 + $0x3c8] sm:$0xff] }
 0x7a6   : > { %2406 = vmatprep.subr.mxu0 %v2218_v30  ;;  %v2291_v30 = vld [vmem:[%s5079_s13 + $0x3c0] sm:$0xff] }
 0x856   : > { %v3014_v22 = vpop.f32.mrf.mxu0 }
 0x857   : > { %1884 = vst.msk [vmem:[#allocation2 + $0x18] sm:$0xff] %vm1280_vm0, %v3014_v22  ;;  %v2217_v22 = vld [vmem:[%s5079_s13 + $0x170] sm:$0xff] }
 0x858   : > { %v1874_v23 = vpop.f32.mrf.mxu0  ;;  %2407 = vmatpush1.msra.mxu0 %v2217_v22  ;;  %v2288_v22 = vld [vmem:[%s5079_s13 + $0x3a8] sm:$0xff] }
 0x859   : > { %1883 = vst.msk [vmem:[#allocation2 + $0x8] sm:$0xff] %vm1280_vm0, %v1874_v23  ;;  %v2212_v23 = vld [vmem:[%s5079_s13 + $0x148] sm:$0xff] }
 0x85e   : > { %v3021_v12 = vpop.f32.mrf.mxu0 }
 0x85f   : > { %v1977_v24 = vmul.f32 0.125, %v3021_v12  ;;  %v2214_v12 = vld [vmem:[%s5079_s13 + $0x158] sm:$0xff] }
 0x860   : > { %v1967_v14 = vpop.f32.mrf.mxu0  ;;  %2408 = vmatprep.subr.mxu0 %v2214_v12 }
 0x861   : > { %v1976_v25 = vmul.f32 0.125, %v1967_v14  ;;  %v1981_v29 = vsel %vm1370_vm1, %v1977_v24, -inf  ;;  %v2213_v14 = vld [vmem:[%s5079_s13 + $0x150] sm:$0xff] }
 0x862   : > { %1982 = vmax.xlane.f32.xlu1 %v1981_v29  ;;  %v2210_v29 = vld [vmem:[%s5079_s13 + $0x138] sm:$0xff]  ;;  %2409 = vmatpush1.msra.mxu0 %v2213_v14 }
 0x863   : > { %v1978_v31 = vsel %vm1370_vm1, %v1976_v25, -inf  ;;  %2410 = vmatprep.subr.mxu0 %v2210_v29 }
 0x864   : > { %1979 = vmax.xlane.f32.xlu0 %v1978_v31  ;;  %v2207_v31 = vld [vmem:[%s5079_s13 + $0x120] sm:$0xff] }
 0x873   : > { %2002 = vrot.lane.b32.xlu1 %v4118_v55, %s3090_s2 }
 0x877   : > { %1682 = vrot.lane.b32.xlu1 %v1671_v57, %s3090_s2 }
 0x8eb   : > { %v1983_v32 = vpop.xlane.xlu1 %1982 }
 0x8ec   : > { %v1985_v35 = vsub.f32 %v1977_v24, %v1983_v32  ;;  %v2211_v24 = vld [vmem:[%s5079_s13 + $0x140] sm:$0xff]  ;;  %v2209_v32 = vld [vmem:[%s5079_s13 + $0x130] sm:$0xff] }
 0x8ed   : > { %v1980_v36 = vpop.xlane.xlu0 %1979  ;;  %2411 = vmatpush1.msra.mxu0 %v2209_v32 }
 0x8ee   : > { %v1988_v38 = vmul.f32 1.442695, %v1985_v35  ;;  %v1984_v39 = vsub.f32 %v1976_v25, %v1980_v36  ;;  %v2208_v25 = vld [vmem:[%s5079_s13 + $0x128] sm:$0xff]  ;;  %v2206_v36 = vld [vmem:[%s5079_s13 + $0x118] sm:$0xff] }
 0x8ef   : > { %v2003_v40 = vpop.permute.xlu1 %2002  ;;  %v2204_v35 = vld [vmem:[%s5079_s13 + $0x108] sm:$0xff]  ;;  %2412 = vmatprep.subr.mxu0 %v2206_v36 }
 0x8f0   : > { %3066 = vpow2.f32 %v1988_v38  ;;  %v1986_v41 = vmul.f32 1.442695, %v1984_v39  ;;  %v2203_v38 = vld [vmem:[%s5079_s13 + $0x100] sm:$0xff]  ;;  %v2205_v39 = vld [vmem:[%s5079_s13 + $0x110] sm:$0xff] }
 0x8f1   : > { %2413 = vmatpush1.msra.mxu0 %v2205_v39 }
 0x8f2   : > { %3068 = vpow2.f32 %v1986_v41  ;;  %v2202_v41 = vld [vmem:[%s5079_s13 + $0xf8] sm:$0xff] }
 0x8f3   : > { %v1683_v42 = vpop.permute.xlu1 %1682  ;;  %2414 = vmatprep.subr.mxu0 %v2202_v41  ;;  %v2287_v41 = vld [vmem:[%s5079_s13 + $0x3a0] sm:$0xff] }
 0x8f4   : > { %1689 = vst.msk [vmem:[#allocation2] sm:$0xff] %vm1688_vm2, %v1683_v42  ;;  %v2199_v42 = vld [vmem:[%s5079_s13 + $0xe0] sm:$0xff] }
 0x8fb   : > { %v4198_v59 = vld [vmem:[#allocation2] sm:$0xff] }
 0x8fd   : > { %v3067_v47 = vpop.eup %3066 }
 0x8fe   : > { %v1993_v43 = vsel %vm1370_vm1, %v3067_v47, 0.0 }
 0x8ff   : > { %v3069_v48 = vpop.eup %3068  ;;  %1994 = vadd.xlane.f32.xlu0 %v1993_v43  ;;  %v2196_v43 = vld [vmem:[%s5079_s13 + $0xc8] sm:$0xff] }
 0x900   : > { %v1990_v55 = vsel %vm1370_vm1, %v3069_v48, 0.0 }
 0x903   : > { %1991 = vadd.xlane.f32.xlu0 %v1990_v55  ;;  %v2195_v55 = vld [vmem:[%s5079_s13 + $0xc0] sm:$0xff] }
 0x919   : > { %2004 = vrot.lane.b32.xlu0 %v4114_v53, %s3090_s2 }
 0x91d   : > { %1684 = vrot.lane.b32.xlu0 %v4158_v56, %s3090_s2 }
 0x988   : > { %v1995_v49 = vpop.xlane.xlu0 %1994 }
 0x989   : > { %3070 = vrcp.f32 %v1995_v49  ;;  %v2197_v49 = vld [vmem:[%s5079_s13 + $0xd0] sm:$0xff] }
 0x98c   : > { %v1992_v50 = vpop.xlane.xlu0 %1991 }
 0x98d   : > { %3072 = vrcp.f32 %v1992_v50  ;;  %v2192_v50 = vld [vmem:[%s5079_s13 + $0xa8] sm:$0xff] }
 0x990   : > { %v2005_v51 = vpop.permute.xlu0 %2004 }
 0x991   : > { %3022 = vmatprep.subr.mxu1 %v2005_v51 }
 0x992   : > { %3023 = vmatpush3.msra.mxu1 %v2005_v51  ;;  %v2194_v51 = vld [vmem:[%s5079_s13 + $0xb8] sm:$0xff] }
 0x993   : > { %3024 = vmatprep.subr.mxu1 %v2003_v40 }
 0x994   : > { %3025 = vmatpush3.msra.mxu1 %v2003_v40  ;;  %v1685_v52 = vpop.permute.xlu0 %1684  ;;  %v2200_v40 = vld [vmem:[%s5079_s13 + $0xe8] sm:$0xff] }
 0x995   : > { %1690 = vst.msk [vmem:[#allocation2 + $0x10] sm:$0xff] %vm1688_vm2, %v1685_v52  ;;  %2321 = vmatprep.subr.mxu1 %v2232_v63  ;;  %v2191_v52 = vld [vmem:[%s5079_s13 + $0xa0] sm:$0xff]  ;;  %v2182_v63 = vld [vmem:[%s5079_s13 + $0x58] sm:$0xff] }
 0x996   : > { %v3071_v54 = vpop.eup %3070 }
 0x997   : > { %v1999_v26 = vmul.f32 %v3071_v54, %v3067_v47  ;;  %v2201_v47 = vld [vmem:[%s5079_s13 + $0xf0] sm:$0xff] }
 0x998   : > { %2415 = vmatpush1.msra.mxu0 %v2201_v47  ;;  %v2193_v54 = vld [vmem:[%s5079_s13 + $0xb0] sm:$0xff]  ;;  %v2283_v47 = vld [vmem:[%s5079_s13 + $0x380] sm:$0xff] }
 0x99a   : > { %v3073_v20 = vpop.eup %3072 }
 0x99b   : > { %v1998_v0 = vmul.f32 %v3073_v20, %v3069_v48  ;;  %v2198_v48 = vld [vmem:[%s5079_s13 + $0xd8] sm:$0xff]  ;;  %v2188_v20 = vld [vmem:[%s5079_s13 + $0x88] sm:$0xff] }
 0x99c   : > { %v4204_v62 = vld [vmem:[#allocation2 + $0x10] sm:$0xff]  ;;  %2416 = vmatprep.subr.mxu0 %v2198_v48  ;;  %v2280_v48 = vld [vmem:[%s5079_s13 + $0x368] sm:$0xff] }
 0x99d   : > { %3026 = vmatprep.mubr.msk.f32.mxu1 %vm1370_vm1, %v1998_v0  ;;  %2417 = vmatpush1.msra.mxu0 %v2197_v49  ;;  %v2190_v0 = vld [vmem:[%s5079_s13 + $0x98] sm:$0xff]  ;;  %v2279_v49 = vld [vmem:[%s5079_s13 + $0x360] sm:$0xff] }
 0x99e   : > { %3027 = vmatmul.mubr.msk.f32.vlgmr.msra.gmra.mxu1 %vm1370_vm1, %v1999_v26  ;;  %2418 = vmatprep.subr.mxu0 %v2194_v51  ;;  %v2187_v26 = vld [vmem:[%s5079_s13 + $0x80] sm:$0xff]  ;;  %v2276_v51 = vld [vmem:[%s5079_s13 + $0x348] sm:$0xff] }
 0x99f   : > { %2322 = vmatpush1.msra.mxu1 %v2231_v1  ;;  %2419 = vmatpush1.msra.mxu0 %v2193_v54  ;;  %v2181_v1 = vld [vmem:[%s5079_s13 + $0x50] sm:$0xff]  ;;  %v2275_v54 = vld [vmem:[%s5079_s13 + $0x340] sm:$0xff] }
 0x9a0   : > { %2323 = vmatprep.subr.mxu1 %v2228_v3  ;;  %2420 = vmatprep.subr.mxu0 %v2190_v0  ;;  %v2178_v3 = vld [vmem:[%s5079_s13 + $0x38] sm:$0xff]  ;;  %v2272_v0 = vld [vmem:[%s5079_s13 + $0x328] sm:$0xff] }
 0x9a1   : > { %2324 = vmatpush1.msra.mxu1 %v2227_v9  ;;  %v2177_v9 = vld [vmem:[%s5079_s13 + $0x30] sm:$0xff] }
 0x9a2   : > { %2325 = vmatprep.subr.mxu1 %v2224_v34  ;;  %v2174_v34 = vld [vmem:[%s5079_s13 + $0x18] sm:$0xff] }
 0x9a3   : > { %2326 = vmatpush1.msra.mxu1 %v2223_v11  ;;  %v2173_v11 = vld [vmem:[%s5079_s13 + $0x10] sm:$0xff] }
 0x9a4   : > { %2327 = vmatprep.subr.mxu1 %v2220_v15  ;;  %v2298_v15 = vld [vmem:[%s5079_s13 + $0x3f8] sm:$0xff] }
 0x9a5   : > { %2328 = vmatpush1.msra.mxu1 %v2219_v17  ;;  %v2297_v17 = vld [vmem:[%s5079_s13 + $0x3f0] sm:$0xff] }
 0x9a6   : > { %2329 = vmatprep.subr.mxu1 %v2216_v19  ;;  %v2294_v19 = vld [vmem:[%s5079_s13 + $0x3d8] sm:$0xff] }
 0x9a7   : > { %2330 = vmatpush1.msra.mxu1 %v2215_v21  ;;  %v2293_v21 = vld [vmem:[%s5079_s13 + $0x3d0] sm:$0xff] }
 0x9a8   : > { %2331 = vmatprep.subr.mxu1 %v2212_v23  ;;  %v2290_v23 = vld [vmem:[%s5079_s13 + $0x3b8] sm:$0xff] }
 0x9a9   : > { %2332 = vmatpush1.msra.mxu1 %v2211_v24 }
 0x9aa   : > { %2333 = vmatprep.subr.mxu1 %v2208_v25 }
 0x9ab   : > { %2334 = vmatpush1.msra.mxu1 %v2207_v31 }
 0x9ac   : > { %2335 = vmatprep.subr.mxu1 %v2204_v35 }
 0x9ad   : > { %2336 = vmatpush1.msra.mxu1 %v2203_v38 }
 0x9ae   : > { %2337 = vmatprep.subr.mxu1 %v2200_v40 }
 0x9af   : > { %2338 = vmatpush1.msra.mxu1 %v2199_v42  ;;  %v2286_v42 = vld [vmem:[%s5079_s13 + $0x398] sm:$0xff] }
 0x9b0   : > { %2339 = vmatprep.subr.mxu1 %v2196_v43  ;;  %v2285_v43 = vld [vmem:[%s5079_s13 + $0x390] sm:$0xff] }
 0x9b1   : > { %2340 = vmatpush1.msra.mxu1 %v2195_v55  ;;  %v2282_v55 = vld [vmem:[%s5079_s13 + $0x378] sm:$0xff] }
 0x9b2   : > { %2341 = vmatprep.subr.mxu1 %v2192_v50  ;;  %v2281_v50 = vld [vmem:[%s5079_s13 + $0x370] sm:$0xff] }
 0x9b3   : > { %2342 = vmatpush1.msra.mxu1 %v2191_v52  ;;  %v2278_v52 = vld [vmem:[%s5079_s13 + $0x358] sm:$0xff] }
 0x9b4   : > { %2343 = vmatprep.subr.mxu1 %v2188_v20  ;;  %v2277_v20 = vld [vmem:[%s5079_s13 + $0x350] sm:$0xff] }
 0x9b5   : > { %2344 = vmatpush1.msra.mxu1 %v2187_v26  ;;  %v2274_v26 = vld [vmem:[%s5079_s13 + $0x338] sm:$0xff] }
 0xa5e   : > { %v3028_v53 = vpop.f32.mrf.mxu1 }
 0xa60   : > { %v2080_v56 = vpop.f32.mrf.mxu1 }
 0xa61   : > { %2091 = vrot.lane.b32.xlu1 %v2080_v56, %s3090_s2  ;;  %v2184_v56 = vld [vmem:[%s5079_s13 + $0x68] sm:$0xff] }
 0xa62   : > { %2345 = vmatprep.subr.mxu1 %v2184_v56  ;;  %v2273_v56 = vld [vmem:[%s5079_s13 + $0x330] sm:$0xff] }
 0xa65   : > { %2093 = vrot.lane.b32.xlu1 %v3028_v53, %s3090_s2  ;;  %v2189_v53 = vld [vmem:[%s5079_s13 + $0x90] sm:$0xff] }
 0xa66   : > { %2421 = vmatpush1.msra.mxu0 %v2189_v53  ;;  %v2271_v53 = vld [vmem:[%s5079_s13 + $0x320] sm:$0xff] }
 0xad3   : > { %v2092_v57 = vpop.permute.xlu1 %2091 }
 0xad4   : > { %2097 = vst.msk [vmem:[#allocation2 + $0x8] sm:$0xff] %vm1688_vm2, %v2092_v57  ;;  %v2186_v57 = vld [vmem:[%s5079_s13 + $0x78] sm:$0xff] }
 0xad5   : > { %2422 = vmatprep.subr.mxu0 %v2186_v57  ;;  %v2268_v57 = vld [vmem:[%s5079_s13 + $0x308] sm:$0xff] }
 0xad7   : > { %v2094_v58 = vpop.permute.xlu1 %2093 }
 0xad8   : > { %2098 = vst.msk [vmem:[#allocation2 + $0x18] sm:$0xff] %vm1688_vm2, %v2094_v58  ;;  %v2183_v58 = vld [vmem:[%s5079_s13 + $0x60] sm:$0xff] }
 0xad9   : > { %2346 = vmatpush1.msra.mxu1 %v2183_v58  ;;  %v2270_v58 = vld [vmem:[%s5079_s13 + $0x318] sm:$0xff] }
 0xadb   : > { %v4200_v60 = vld [vmem:[#allocation2 + $0x8] sm:$0xff] }
 0xadc   : > { %v2105_v61 = vadd.f32 %v4200_v60, %v4198_v59 }
 0xade   : > { %2106 = vadd.xlane.f32.xlu0 %v2105_v61  ;;  %v2185_v61 = vld [vmem:[%s5079_s13 + $0x70] sm:$0xff] }
 0xadf   : > { %v4206_v37 = vld [vmem:[#allocation2 + $0x18] sm:$0xff]  ;;  %2423 = vmatpush1.msra.mxu0 %v2185_v61  ;;  %v2267_v61 = vld [vmem:[%s5079_s13 + $0x300] sm:$0xff] }
 0xae0   : > { %v2108_v28 = vadd.f32 %v4206_v37, %v4204_v62  ;;  %2424 = vmatprep.subr.mxu0 %v2182_v63  ;;  %v2264_v63 = vld [vmem:[%s5079_s13 + $0x2e8] sm:$0xff] }
 0xae1   : > { %2425 = vmatpush1.msra.mxu0 %v2181_v1  ;;  %v2263_v1 = vld [vmem:[%s5079_s13 + $0x2e0] sm:$0xff] }
 0xae2   : > { %2109 = vadd.xlane.f32.xlu1 %v2108_v28  ;;  %v2180_v28 = vld [vmem:[%s5079_s13 + $0x48] sm:$0xff]  ;;  %2426 = vmatprep.subr.mxu0 %v2178_v3 }
 0xae3   : > { %2347 = vmatprep.subr.mxu1 %v2180_v28  ;;  %2427 = vmatpush1.msra.mxu0 %v2177_v9  ;;  %v2269_v28 = vld [vmem:[%s5079_s13 + $0x310] sm:$0xff]  ;;  %v2260_v3 = vld [vmem:[%s5079_s13 + $0x2c8] sm:$0xff]  ;;  %v2259_v9 = vld [vmem:[%s5079_s13 + $0x2c0] sm:$0xff] }
 0xae4   : > { %2348 = vmatpush1.msra.mxu1 %v2179_v27  ;;  %2428 = vmatprep.subr.mxu0 %v2174_v34  ;;  %v2266_v27 = vld [vmem:[%s5079_s13 + $0x2f8] sm:$0xff]  ;;  %v2256_v34 = vld [vmem:[%s5079_s13 + $0x2a8] sm:$0xff] }
 0xae5   : > { %2349 = vmatprep.subr.mxu1 %v2176_v2  ;;  %2429 = vmatpush1.msra.mxu0 %v2173_v11  ;;  %v2265_v2 = vld [vmem:[%s5079_s13 + $0x2f0] sm:$0xff]  ;;  %v2255_v11 = vld [vmem:[%s5079_s13 + $0x2a0] sm:$0xff] }
 0xae6   : > { %2350 = vmatpush1.msra.mxu1 %v2175_v6  ;;  %2430 = vmatprep.subr.mxu0 %v2298_v15  ;;  %v2262_v6 = vld [vmem:[%s5079_s13 + $0x2d8] sm:$0xff]  ;;  %v2252_v15 = vld [vmem:[%s5079_s13 + $0x288] sm:$0xff] }
 0xae7   : > { %2351 = vmatprep.subr.mxu1 %v2172_v33  ;;  %2431 = vmatpush2.msra.mxu0 %v2297_v17  ;;  %v2261_v33 = vld [vmem:[%s5079_s13 + $0x2d0] sm:$0xff]  ;;  %v2251_v17 = vld [vmem:[%s5079_s13 + $0x280] sm:$0xff] }
 0xae8   : > { %2352 = vmatpush1.msra.mxu1 %v2171_v10  ;;  %2432 = vmatprep.subr.mxu0 %v2294_v19  ;;  %v2258_v10 = vld [vmem:[%s5079_s13 + $0x2b8] sm:$0xff]  ;;  %v2248_v19 = vld [vmem:[%s5079_s13 + $0x268] sm:$0xff] }
 0xae9   : > { %2353 = vmatprep.subr.mxu1 %v2296_v13  ;;  %2433 = vmatpush2.msra.mxu0 %v2293_v21  ;;  %v2257_v13 = vld [vmem:[%s5079_s13 + $0x2b0] sm:$0xff]  ;;  %v2247_v21 = vld [vmem:[%s5079_s13 + $0x260] sm:$0xff] }
 0xaea   : > { %2354 = vmatpush2.msra.mxu1 %v2295_v16  ;;  %2434 = vmatprep.subr.mxu0 %v2290_v23  ;;  %v2254_v16 = vld [vmem:[%s5079_s13 + $0x298] sm:$0xff]  ;;  %v2244_v23 = vld [vmem:[%s5079_s13 + $0x248] sm:$0xff] }
 0xaeb   : > { %2355 = vmatprep.subr.mxu1 %v2292_v18  ;;  %v2253_v18 = vld [vmem:[%s5079_s13 + $0x290] sm:$0xff] }
 0xaec   : > { %2356 = vmatpush2.msra.mxu1 %v2291_v30  ;;  %v2250_v30 = vld [vmem:[%s5079_s13 + $0x278] sm:$0xff] }
 0xaed   : > { %2357 = vmatprep.subr.mxu1 %v2288_v22  ;;  %v2249_v22 = vld [vmem:[%s5079_s13 + $0x270] sm:$0xff] }
 0xaee   : > { %2358 = vmatpush2.msra.mxu1 %v2287_v41  ;;  %v2237_v41 = vld [vmem:[%s5079_s13 + $0x210] sm:$0xff] }
 0xb67   : > { %v2107_v12 = vpop.xlane.xlu0 %2106 }
 0xb68   : > { %v2111_v24 = vmul.f32 0.00390625, %v2107_v12  ;;  %v2246_v12 = vld [vmem:[%s5079_s13 + $0x258] sm:$0xff] }
 0xb6a   : > { %v4433_v14 = vsub.f32 %v4198_v59, %v2111_v24  ;;  %v4436_v25 = vsub.f32 %v4200_v60, %v2111_v24  ;;  %v2243_v24 = vld [vmem:[%s5079_s13 + $0x240] sm:$0xff] }
 0xb6b   : > { %v2110_v29 = vpop.xlane.xlu1 %2109 }
 0xb6c   : > { %v2112_v31 = vmul.f32 0.00390625, %v2110_v29  ;;  %v2117_v32 = vmul.f32 %v4433_v14, %v4433_v14  ;;  %v2118_v35 = vmul.f32 %v4436_v25, %v4436_v25  ;;  %v2245_v29 = vld [vmem:[%s5079_s13 + $0x250] sm:$0xff] }
 0xb6e   : > { %v4443_v36 = vsub.f32 %v4204_v62, %v2112_v31  ;;  %v4446_v38 = vsub.f32 %v4206_v37, %v2112_v31  ;;  %v2121_v39 = vadd.f32 %v2118_v35, %v2117_v32  ;;  %v2289_v62 = vld [vmem:[%s5079_s13 + $0x3b0] sm:$0xff]  ;;  %v2284_v37 = vld [vmem:[%s5079_s13 + $0x388] sm:$0xff]  ;;  %v2242_v32 = vld [vmem:[%s5079_s13 + $0x238] sm:$0xff] }
 0xb6f   : > { %2435 = vmatpush2.msra.mxu0 %v2289_v62  ;;  %2359 = vmatprep.subr.mxu1 %v2284_v37  ;;  %v2240_v31 = vld [vmem:[%s5079_s13 + $0x228] sm:$0xff]  ;;  %v2239_v35 = vld [vmem:[%s5079_s13 + $0x220] sm:$0xff]  ;;  %v2514_v62 = vld [vmem:[%s5081_s15 + $0xf8] sm:$0xff] }
 0xb70   : > { %2122 = vadd.xlane.f32.xlu0 %v2121_v39  ;;  %v2119_v59 = vmul.f32 %v4443_v36, %v4443_v36  ;;  %v2120_v60 = vmul.f32 %v4446_v38, %v4446_v38  ;;  %2436 = vmatprep.subr.mxu0 %v2286_v42  ;;  %v2241_v39 = vld [vmem:[%s5079_s13 + $0x230] sm:$0xff]  ;;  %v2578_v37 = vld [vmem:[%s5081_s15 + $0x2f8] sm:$0xff] }
 0xb71   : > { %2360 = vmatpush2.msra.mxu1 %v2283_v47  ;;  %2437 = vmatpush2.msra.mxu0 %v2285_v43 }
 0xb72   : > { %v2124_v40 = vadd.f32 %v2120_v60, %v2119_v59  ;;  %2361 = vmatprep.subr.mxu1 %v2280_v48  ;;  %2438 = vmatprep.subr.mxu0 %v2282_v55  ;;  %v2236_v59 = vld [vmem:[%s5079_s13 + $0x208] sm:$0xff]  ;;  %v2238_v60 = vld [vmem:[%s5079_s13 + $0x218] sm:$0xff] }
 0xb73   : > { %2362 = vmatpush2.msra.mxu1 %v2279_v49  ;;  %2439 = vmatpush2.msra.mxu0 %v2281_v50  ;;  %v2103_v50 = vld [vmem:[%s5077_s11] sm:$0x3] }
 0xb74   : > { %2125 = vadd.xlane.f32.xlu0 %v2124_v40  ;;  %2363 = vmatprep.subr.mxu1 %v2276_v51  ;;  %v2235_v40 = vld [vmem:[%s5079_s13 + $0x200] sm:$0xff] }
 0xb75   : > { %2440 = vmatprep.subr.mxu0 %v2278_v52  ;;  %2364 = vmatpush2.msra.mxu1 %v2275_v54  ;;  %v2104_v51 = vld [vmem:[%s5078_s12] sm:$0x3]  ;;  %v2141_v52 = vrot.slane %v2103_v50, %v3834_v46  ;;  %v2145_v54 = vrot.slane %v2103_v50, %v3831_v45 }
 0xb76   : > { %2441 = vmatpush2.msra.mxu0 %v2277_v20  ;;  %2365 = vmatprep.subr.mxu1 %v2272_v0  ;;  %v2559_v50 = vld [vmem:[%s5081_s15 + $0x260] sm:$0xff] }
 0xb77   : > { %2442 = vmatprep.subr.mxu0 %v2274_v26  ;;  %2366 = vmatpush2.msra.mxu1 %v2271_v53  ;;  %v2156_v26 = vrot.slane %v2104_v51, %v3834_v46  ;;  %v2160_v53 = vrot.slane %v2104_v51, %v3831_v45  ;;  %v2494_v51 = vld [vmem:[%s5081_s15 + $0x58] sm:$0xff] }
 0xb78   : > { %2443 = vmatpush2.msra.mxu0 %v2273_v56  ;;  %2367 = vmatprep.subr.mxu1 %v2268_v57 }
 0xb79   : > { %2444 = vmatprep.subr.mxu0 %v2270_v58  ;;  %2368 = vmatpush2.msra.mxu1 %v2267_v61 }
 0xb7a   : > { %2445 = vmatpush2.msra.mxu0 %v2269_v28  ;;  %2369 = vmatprep.subr.mxu1 %v2264_v63 }
 0xb7b   : > { %2446 = vmatprep.subr.mxu0 %v2266_v27  ;;  %2370 = vmatpush2.msra.mxu1 %v2263_v1 }
 0xb7c   : > { %2447 = vmatpush2.msra.mxu0 %v2265_v2  ;;  %2371 = vmatprep.subr.mxu1 %v2260_v3 }
 0xb7d   : > { %2448 = vmatprep.subr.mxu0 %v2262_v6  ;;  %2372 = vmatpush2.msra.mxu1 %v2259_v9  ;;  %v2577_v9 = vld [vmem:[%s5081_s15 + $0x2f0] sm:$0xff] }
 0xb7e   : > { %2449 = vmatpush2.msra.mxu0 %v2261_v33  ;;  %2373 = vmatprep.subr.mxu1 %v2256_v34 }
 0xb7f   : > { %2450 = vmatprep.subr.mxu0 %v2258_v10  ;;  %2374 = vmatpush2.msra.mxu1 %v2255_v11  ;;  %v2511_v10 = vld [vmem:[%s5081_s15 + $0xe0] sm:$0xff] }
 0xb80   : > { %2451 = vmatpush2.msra.mxu0 %v2257_v13  ;;  %2375 = vmatprep.subr.mxu1 %v2252_v15  ;;  %v2575_v11 = vld [vmem:[%s5081_s15 + $0x2e0] sm:$0xff]  ;;  %v2509_v13 = vld [vmem:[%s5081_s15 + $0xd0] sm:$0xff] }
 0xb81   : > { %2452 = vmatprep.subr.mxu0 %v2254_v16  ;;  %2376 = vmatpush2.msra.mxu1 %v2251_v17  ;;  %v2573_v15 = vld [vmem:[%s5081_s15 + $0x2d0] sm:$0xff]  ;;  %v2508_v16 = vld [vmem:[%s5081_s15 + $0xc8] sm:$0xff] }
 0xb82   : > { %2453 = vmatpush2.msra.mxu0 %v2253_v18  ;;  %2377 = vmatprep.subr.mxu1 %v2248_v19  ;;  %v2572_v17 = vld [vmem:[%s5081_s15 + $0x2c8] sm:$0xff]  ;;  %v2507_v18 = vld [vmem:[%s5081_s15 + $0xc0] sm:$0xff] }
 0xb83   : > { %2454 = vmatprep.subr.mxu0 %v2250_v30  ;;  %2378 = vmatpush2.msra.mxu1 %v2247_v21  ;;  %v2571_v19 = vld [vmem:[%s5081_s15 + $0x2c0] sm:$0xff]  ;;  %v2506_v30 = vld [vmem:[%s5081_s15 + $0xb8] sm:$0xff] }
 0xb84   : > { %2455 = vmatpush2.msra.mxu0 %v2249_v22  ;;  %2379 = vmatprep.subr.mxu1 %v2244_v23  ;;  %v2570_v21 = vld [vmem:[%s5081_s15 + $0x2b8] sm:$0xff]  ;;  %v2505_v22 = vld [vmem:[%s5081_s15 + $0xb0] sm:$0xff] }
 0xb85   : > { %2456 = vmatprep.subr.mxu0 %v2246_v12  ;;  %2380 = vmatpush2.msra.mxu1 %v2243_v24  ;;  %v2569_v23 = vld [vmem:[%s5081_s15 + $0x2b0] sm:$0xff]  ;;  %v2504_v12 = vld [vmem:[%s5081_s15 + $0xa8] sm:$0xff] }
 0xb86   : > { %2457 = vmatpush2.msra.mxu0 %v2245_v29  ;;  %2381 = vmatprep.subr.mxu1 %v2240_v31  ;;  %v2568_v24 = vld [vmem:[%s5081_s15 + $0x2a8] sm:$0xff]  ;;  %v2503_v29 = vld [vmem:[%s5081_s15 + $0xa0] sm:$0xff] }
 0xb87   : > { %2458 = vmatprep.subr.mxu0 %v2242_v32  ;;  %2382 = vmatpush2.msra.mxu1 %v2239_v35  ;;  %v2567_v31 = vld [vmem:[%s5081_s15 + $0x2a0] sm:$0xff]  ;;  %v2502_v32 = vld [vmem:[%s5081_s15 + $0x98] sm:$0xff] }
 0xb88   : > { %2459 = vmatpush2.msra.mxu0 %v2241_v39  ;;  %2383 = vmatprep.subr.mxu1 %v2236_v59  ;;  %v2566_v35 = vld [vmem:[%s5081_s15 + $0x298] sm:$0xff]  ;;  %v2501_v39 = vld [vmem:[%s5081_s15 + $0x90] sm:$0xff] }
 0xb89   : > { %2460 = vmatprep.subr.mxu0 %v2238_v60  ;;  %2384 = vmatpush2.msra.mxu1 %v2235_v40  ;;  %v2565_v59 = vld [vmem:[%s5081_s15 + $0x290] sm:$0xff]  ;;  %v2500_v60 = vld [vmem:[%s5081_s15 + $0x88] sm:$0xff] }
 0xb8a   : > { %2461 = vmatpush2.msra.mxu0 %v2237_v41  ;;  %2623 = vmatprep.subr.mxu1 %v2514_v62  ;;  %v2564_v40 = vld [vmem:[%s5081_s15 + $0x288] sm:$0xff]  ;;  %v2499_v41 = vld [vmem:[%s5081_s15 + $0x80] sm:$0xff] }
 0xb8b   : > { %2700 = vmatprep.subr.mxu0 %v2578_v37  ;;  %v2563_v62 = vld [vmem:[%s5081_s15 + $0x280] sm:$0xff]  ;;  %v2498_v37 = vld [vmem:[%s5081_s15 + $0x78] sm:$0xff] }
 0xbf9   : > { %v2123_v42 = vpop.xlane.xlu0 %2122 }
 0xbfa   : > { %v2127_v47 = vmul.f32 0.00390625, %v2123_v42  ;;  %v2562_v42 = vld [vmem:[%s5081_s15 + $0x278] sm:$0xff] }
 0xbfc   : > { %v2129_v43 = vadd.f32 1e-05, %v2127_v47  ;;  %v2497_v47 = vld [vmem:[%s5081_s15 + $0x70] sm:$0xff] }
 0xbfd   : > { %v2126_v48 = vpop.xlane.xlu0 %2125 }
 0xbfe   : > { %3074 = vrsqrt.f32 %v2129_v43  ;;  %v2128_v55 = vmul.f32 0.00390625, %v2126_v48  ;;  %v2561_v43 = vld [vmem:[%s5081_s15 + $0x270] sm:$0xff]  ;;  %v2496_v48 = vld [vmem:[%s5081_s15 + $0x68] sm:$0xff] }
 0xc00   : > { %v2130_v49 = vadd.f32 1e-05, %v2128_v55  ;;  %v2560_v55 = vld [vmem:[%s5081_s15 + $0x268] sm:$0xff] }
 0xc02   : > { %3076 = vrsqrt.f32 %v2130_v49  ;;  %v2495_v49 = vld [vmem:[%s5081_s15 + $0x60] sm:$0xff] }
 0xc0b   : > { %v3075_v20 = vpop.eup %3074 }
 0xc0c   : > { %v2134_v0 = vmul.f32 %v3075_v20, %v4436_v25  ;;  %v2133_v56 = vmul.f32 %v3075_v20, %v4433_v14  ;;  %v2513_v14 = vld [vmem:[%s5081_s15 + $0xf0] sm:$0xff] }
 0xc0d   : > { %v2557_v20 = vld [vmem:[%s5081_s15 + $0x250] sm:$0xff] }
 0xc0e   : > { %v2149_v57 = vmul.f32 %v2145_v54, %v2134_v0  ;;  %v2148_v58 = vmul.f32 %v2141_v52, %v2133_v56  ;;  %v2492_v0 = vld [vmem:[%s5081_s15 + $0x48] sm:$0xff]  ;;  %v2555_v56 = vld [vmem:[%s5081_s15 + $0x240] sm:$0xff] }
 0xc0f   : > { %v3077_v61 = vpop.eup %3076 }
 0xc10   : > { %v2164_v28 = vadd.f32 %v2160_v53, %v2149_v57  ;;  %v2163_v63 = vadd.f32 %v2156_v26, %v2148_v58  ;;  %v2136_v27 = vmul.f32 %v3077_v61, %v4446_v38  ;;  %v2135_v1 = vmul.f32 %v3077_v61, %v4443_v36  ;;  %v2576_v38 = vld [vmem:[%s5081_s15 + $0x2e8] sm:$0xff]  ;;  %v2490_v57 = vld [vmem:[%s5081_s15 + $0x38] sm:$0xff]  ;;  %v2489_v61 = vld [vmem:[%s5081_s15 + $0x30] sm:$0xff] }
 0xc11   : > { %v2554_v58 = vld [vmem:[%s5081_s15 + $0x238] sm:$0xff] }
 0xc12   : > { %v4635_v2 = vadd.f32 %v2164_v28, %v3411_v5  ;;  %v4638_v25 = vadd.f32 %v2163_v63, %v3409_v4  ;;  %v2151_v3 = vmul.f32 %v2145_v54, %v2136_v27  ;;  %v2150_v6 = vmul.f32 %v2141_v52, %v2135_v1  ;;  %v2512_v4 = vld [vmem:[%s5081_s15 + $0xe8] sm:$0xff]  ;;  %v2558_v52 = vld [vmem:[%s5081_s15 + $0x258] sm:$0xff]  ;;  %v2493_v54 = vld [vmem:[%s5081_s15 + $0x50] sm:$0xff] }
 0xc13   : > { %v2553_v28 = vld [vmem:[%s5081_s15 + $0x230] sm:$0xff]  ;;  %v2488_v63 = vld [vmem:[%s5081_s15 + $0x28] sm:$0xff]  ;;  %v2487_v1 = vld [vmem:[%s5081_s15 + $0x20] sm:$0xff] }
 0xc14   : > { %2385 = vmatprep.mubr.f32.mxu1 %v4635_v2  ;;  %2462 = vmatprep.mubr.f32.mxu0 %v4635_v2  ;;  %v2166_v36 = vadd.f32 %v2160_v53, %v2151_v3  ;;  %v2165_v5 = vadd.f32 %v2156_v26, %v2150_v6  ;;  %v2556_v26 = vld [vmem:[%s5081_s15 + $0x248] sm:$0xff]  ;;  %v2491_v53 = vld [vmem:[%s5081_s15 + $0x40] sm:$0xff]  ;;  %v2486_v6 = vld [vmem:[%s5081_s15 + $0x18] sm:$0xff] }
 0xc15   : > { %2386 = vmatmul.mubr.f32.vlgmr.msra.gmra.mxu1 %v4638_v25  ;;  %2463 = vmatmul.mubr.f32.vlgmr.msra.gmra.mxu0 %v4638_v25  ;;  %v2552_v27 = vld [vmem:[%s5081_s15 + $0x228] sm:$0xff]  ;;  %v2551_v3 = vld [vmem:[%s5081_s15 + $0x220] sm:$0xff] }
 0xc16   : > { %v4657_v33 = vadd.f32 %v2166_v36, %v3417_v8  ;;  %v4660_v34 = vadd.f32 %v2165_v5, %v3415_v7  ;;  %2624 = vmatpush1.msra.mxu1 %v2513_v14  ;;  %2701 = vmatpush1.msra.mxu0 %v2577_v9  ;;  %v2510_v7 = vld [vmem:[%s5081_s15 + $0xd8] sm:$0xff]  ;;  %v2485_v9 = vld [vmem:[%s5081_s15 + $0x10] sm:$0xff]  ;;  %v2484_v5 = vld [vmem:[%s5081_s15 + $0x8] sm:$0xff] }
 0xc17   : > { %2625 = vmatprep.subr.mxu1 %v2512_v4  ;;  %2702 = vmatprep.subr.mxu0 %v2576_v38  ;;  %v2574_v8 = vld [vmem:[%s5081_s15 + $0x2d8] sm:$0xff]  ;;  %v2549_v36 = vld [vmem:[%s5081_s15 + $0x210] sm:$0xff]  ;;  %v2548_v4 = vld [vmem:[%s5081_s15 + $0x208] sm:$0xff] }
 0xc18   : > { %2391 = vmatprep.mubr.f32.mxu1 %v4657_v33  ;;  %2468 = vmatprep.mubr.f32.mxu0 %v4657_v33  ;;  %v2550_v14 = vld [vmem:[%s5081_s15 + $0x218] sm:$0xff]  ;;  %v2483_v38 = vld [vmem:[%s5081_s15] sm:$0xff] }
 0xc19   : > { %2392 = vmatmul.mubr.f32.gmra.mxu1 %v4660_v34  ;;  %2469 = vmatmul.mubr.f32.gmra.mxu0 %v4660_v34 }
 0xc1a   : > { %2626 = vmatpush1.msra.mxu1 %v2511_v10  ;;  %2703 = vmatpush1.msra.mxu0 %v2575_v11  ;;  %v2547_v10 = vld [vmem:[%s5081_s15 + $0x200] sm:$0xff]  ;;  %v2546_v11 = vld [vmem:[%s5081_s15 + $0x1f8] sm:$0xff] }
 0xc1b   : > { %2627 = vmatprep.subr.mxu1 %v2510_v7  ;;  %2704 = vmatprep.subr.mxu0 %v2574_v8  ;;  %v2610_v7 = vld [vmem:[%s5081_s15 + $0x3f8] sm:$0xff]  ;;  %v2545_v8 = vld [vmem:[%s5081_s15 + $0x1f0] sm:$0xff] }
 0xc1c   : > { %2628 = vmatpush1.msra.mxu1 %v2509_v13  ;;  %2705 = vmatpush1.msra.mxu0 %v2573_v15  ;;  %v2609_v13 = vld [vmem:[%s5081_s15 + $0x3f0] sm:$0xff]  ;;  %v2544_v15 = vld [vmem:[%s5081_s15 + $0x1e8] sm:$0xff] }
 0xc1d   : > { %2629 = vmatprep.subr.mxu1 %v2508_v16  ;;  %2706 = vmatprep.subr.mxu0 %v2572_v17  ;;  %v2608_v16 = vld [vmem:[%s5081_s15 + $0x3e8] sm:$0xff]  ;;  %v2543_v17 = vld [vmem:[%s5081_s15 + $0x1e0] sm:$0xff] }
 0xc1e   : > { %2630 = vmatpush1.msra.mxu1 %v2507_v18  ;;  %2707 = vmatpush1.msra.mxu0 %v2571_v19  ;;  %v2607_v18 = vld [vmem:[%s5081_s15 + $0x3e0] sm:$0xff]  ;;  %v2542_v19 = vld [vmem:[%s5081_s15 + $0x1d8] sm:$0xff] }
 0xc1f   : > { %2631 = vmatprep.subr.mxu1 %v2506_v30  ;;  %2708 = vmatprep.subr.mxu0 %v2570_v21  ;;  %v2606_v30 = vld [vmem:[%s5081_s15 + $0x3d8] sm:$0xff]  ;;  %v2541_v21 = vld [vmem:[%s5081_s15 + $0x1d0] sm:$0xff] }
 0xc20   : > { %2632 = vmatpush1.msra.mxu1 %v2505_v22  ;;  %2709 = vmatpush1.msra.mxu0 %v2569_v23  ;;  %v2605_v22 = vld [vmem:[%s5081_s15 + $0x3d0] sm:$0xff]  ;;  %v2540_v23 = vld [vmem:[%s5081_s15 + $0x1c8] sm:$0xff] }
 0xc21   : > { %2633 = vmatprep.subr.mxu1 %v2504_v12  ;;  %2710 = vmatprep.subr.mxu0 %v2568_v24  ;;  %v2604_v12 = vld [vmem:[%s5081_s15 + $0x3c8] sm:$0xff]  ;;  %v2539_v24 = vld [vmem:[%s5081_s15 + $0x1c0] sm:$0xff] }
 0xc22   : > { %2634 = vmatpush1.msra.mxu1 %v2503_v29  ;;  %2711 = vmatpush1.msra.mxu0 %v2567_v31  ;;  %v2603_v29 = vld [vmem:[%s5081_s15 + $0x3c0] sm:$0xff]  ;;  %v2538_v31 = vld [vmem:[%s5081_s15 + $0x1b8] sm:$0xff] }
 0xc23   : > { %2635 = vmatprep.subr.mxu1 %v2502_v32  ;;  %2712 = vmatprep.subr.mxu0 %v2566_v35  ;;  %v2602_v32 = vld [vmem:[%s5081_s15 + $0x3b8] sm:$0xff]  ;;  %v2537_v35 = vld [vmem:[%s5081_s15 + $0x1b0] sm:$0xff] }
 0xc24   : > { %2636 = vmatpush1.msra.mxu1 %v2501_v39  ;;  %2713 = vmatpush1.msra.mxu0 %v2565_v59  ;;  %v2601_v39 = vld [vmem:[%s5081_s15 + $0x3b0] sm:$0xff]  ;;  %v2536_v59 = vld [vmem:[%s5081_s15 + $0x1a8] sm:$0xff] }
 0xc25   : > { %2637 = vmatprep.subr.mxu1 %v2500_v60  ;;  %2714 = vmatprep.subr.mxu0 %v2564_v40  ;;  %v2600_v60 = vld [vmem:[%s5081_s15 + $0x3a8] sm:$0xff]  ;;  %v2535_v40 = vld [vmem:[%s5081_s15 + $0x1a0] sm:$0xff] }
 0xc26   : > { %2638 = vmatpush1.msra.mxu1 %v2499_v41  ;;  %2715 = vmatpush1.msra.mxu0 %v2563_v62  ;;  %v2599_v41 = vld [vmem:[%s5081_s15 + $0x3a0] sm:$0xff]  ;;  %v2534_v62 = vld [vmem:[%s5081_s15 + $0x198] sm:$0xff] }
 0xc27   : > { %2639 = vmatprep.subr.mxu1 %v2498_v37  ;;  %2716 = vmatprep.subr.mxu0 %v2562_v42  ;;  %v2598_v37 = vld [vmem:[%s5081_s15 + $0x398] sm:$0xff]  ;;  %v2533_v42 = vld [vmem:[%s5081_s15 + $0x190] sm:$0xff] }
 0xc28   : > { %2640 = vmatpush1.msra.mxu1 %v2497_v47  ;;  %2717 = vmatpush1.msra.mxu0 %v2561_v43  ;;  %v2597_v47 = vld [vmem:[%s5081_s15 + $0x390] sm:$0xff]  ;;  %v2532_v43 = vld [vmem:[%s5081_s15 + $0x188] sm:$0xff] }
 0xc29   : > { %2641 = vmatprep.subr.mxu1 %v2496_v48  ;;  %2718 = vmatprep.subr.mxu0 %v2560_v55  ;;  %v2596_v48 = vld [vmem:[%s5081_s15 + $0x388] sm:$0xff]  ;;  %v2531_v55 = vld [vmem:[%s5081_s15 + $0x180] sm:$0xff] }
 0xc2a   : > { %2642 = vmatpush1.msra.mxu1 %v2495_v49  ;;  %2719 = vmatpush1.msra.mxu0 %v2559_v50  ;;  %v2595_v49 = vld [vmem:[%s5081_s15 + $0x380] sm:$0xff]  ;;  %v2530_v50 = vld [vmem:[%s5081_s15 + $0x178] sm:$0xff] }
 0xc2b   : > { %2643 = vmatprep.subr.mxu1 %v2494_v51  ;;  %2720 = vmatprep.subr.mxu0 %v2558_v52  ;;  %v2594_v51 = vld [vmem:[%s5081_s15 + $0x378] sm:$0xff]  ;;  %v2529_v52 = vld [vmem:[%s5081_s15 + $0x170] sm:$0xff] }
 0xc2c   : > { %2644 = vmatpush1.msra.mxu1 %v2493_v54  ;;  %2721 = vmatpush1.msra.mxu0 %v2557_v20  ;;  %v2593_v54 = vld [vmem:[%s5081_s15 + $0x370] sm:$0xff]  ;;  %v2528_v20 = vld [vmem:[%s5081_s15 + $0x168] sm:$0xff] }
 0xc2d   : > { %2645 = vmatprep.subr.mxu1 %v2492_v0  ;;  %2722 = vmatprep.subr.mxu0 %v2556_v26  ;;  %v2592_v0 = vld [vmem:[%s5081_s15 + $0x368] sm:$0xff]  ;;  %v2527_v26 = vld [vmem:[%s5081_s15 + $0x160] sm:$0xff] }
 0xc2e   : > { %2646 = vmatpush1.msra.mxu1 %v2491_v53  ;;  %2723 = vmatpush1.msra.mxu0 %v2555_v56  ;;  %v2591_v53 = vld [vmem:[%s5081_s15 + $0x360] sm:$0xff]  ;;  %v2526_v56 = vld [vmem:[%s5081_s15 + $0x158] sm:$0xff] }
 0xc2f   : > { %2647 = vmatprep.subr.mxu1 %v2490_v57  ;;  %2724 = vmatprep.subr.mxu0 %v2554_v58  ;;  %v2590_v57 = vld [vmem:[%s5081_s15 + $0x358] sm:$0xff]  ;;  %v2525_v58 = vld [vmem:[%s5081_s15 + $0x150] sm:$0xff] }
 0xc30   : > { %2648 = vmatpush1.msra.mxu1 %v2489_v61  ;;  %2725 = vmatpush1.msra.mxu0 %v2553_v28  ;;  %v2589_v61 = vld [vmem:[%s5081_s15 + $0x350] sm:$0xff]  ;;  %v2524_v28 = vld [vmem:[%s5081_s15 + $0x148] sm:$0xff] }
 0xc31   : > { %2649 = vmatprep.subr.mxu1 %v2488_v63  ;;  %2726 = vmatprep.subr.mxu0 %v2552_v27  ;;  %v2588_v63 = vld [vmem:[%s5081_s15 + $0x348] sm:$0xff]  ;;  %v2523_v27 = vld [vmem:[%s5081_s15 + $0x140] sm:$0xff] }
 0xc32   : > { %2650 = vmatpush1.msra.mxu1 %v2487_v1  ;;  %2727 = vmatpush1.msra.mxu0 %v2551_v3  ;;  %v2587_v1 = vld [vmem:[%s5081_s15 + $0x340] sm:$0xff]  ;;  %v2522_v3 = vld [vmem:[%s5081_s15 + $0x138] sm:$0xff] }
 0xc33   : > { %2651 = vmatprep.subr.mxu1 %v2486_v6  ;;  %2728 = vmatprep.subr.mxu0 %v2550_v14  ;;  %v2586_v6 = vld [vmem:[%s5081_s15 + $0x338] sm:$0xff]  ;;  %v2521_v14 = vld [vmem:[%s5081_s15 + $0x130] sm:$0xff] }
 0xc34   : > { %2652 = vmatpush1.msra.mxu1 %v2485_v9  ;;  %2729 = vmatpush1.msra.mxu0 %v2549_v36  ;;  %v2585_v9 = vld [vmem:[%s5081_s15 + $0x330] sm:$0xff]  ;;  %v2520_v36 = vld [vmem:[%s5081_s15 + $0x128] sm:$0xff] }
 0xc35   : > { %2653 = vmatprep.subr.mxu1 %v2484_v5  ;;  %2730 = vmatprep.subr.mxu0 %v2548_v4  ;;  %v2584_v5 = vld [vmem:[%s5081_s15 + $0x328] sm:$0xff]  ;;  %v2519_v4 = vld [vmem:[%s5081_s15 + $0x120] sm:$0xff] }
 0xc36   : > { %2654 = vmatpush1.msra.mxu1 %v2483_v38  ;;  %2731 = vmatpush1.msra.mxu0 %v2547_v10  ;;  %v2583_v38 = vld [vmem:[%s5081_s15 + $0x320] sm:$0xff]  ;;  %v2518_v10 = vld [vmem:[%s5081_s15 + $0x118] sm:$0xff] }
 0xc37   : > { %2655 = vmatprep.subr.mxu1 %v2546_v11  ;;  %2732 = vmatprep.subr.mxu0 %v2610_v7  ;;  %v2582_v11 = vld [vmem:[%s5081_s15 + $0x318] sm:$0xff]  ;;  %v2517_v7 = vld [vmem:[%s5081_s15 + $0x110] sm:$0xff] }
 0xc38   : > { %2656 = vmatpush2.msra.mxu1 %v2545_v8  ;;  %2733 = vmatpush2.msra.mxu0 %v2609_v13  ;;  %v2581_v8 = vld [vmem:[%s5081_s15 + $0x310] sm:$0xff]  ;;  %v2516_v13 = vld [vmem:[%s5081_s15 + $0x108] sm:$0xff] }
 0xc39   : > { %2657 = vmatprep.subr.mxu1 %v2544_v15  ;;  %2734 = vmatprep.subr.mxu0 %v2608_v16  ;;  %v2580_v15 = vld [vmem:[%s5081_s15 + $0x308] sm:$0xff]  ;;  %v2515_v16 = vld [vmem:[%s5081_s15 + $0x100] sm:$0xff] }
 0xc3a   : > { %2658 = vmatpush2.msra.mxu1 %v2543_v17  ;;  %2735 = vmatpush2.msra.mxu0 %v2607_v18  ;;  %v2579_v17 = vld [vmem:[%s5081_s15 + $0x300] sm:$0xff]  ;;  %v2311_v18 = vsub.s32 2, %v3828_v44 }
 0xc3b   : > { %2659 = vmatprep.subr.mxu1 %v2542_v19  ;;  %2736 = vmatprep.subr.mxu0 %v2606_v30  ;;  %v2299_v19 = vld [vmem:[%s5080_s14] sm:$0xf]  ;;  %v2315_v30 = vsub.s32 3, %v3828_v44 }
 0xc3c   : > { %2660 = vmatpush2.msra.mxu1 %v2541_v21  ;;  %2737 = vmatpush2.msra.mxu0 %v2605_v22  ;;  %v2304_v21 = vrot.slane %v2299_v19, %v3834_v46  ;;  %v2312_v22 = vrot.slane %v2299_v19, %v2311_v18 }
 0xc3d   : > { %2661 = vmatprep.subr.mxu1 %v2540_v23  ;;  %2738 = vmatprep.subr.mxu0 %v2604_v12  ;;  %v2308_v23 = vrot.slane %v2299_v19, %v3831_v45  ;;  %v2316_v12 = vrot.slane %v2299_v19, %v2315_v30 }
 0xc3e   : > { %2662 = vmatpush2.msra.mxu1 %v2539_v24  ;;  %2739 = vmatpush2.msra.mxu0 %v2603_v29 }
 0xc3f   : > { %2663 = vmatprep.subr.mxu1 %v2538_v31  ;;  %2740 = vmatprep.subr.mxu0 %v2602_v32 }
 0xc40   : > { %2664 = vmatpush2.msra.mxu1 %v2537_v35  ;;  %2741 = vmatpush2.msra.mxu0 %v2601_v39 }
 0xc41   : > { %2665 = vmatprep.subr.mxu1 %v2536_v59  ;;  %2742 = vmatprep.subr.mxu0 %v2600_v60 }
 0xc42   : > { %2666 = vmatpush2.msra.mxu1 %v2535_v40  ;;  %2743 = vmatpush2.msra.mxu0 %v2599_v41 }
 0xc43   : > { %2667 = vmatprep.subr.mxu1 %v2534_v62  ;;  %2744 = vmatprep.subr.mxu0 %v2598_v37 }
 0xc44   : > { %2668 = vmatpush2.msra.mxu1 %v2533_v42  ;;  %2745 = vmatpush2.msra.mxu0 %v2597_v47 }
 0xc45   : > { %2669 = vmatprep.subr.mxu1 %v2532_v43  ;;  %2746 = vmatprep.subr.mxu0 %v2596_v48 }
 0xc46   : > { %2670 = vmatpush2.msra.mxu1 %v2531_v55  ;;  %2747 = vmatpush2.msra.mxu0 %v2595_v49 }
 0xc47   : > { %2671 = vmatprep.subr.mxu1 %v2530_v50  ;;  %2748 = vmatprep.subr.mxu0 %v2594_v51 }
 0xc48   : > { %2672 = vmatpush2.msra.mxu1 %v2529_v52  ;;  %2749 = vmatpush2.msra.mxu0 %v2593_v54 }
 0xc49   : > { %2673 = vmatprep.subr.mxu1 %v2528_v20  ;;  %2750 = vmatprep.subr.mxu0 %v2592_v0  ;;  %v2611_v0 = vld [vmem:[%s5082_s16] sm:$0x3] }
 0xc4a   : > { %2674 = vmatpush2.msra.mxu1 %v2527_v26  ;;  %2751 = vmatpush2.msra.mxu0 %v2591_v53  ;;  %v2616_v26 = vrot.slane %v2611_v0, %v3834_v46  ;;  %v2620_v53 = vrot.slane %v2611_v0, %v3831_v45 }
 0xc4b   : > { %2675 = vmatprep.subr.mxu1 %v2526_v56  ;;  %2752 = vmatprep.subr.mxu0 %v2590_v57 }
 0xc4c   : > { %2676 = vmatpush2.msra.mxu1 %v2525_v58  ;;  %2753 = vmatpush2.msra.mxu0 %v2589_v61 }
 0xc4d   : > { %2677 = vmatprep.subr.mxu1 %v2524_v28  ;;  %2754 = vmatprep.subr.mxu0 %v2588_v63 }
 0xc4e   : > { %2678 = vmatpush2.msra.mxu1 %v2523_v27  ;;  %2755 = vmatpush2.msra.mxu0 %v2587_v1 }
 0xc4f   : > { %2679 = vmatprep.subr.mxu1 %v2522_v3  ;;  %2756 = vmatprep.subr.mxu0 %v2586_v6 }
 0xc50   : > { %2680 = vmatpush2.msra.mxu1 %v2521_v14  ;;  %2757 = vmatpush2.msra.mxu0 %v2585_v9 }
 0xc51   : > { %2681 = vmatprep.subr.mxu1 %v2520_v36  ;;  %2758 = vmatprep.subr.mxu0 %v2584_v5 }
 0xc52   : > { %2682 = vmatpush2.msra.mxu1 %v2519_v4  ;;  %2759 = vmatpush2.msra.mxu0 %v2583_v38 }
 0xc53   : > { %2683 = vmatprep.subr.mxu1 %v2518_v10  ;;  %2760 = vmatprep.subr.mxu0 %v2582_v11 }
 0xc54   : > { %2684 = vmatpush2.msra.mxu1 %v2517_v7  ;;  %2761 = vmatpush2.msra.mxu0 %v2581_v8 }
 0xc55   : > { %2685 = vmatprep.subr.mxu1 %v2516_v13  ;;  %2762 = vmatprep.subr.mxu0 %v2580_v15 }
 0xc56   : > { %2686 = vmatpush2.msra.mxu1 %v2515_v16  ;;  %2763 = vmatpush2.msra.mxu0 %v2579_v17 }
 0xcd5   : > { %v2387_v24 = vpop.f32.mrf.mxu1  ;;  %v2464_v29 = vpop.f32.mrf.mxu0 }
 0xcd6   : > { %v2388_v31 = vadd.f32 %v2387_v24, %v2304_v21  ;;  %v2465_v32 = vadd.f32 %v2464_v29, %v2312_v22 }
 0xcd7   : > { %v2389_v35 = vpop.f32.mrf.mxu1  ;;  %v2466_v39 = vpop.f32.mrf.mxu0 }
 0xcd8   : > { %v2390_v59 = vadd.f32 %v2389_v35, %v2308_v23  ;;  %v2467_v60 = vadd.f32 %v2466_v39, %v2316_v12  ;;  %v2475_v42 = vmax.f32 %v2388_v31, 0.0  ;;  %v2477_v44 = vmax.f32 %v2465_v32, 0.0 }
 0xcd9   : > { %v2393_v40 = vpop.f32.mrf.mxu1  ;;  %v2470_v41 = vpop.f32.mrf.mxu0 }
 0xcda   : > { %v2476_v62 = vmax.f32 %v2390_v59, 0.0  ;;  %v2478_v37 = vmax.f32 %v2467_v60, 0.0  ;;  %v2394_v47 = vadd.f32 %v2393_v40, %v2304_v21  ;;  %v2471_v43 = vadd.f32 %v2470_v41, %v2312_v22  ;;  %v2777_v60 = vld [vmem:[%s5083_s17] sm:$0x3] }
 0xcdb   : > { %v2395_v48 = vpop.f32.mrf.mxu1  ;;  %v2472_v55 = vpop.f32.mrf.mxu0  ;;  %v2778_v40 = vld [vmem:[%s5084_s18] sm:$0x3]  ;;  %v2815_v41 = vrot.slane %v2777_v60, %v3834_v46 }
 0xcdc   : > { %v2396_v49 = vadd.f32 %v2395_v48, %v2308_v23  ;;  %v2473_v50 = vadd.f32 %v2472_v55, %v2316_v12  ;;  %2687 = vmatprep.mubr.f32.mxu1 %v2476_v62  ;;  %2764 = vmatprep.mubr.f32.mxu0 %v2478_v37  ;;  %v2479_v54 = vmax.f32 %v2394_v47, 0.0  ;;  %v2481_v20 = vmax.f32 %v2471_v43, 0.0 }
 0xcdd   : > { %2688 = vmatmul.mubr.f32.vlgmr.msra.gmra.mxu1 %v2475_v42  ;;  %2765 = vmatmul.mubr.f32.vlgmr.msra.gmra.mxu0 %v2477_v44  ;;  %v2819_v62 = vrot.slane %v2777_v60, %v3831_v45  ;;  %v2830_v42 = vrot.slane %v2778_v40, %v3834_v46  ;;  %v2834_v44 = vrot.slane %v2778_v40, %v3831_v45 }
 0xcde   : > { %v2480_v51 = vmax.f32 %v2396_v49, 0.0  ;;  %v2482_v52 = vmax.f32 %v2473_v50, 0.0 }
 0xce0   : > { %2693 = vmatprep.mubr.f32.mxu1 %v2480_v51  ;;  %2770 = vmatprep.mubr.f32.mxu0 %v2482_v52 }
 0xce1   : > { %2694 = vmatmul.mubr.f32.gmra.mxu1 %v2479_v54  ;;  %2771 = vmatmul.mubr.f32.gmra.mxu0 %v2481_v20 }
 0xd9d   : > { %v2689_v56 = vpop.f32.mrf.mxu1  ;;  %v2766_v57 = vpop.f32.mrf.mxu0 }
 0xd9e   : > { %v2690_v58 = vadd.f32 %v2689_v56, %v2616_v26 }
 0xd9f   : > { %v2691_v61 = vpop.f32.mrf.mxu1  ;;  %v2768_v28 = vpop.f32.mrf.mxu0 }
 0xda0   : > { %v2692_v63 = vadd.f32 %v2691_v61, %v2620_v53  ;;  %v2767_v3 = vadd.f32 %v2766_v57, %v2690_v58 }
 0xda1   : > { %v2695_v27 = vpop.f32.mrf.mxu1  ;;  %v2772_v1 = vpop.f32.mrf.mxu0 }
 0xda2   : > { %v2769_v6 = vadd.f32 %v2768_v28, %v2692_v63  ;;  %v2696_v14 = vadd.f32 %v2695_v27, %v2616_v26 }
 0xda3   : > { %v2697_v9 = vpop.f32.mrf.mxu1  ;;  %v2774_v4 = vpop.f32.mrf.mxu0 }
 0xda4   : > { %v2698_v36 = vadd.f32 %v2697_v9, %v2620_v53  ;;  %v2779_v5 = vadd.f32 %v2769_v6, %v2767_v3  ;;  %v2773_v38 = vadd.f32 %v2772_v1, %v2696_v14 }
 0xda6   : > { %v2775_v10 = vadd.f32 %v2774_v4, %v2698_v36  ;;  %2780 = vadd.xlane.f32.xlu0 %v2779_v5 }
 0xda8   : > { %v2782_v11 = vadd.f32 %v2775_v10, %v2773_v38 }
 0xdaa   : > { %2783 = vadd.xlane.f32.xlu1 %v2782_v11 }
 0xe2f   : > { %v2781_v7 = vpop.xlane.xlu0 %2780 }
 0xe30   : > { %v2785_v8 = vmul.f32 0.00390625, %v2781_v7 }
 0xe32   : > { %v2787_v13 = vsub.f32 %v2767_v3, %v2785_v8  ;;  %v2788_v15 = vsub.f32 %v2769_v6, %v2785_v8 }
 0xe33   : > { %v2784_v16 = vpop.xlane.xlu1 %2783 }
 0xe34   : > { %v2786_v17 = vmul.f32 0.00390625, %v2784_v16  ;;  %v2791_v18 = vmul.f32 %v2787_v13, %v2787_v13  ;;  %v2792_v19 = vmul.f32 %v2788_v15, %v2788_v15 }
 0xe36   : > { %v2789_v30 = vsub.f32 %v2773_v38, %v2786_v17  ;;  %v2790_v21 = vsub.f32 %v2775_v10, %v2786_v17  ;;  %v2795_v22 = vadd.f32 %v2792_v19, %v2791_v18 }
 0xe38   : > { %2796 = vadd.xlane.f32.xlu0 %v2795_v22  ;;  %v2793_v23 = vmul.f32 %v2789_v30, %v2789_v30  ;;  %v2794_v12 = vmul.f32 %v2790_v21, %v2790_v21 }
 0xe3a   : > { %v2798_v24 = vadd.f32 %v2794_v12, %v2793_v23 }
 0xe3c   : > { %2799 = vadd.xlane.f32.xlu1 %v2798_v24 }
 0xec1   : > { %v2797_v29 = vpop.xlane.xlu0 %2796 }
 0xec2   : > { %v2801_v31 = vmul.f32 0.00390625, %v2797_v29 }
 0xec4   : > { %v2803_v32 = vadd.f32 1e-05, %v2801_v31 }
 0xec5   : > { %v2800_v35 = vpop.xlane.xlu1 %2799 }
 0xec6   : > { %3078 = vrsqrt.f32 %v2803_v32  ;;  %v2802_v39 = vmul.f32 0.00390625, %v2800_v35 }
 0xec8   : > { %v2804_v59 = vadd.f32 1e-05, %v2802_v39 }
 0xeca   : > { %3080 = vrsqrt.f32 %v2804_v59 }
 0xed3   : > { %v3079_v37 = vpop.eup %3078 }
 0xed4   : > { %v2807_v47 = vmul.f32 %v3079_v37, %v2787_v13  ;;  %v2808_v43 = vmul.f32 %v3079_v37, %v2788_v15 }
 0xed6   : > { %v2822_v48 = vmul.f32 %v2815_v41, %v2807_v47  ;;  %v2823_v55 = vmul.f32 %v2819_v62, %v2808_v43 }
 0xed7   : > { %v3081_v49 = vpop.eup %3080 }
 0xed8   : > { %v2837_v50 = vadd.f32 %v2830_v42, %v2822_v48  ;;  %v2838_v51 = vadd.f32 %v2834_v44, %v2823_v55  ;;  %v2809_v52 = vmul.f32 %v3081_v49, %v2789_v30  ;;  %v2810_v54 = vmul.f32 %v3081_v49, %v2790_v21 }
 0xeda   : > { %v2841_v20 = vadd.f32 %v2837_v50, %v4638_v25  ;;  %v2842_v46 = vadd.f32 %v2838_v51, %v4635_v2  ;;  %v2824_v0 = vmul.f32 %v2815_v41, %v2809_v52  ;;  %v2825_v45 = vmul.f32 %v2819_v62, %v2810_v54 }
 0xedc   : > { %2845 = vst [vmem:[%s602_s22] sm:$0xff] %v2841_v20  ;;  %2846 = vst [vmem:[%s602_s22 + $0x8] sm:$0xff] %v2842_v46  ;;  %v2839_v26 = vadd.f32 %v2830_v42, %v2824_v0  ;;  %v2840_v53 = vadd.f32 %v2834_v44, %v2825_v45 }
 0xede   : > { %v2843_v56 = vadd.f32 %v2839_v26, %v4660_v34  ;;  %v2844_v57 = vadd.f32 %v2840_v53, %v4657_v33 }
 0xee0   : > { %2847 = vst [vmem:[%s602_s22 + $0x10] sm:$0xff] %v2843_v56  ;;  %2848 = vst [vmem:[%s602_s22 + $0x18] sm:$0xff] %v2844_v57 }
 0xee1 PF: > { %s29_s0 = sadd.s32 1, %s3088_s0  }
 0xee2   : > { %p26_p4 = scmp.ge.s32.totalorder %s29_s0, 4  }
 0xee4   :  { %28 = sbr.rel (!%p26_p4) target bundleno = 5 (0x5), region = 126 }

// kernel: vit_encoder_forward.3
= control target key start
LH: loop header
LB: loop body
LE: loop exit
PB: predicated region body
PF: predicated region fallthrough
CT: control target
= control target key end

     0   :  { %s5202_s0 = inlined_call_operand.vmem [shape: f32[2,16,256], index: 0, kind: input, shape index: {}]   ;;  %s5203_s1 = inlined_call_operand.vmem [shape: f32[256,256], index: 1, kind: input, shape index: {}]   ;;  %s5204_s2 = inlined_call_operand.vmem [shape: f32[1,256], index: 2, kind: input, shape index: {}]   ;;  %s5205_s3 = inlined_call_operand.vmem [shape: f32[1,256], index: 3, kind: input, shape index: {}]   ;;  %s5206_s4 = inlined_call_operand.vmem [shape: f32[256,256], index: 4, kind: input, shape index: {}]   ;;  %s5207_s5 = inlined_call_operand.vmem [shape: f32[1,256], index: 5, kind: input, shape index: {}]   ;;  %s5208_s6 = inlined_call_operand.vmem [shape: f32[256,256], index: 6, kind: input, shape index: {}]   ;;  %s5209_s7 = inlined_call_operand.vmem [shape: f32[1,256], index: 7, kind: input, shape index: {}]   ;;  %s5210_s8 = inlined_call_operand.vmem [shape: f32[256,256], index: 8, kind: input, shape index: {}]   ;;  %s5211_s9 = inlined_call_operand.vmem [shape: f32[1,256], index: 9, kind: input, shape index: {}]   ;;  %s5212_s10 = inlined_call_operand.vmem [shape: f32[1,256], index: 10, kind: input, shape index: {}]   ;;  %s5213_s11 = inlined_call_operand.vmem [shape: f32[1,256], index: 11, kind: input, shape index: {}]   ;;  %s5214_s12 = inlined_call_operand.vmem [shape: f32[256,512], index: 12, kind: input, shape index: {}]   ;;  %s5215_s13 = inlined_call_operand.vmem [shape: f32[1,512], index: 13, kind: input, shape index: {}]   ;;  %s5216_s14 = inlined_call_operand.vmem [shape: f32[512,256], index: 14, kind: input, shape index: {}]   ;;  %s5217_s15 = inlined_call_operand.vmem [shape: f32[1,256], index: 15, kind: input, shape index: {}]   ;;  %s5218_s16 = inlined_call_operand.vmem [shape: f32[1,256], index: 16, kind: input, shape index: {}]   ;;  %s5219_s17 = inlined_call_operand.vmem [shape: f32[1,256], index: 17, kind: input, shape index: {}]   ;;  %s5220_s18 = inlined_call_operand.hbm [shape: f32[2,16,256], index: 18, kind: output, shape index: {}]  }
   0x1   :  { %5229 = sst [smem:[#allocation12_spill]] %s5202_s0 }
   0x2   :  { %5230 = sst [smem:[#allocation13_spill]] %s5203_s1 }
   0x3   :  { %5231 = sst [smem:[#allocation14_spill]] %s5204_s2 }
   0x4   :  { %5232 = sst [smem:[#allocation15_spill]] %s5205_s3 }
   0x5   :  { %5233 = sst [smem:[#allocation16_spill]] %s5220_s18 }
   0x6   :  { %23 = vsyncpa [#allocation4], 0 }
   0x7   :  { %25 = vsyncpa [#allocation4 + $0x1], 0  ;;  %s3261_s27 = smov 0   ;;  %s3263_s28 = smov 0  }
   0x8   :  { %s3265_s29 = smov 0   ;;  %s3267_s30 = smov 0  }
   0x9 LB: > { %5234 = sst [smem:[#allocation6_spill]] %s3148_s27  ;;  %s3282_s0 = sadd.s32 4294967295, %s3160_s30   ;;  %s3160_s30 = sphi %s3267_s30, %s5250_s30   ;;  %s3156_s29 = sphi %s3265_s29, %s5255_s29   ;;  %s3152_s28 = sphi %s3263_s28, %s5254_s28   ;;  %s3148_s27 = sphi %s3261_s27, %s5253_s27  }
   0xa   : > { %5235 = sst [smem:[#allocation7_spill]] %s3156_s29  ;;  %s2888_s19 = sadd.s32 4294967294, %s3160_s30  }
   0xb   : > { %5236 = sst [smem:[#allocation8_spill]] %s3160_s30  ;;  %s3286_s1 = sadd.s32 1, %s3160_s30  }
   0xc   : > { %5237 = sst [smem:[#allocation9_spill]] %s3286_s1  ;;  %s421_s20 = sadd.s32 1, %s3156_s29 }
   0xd   : > { %s418_s21 = ssub.s32 %s3160_s30, %s3286_s1  ;;  %p431_p0 = scmp.ne.s32.totalorder %s3156_s29, %s3152_s28 }
   0xe   : > { %p419_p1 = scmp.eq.s32.totalorder %s418_s21, 0  ;;  %p432_p2 = scmp.eq.s32.totalorder %s3282_s0, 1 }
   0xf   : > { %p437_p3 = scmp.ne.s32.totalorder %s3152_s28, %s3148_s27  ;;  %p438_p4 = scmp.eq.s32.totalorder %s2888_s19, 1 }
  0x10   : > { %s3297_s22 = scalar_select %p419_p1, %s3156_s29, %s421_s20  }
  0x11   : > { %p3299_p5 = por %p432_p2, %p431_p0  ;;  %p3303_p6 = por %p438_p4, %p437_p3 }
  0x12   : > { %5238 = sst [smem:[#allocation10_spill]] %s3297_s22  ;;  %p2891_p7 = scmp.ge.s32.totalorder %s3160_s30, 1 }
  0x13   : > { %s5240_s23 = scalar_select %p3303_p6, 1, 0 }
  0x14   : > { %p515_p8 = scmp.lt.s32.totalorder %s3160_s30, 3 }
  0x15   : > { %5241 = sst [smem:[#allocation11_spill]] %s5240_s23 }
  0x16   : > { %p516_p9 = pnand %p2891_p7, %p515_p8 }
  0x17   : > { %s5242_s26 = sld [smem:[#allocation13_spill]] (!%p516_p9)  ;;  %p569_p10 = scmp.lt.s32.totalorder (!%p516_p9), %s3282_s0, 1 }
  0x18   : > { %519 = sbr.rel (%p516_p9) target bundleno = 3834 (0xefa), region = 92  ;;  %s5243_s29 = sld [smem:[#allocation12_spill]] (!%p516_p9) }
  0x19   : > { %s5244_s21 = sld [smem:[#allocation14_spill]] (!%p516_p9)  ;;  %s3162_s18 = smov (!%p516_p9), 64  }
  0x1a   : > { %s5245_s3 = sld [smem:[#allocation15_spill]] (!%p516_p9)  ;;  %s3163_s24 = smov (!%p516_p9), [#allocation3]  }
  0x1b   : > { %s3104_s25 = sshll.u32 (!%p516_p9), %s3163_s24, 4  ;;  %s3105_s25 = int_to_ptr.vmem [resolvable:$false] %s3104_s25 }
  0x1d   : > { %v609_v0 = vld [vmem:[%s5242_s26 + $0xf8] sm:$0xff]  ;;  %v608_v1 = vld [vmem:[%s5242_s26 + $0xf0] sm:$0xff]  ;;  %v607_v2 = vld [vmem:[%s5242_s26 + $0xe8] sm:$0xff]  ;;  %s570_s23 = scalar_select %p569_p10, %s3282_s0, 1  ;;  %vm1243_vm0 = vcmask 523264   ;;  %vm1333_vm1 = vcmask 130048  }
  0x1e   : > { %642 = vmatprep.subr.mxu0 %v609_v0  ;;  %v606_v3 = vld [vmem:[%s5242_s26 + $0xe0] sm:$0xff]  ;;  %v605_v4 = vld [vmem:[%s5242_s26 + $0xd8] sm:$0xff]  ;;  %v604_v5 = vld [vmem:[%s5242_s26 + $0xd0] sm:$0xff]  ;;  %vm1651_vm2 = vcmask 1048064  }
  0x1f   : > { %643 = vmatpush1.msra.mxu0 %v608_v1  ;;  %v603_v6 = vld [vmem:[%s5242_s26 + $0xc8] sm:$0xff]  ;;  %v602_v7 = vld [vmem:[%s5242_s26 + $0xc0] sm:$0xff]  ;;  %v601_v8 = vld [vmem:[%s5242_s26 + $0xb8] sm:$0xff]  ;;  %s2924_s27 = sshll.u32 %s570_s23, 5  ;;  %s5246_s23 = sld [smem:[#allocation16_spill]] }
  0x20   : > { %644 = vmatprep.subr.mxu0 %v607_v2  ;;  %v600_v9 = vld [vmem:[%s5242_s26 + $0xb0] sm:$0xff]  ;;  %v599_v10 = vld [vmem:[%s5242_s26 + $0xa8] sm:$0xff]  ;;  %v598_v11 = vld [vmem:[%s5242_s26 + $0xa0] sm:$0xff]  ;;  %s3377_s1 = scalar_lea.vmem %s5243_s29, %s2924_s27  ;;  %s2925_s27 = sshll.u32 %s3282_s0, 9 }
  0x21   : > { %645 = vmatpush1.msra.mxu0 %v606_v3  ;;  %v597_v12 = vld [vmem:[%s5242_s26 + $0x98] sm:$0xff]  ;;  %v596_v13 = vld [vmem:[%s5242_s26 + $0x90] sm:$0xff]  ;;  %v595_v14 = vld [vmem:[%s5242_s26 + $0x88] sm:$0xff] }
  0x22   : > { %646 = vmatprep.subr.mxu0 %v605_v4  ;;  %v594_v15 = vld [vmem:[%s5242_s26 + $0x80] sm:$0xff]  ;;  %v593_v16 = vld [vmem:[%s5242_s26 + $0x78] sm:$0xff]  ;;  %v592_v17 = vld [vmem:[%s5242_s26 + $0x70] sm:$0xff] }
  0x23   : > { %647 = vmatpush1.msra.mxu0 %v604_v5  ;;  %v591_v18 = vld [vmem:[%s5242_s26 + $0x68] sm:$0xff]  ;;  %v590_v19 = vld [vmem:[%s5242_s26 + $0x60] sm:$0xff]  ;;  %v589_v20 = vld [vmem:[%s5242_s26 + $0x58] sm:$0xff] }
  0x24   : > { %648 = vmatprep.subr.mxu0 %v603_v6  ;;  %v588_v21 = vld [vmem:[%s5242_s26 + $0x50] sm:$0xff]  ;;  %v587_v22 = vld [vmem:[%s5242_s26 + $0x48] sm:$0xff]  ;;  %v586_v23 = vld [vmem:[%s5242_s26 + $0x40] sm:$0xff] }
  0x25   : > { %649 = vmatpush1.msra.mxu0 %v602_v7  ;;  %v575_v24 = vld [vmem:[%s3377_s1 + $0x8] sm:$0xff]  ;;  %v585_v25 = vld [vmem:[%s5242_s26 + $0x38] sm:$0xff]  ;;  %v584_v26 = vld [vmem:[%s5242_s26 + $0x30] sm:$0xff]  ;;  %s5154_s30 = scalar_lea.hbm %s5246_s23, %s2925_s27 }
  0x26   : > { %650 = vmatprep.subr.mxu0 %v601_v8  ;;  %706 = vmatprep.mubr.f32.mxu0 %v575_v24  ;;  %v583_v27 = vld [vmem:[%s5242_s26 + $0x28] sm:$0xff]  ;;  %v582_v28 = vld [vmem:[%s5242_s26 + $0x20] sm:$0xff]  ;;  %v581_v29 = vld [vmem:[%s5242_s26 + $0x18] sm:$0xff] }
  0x27   : > { %651 = vmatpush1.msra.mxu0 %v600_v9  ;;  %v580_v30 = vld [vmem:[%s5242_s26 + $0x10] sm:$0xff]  ;;  %v579_v31 = vld [vmem:[%s5242_s26 + $0x8] sm:$0xff]  ;;  %v578_v32 = vld [vmem:[%s5242_s26] sm:$0xff] }
  0x28   : > { %652 = vmatprep.subr.mxu0 %v599_v10  ;;  %v641_v33 = vld [vmem:[%s5242_s26 + $0x1f8] sm:$0xff]  ;;  %v640_v34 = vld [vmem:[%s5242_s26 + $0x1f0] sm:$0xff]  ;;  %v639_v35 = vld [vmem:[%s5242_s26 + $0x1e8] sm:$0xff] }
  0x29   : > { %653 = vmatpush1.msra.mxu0 %v598_v11  ;;  %v638_v36 = vld [vmem:[%s5242_s26 + $0x1e0] sm:$0xff]  ;;  %v637_v37 = vld [vmem:[%s5242_s26 + $0x1d8] sm:$0xff]  ;;  %v636_v38 = vld [vmem:[%s5242_s26 + $0x1d0] sm:$0xff] }
  0x2a   : > { %654 = vmatprep.subr.mxu0 %v597_v12  ;;  %v635_v39 = vld [vmem:[%s5242_s26 + $0x1c8] sm:$0xff]  ;;  %v634_v40 = vld [vmem:[%s5242_s26 + $0x1c0] sm:$0xff]  ;;  %v633_v41 = vld [vmem:[%s5242_s26 + $0x1b8] sm:$0xff] }
  0x2b   : > { %655 = vmatpush1.msra.mxu0 %v596_v13  ;;  %v632_v42 = vld [vmem:[%s5242_s26 + $0x1b0] sm:$0xff]  ;;  %v631_v43 = vld [vmem:[%s5242_s26 + $0x1a8] sm:$0xff]  ;;  %v630_v44 = vld [vmem:[%s5242_s26 + $0x1a0] sm:$0xff] }
  0x2c   : > { %656 = vmatprep.subr.mxu0 %v595_v14  ;;  %v629_v45 = vld [vmem:[%s5242_s26 + $0x198] sm:$0xff]  ;;  %v628_v46 = vld [vmem:[%s5242_s26 + $0x190] sm:$0xff]  ;;  %v627_v47 = vld [vmem:[%s5242_s26 + $0x188] sm:$0xff] }
  0x2d   : > { %657 = vmatpush1.msra.mxu0 %v594_v15  ;;  %v626_v48 = vld [vmem:[%s5242_s26 + $0x180] sm:$0xff]  ;;  %v625_v49 = vld [vmem:[%s5242_s26 + $0x178] sm:$0xff]  ;;  %v624_v50 = vld [vmem:[%s5242_s26 + $0x170] sm:$0xff] }
  0x2e   : > { %658 = vmatprep.subr.mxu0 %v593_v16  ;;  %v623_v51 = vld [vmem:[%s5242_s26 + $0x168] sm:$0xff]  ;;  %v622_v52 = vld [vmem:[%s5242_s26 + $0x160] sm:$0xff]  ;;  %v621_v53 = vld [vmem:[%s5242_s26 + $0x158] sm:$0xff] }
  0x2f   : > { %659 = vmatpush1.msra.mxu0 %v592_v17  ;;  %v620_v54 = vld [vmem:[%s5242_s26 + $0x150] sm:$0xff]  ;;  %v619_v55 = vld [vmem:[%s5242_s26 + $0x148] sm:$0xff]  ;;  %v618_v56 = vld [vmem:[%s5242_s26 + $0x140] sm:$0xff] }
  0x30   : > { %660 = vmatprep.subr.mxu0 %v591_v18  ;;  %v617_v57 = vld [vmem:[%s5242_s26 + $0x138] sm:$0xff]  ;;  %v616_v58 = vld [vmem:[%s5242_s26 + $0x130] sm:$0xff]  ;;  %v615_v59 = vld [vmem:[%s5242_s26 + $0x128] sm:$0xff] }
  0x31   : > { %661 = vmatpush1.msra.mxu0 %v590_v19  ;;  %v614_v60 = vld [vmem:[%s5242_s26 + $0x120] sm:$0xff]  ;;  %v613_v61 = vld [vmem:[%s5242_s26 + $0x118] sm:$0xff]  ;;  %v612_v62 = vld [vmem:[%s5242_s26 + $0x110] sm:$0xff] }
  0x32   : > { %662 = vmatprep.subr.mxu0 %v589_v20  ;;  %v611_v63 = vld [vmem:[%s5242_s26 + $0x108] sm:$0xff]  ;;  %v610_v0 = vld [vmem:[%s5242_s26 + $0x100] sm:$0xff]  ;;  %v577_v2 = vld [vmem:[%s3377_s1 + $0x18] sm:$0xff] }
  0x33   : > { %663 = vmatpush1.msra.mxu0 %v588_v21  ;;  %v574_v1 = vld [vmem:[%s3377_s1] sm:$0xff]  ;;  %v576_v3 = vld [vmem:[%s3377_s1 + $0x10] sm:$0xff]  ;;  %v815_v10 = vld [vmem:[%s5206_s4 + $0xf8] sm:$0xff] }
  0x34   : > { %664 = vmatprep.subr.mxu0 %v587_v22  ;;  %v814_v11 = vld [vmem:[%s5206_s4 + $0xf0] sm:$0xff]  ;;  %v968_v12 = vld [vmem:[%s5208_s6 + $0xf8] sm:$0xff]  ;;  %860 = vmatprep.subr.mxu1 %v815_v10  ;;  %v813_v13 = vld [vmem:[%s5206_s4 + $0xe8] sm:$0xff] }
  0x35   : > { %665 = vmatpush1.msra.mxu0 %v586_v23  ;;  %v967_v14 = vld [vmem:[%s5208_s6 + $0xf0] sm:$0xff]  ;;  %v812_v15 = vld [vmem:[%s5206_s4 + $0xe0] sm:$0xff]  ;;  %861 = vmatpush1.msra.mxu1 %v814_v11  ;;  %v966_v16 = vld [vmem:[%s5208_s6 + $0xe8] sm:$0xff] }
  0x36   : > { %666 = vmatprep.subr.mxu0 %v585_v25  ;;  %v811_v17 = vld [vmem:[%s5206_s4 + $0xd8] sm:$0xff]  ;;  %v965_v18 = vld [vmem:[%s5208_s6 + $0xe0] sm:$0xff]  ;;  %862 = vmatprep.subr.mxu1 %v813_v13  ;;  %v810_v19 = vld [vmem:[%s5206_s4 + $0xd0] sm:$0xff] }
  0x37   : > { %667 = vmatpush1.msra.mxu0 %v584_v26  ;;  %v964_v20 = vld [vmem:[%s5208_s6 + $0xd8] sm:$0xff]  ;;  %863 = vmatpush1.msra.mxu1 %v812_v15  ;;  %v809_v21 = vld [vmem:[%s5206_s4 + $0xc8] sm:$0xff]  ;;  %v963_v22 = vld [vmem:[%s5208_s6 + $0xd0] sm:$0xff] }
  0x38   : > { %668 = vmatprep.subr.mxu0 %v583_v27  ;;  %v962_v23 = vld [vmem:[%s5208_s6 + $0xc8] sm:$0xff]  ;;  %864 = vmatprep.subr.mxu1 %v811_v17  ;;  %v808_v24 = vld [vmem:[%s5206_s4 + $0xc0] sm:$0xff]  ;;  %v807_v26 = vld [vmem:[%s5206_s4 + $0xb8] sm:$0xff] }
  0x39   : > { %669 = vmatpush1.msra.mxu0 %v582_v28  ;;  %v961_v25 = vld [vmem:[%s5208_s6 + $0xc0] sm:$0xff]  ;;  %865 = vmatpush1.msra.mxu1 %v810_v19  ;;  %v960_v27 = vld [vmem:[%s5208_s6 + $0xb8] sm:$0xff]  ;;  %v806_v28 = vld [vmem:[%s5206_s4 + $0xb0] sm:$0xff] }
  0x3a   : > { %670 = vmatprep.subr.mxu0 %v581_v29  ;;  %866 = vmatprep.subr.mxu1 %v809_v21  ;;  %v959_v29 = vld [vmem:[%s5208_s6 + $0xb0] sm:$0xff]  ;;  %v785_v10 = vld [vmem:[%s5206_s4 + $0x8] sm:$0xff]  ;;  %v937_v13 = vld [vmem:[%s5208_s6] sm:$0xff] }
  0x3b   : > { %671 = vmatpush1.msra.mxu0 %v580_v30  ;;  %867 = vmatpush1.msra.mxu1 %v808_v24  ;;  %v805_v30 = vld [vmem:[%s5206_s4 + $0xa8] sm:$0xff]  ;;  %v1000_v15 = vld [vmem:[%s5208_s6 + $0x1f8] sm:$0xff]  ;;  %v999_v17 = vld [vmem:[%s5208_s6 + $0x1f0] sm:$0xff] }
  0x3c   : > { %672 = vmatprep.subr.mxu0 %v579_v31  ;;  %v958_v31 = vld [vmem:[%s5208_s6 + $0xa8] sm:$0xff]  ;;  %868 = vmatprep.subr.mxu1 %v807_v26  ;;  %v997_v21 = vld [vmem:[%s5208_s6 + $0x1e0] sm:$0xff]  ;;  %v842_v24 = vld [vmem:[%s5206_s4 + $0x1d0] sm:$0xff] }
  0x3d   : > { %673 = vmatpush1.msra.mxu0 %v578_v32  ;;  %v804_v32 = vld [vmem:[%s5206_s4 + $0xa0] sm:$0xff]  ;;  %869 = vmatpush1.msra.mxu1 %v806_v28  ;;  %v938_v11 = vld [vmem:[%s5208_s6 + $0x8] sm:$0xff] }
  0x3e   : > { %674 = vmatprep.subr.mxu0 %v641_v33  ;;  %v957_v33 = vld [vmem:[%s5208_s6 + $0xa0] sm:$0xff]  ;;  %870 = vmatprep.subr.mxu1 %v805_v30  ;;  %v998_v19 = vld [vmem:[%s5208_s6 + $0x1e8] sm:$0xff] }
  0x3f   : > { %675 = vmatpush2.msra.mxu0 %v640_v34  ;;  %v803_v34 = vld [vmem:[%s5206_s4 + $0x98] sm:$0xff]  ;;  %871 = vmatpush1.msra.mxu1 %v804_v32  ;;  %v841_v26 = vld [vmem:[%s5206_s4 + $0x1c8] sm:$0xff]  ;;  %v840_v28 = vld [vmem:[%s5206_s4 + $0x1c0] sm:$0xff] }
  0x40   : > { %676 = vmatprep.subr.mxu0 %v639_v35  ;;  %v956_v35 = vld [vmem:[%s5208_s6 + $0x98] sm:$0xff]  ;;  %872 = vmatprep.subr.mxu1 %v803_v34 }
  0x41   : > { %677 = vmatpush2.msra.mxu0 %v638_v36  ;;  %v802_v36 = vld [vmem:[%s5206_s4 + $0x90] sm:$0xff] }
  0x42   : > { %678 = vmatprep.subr.mxu0 %v637_v37  ;;  %v955_v37 = vld [vmem:[%s5208_s6 + $0x90] sm:$0xff]  ;;  %873 = vmatpush1.msra.mxu1 %v802_v36 }
  0x43   : > { %679 = vmatpush2.msra.mxu0 %v636_v38  ;;  %v801_v38 = vld [vmem:[%s5206_s4 + $0x88] sm:$0xff] }
  0x44   : > { %680 = vmatprep.subr.mxu0 %v635_v39  ;;  %v954_v39 = vld [vmem:[%s5208_s6 + $0x88] sm:$0xff]  ;;  %874 = vmatprep.subr.mxu1 %v801_v38 }
  0x45   : > { %681 = vmatpush2.msra.mxu0 %v634_v40  ;;  %v800_v40 = vld [vmem:[%s5206_s4 + $0x80] sm:$0xff] }
  0x46   : > { %682 = vmatprep.subr.mxu0 %v633_v41  ;;  %v953_v41 = vld [vmem:[%s5208_s6 + $0x80] sm:$0xff]  ;;  %875 = vmatpush1.msra.mxu1 %v800_v40 }
  0x47   : > { %683 = vmatpush2.msra.mxu0 %v632_v42  ;;  %v799_v42 = vld [vmem:[%s5206_s4 + $0x78] sm:$0xff] }
  0x48   : > { %684 = vmatprep.subr.mxu0 %v631_v43  ;;  %v952_v43 = vld [vmem:[%s5208_s6 + $0x78] sm:$0xff]  ;;  %876 = vmatprep.subr.mxu1 %v799_v42 }
  0x49   : > { %685 = vmatpush2.msra.mxu0 %v630_v44  ;;  %v798_v44 = vld [vmem:[%s5206_s4 + $0x70] sm:$0xff] }
  0x4a   : > { %686 = vmatprep.subr.mxu0 %v629_v45  ;;  %v951_v45 = vld [vmem:[%s5208_s6 + $0x70] sm:$0xff]  ;;  %877 = vmatpush1.msra.mxu1 %v798_v44  ;;  %v993_v44 = vld [vmem:[%s5208_s6 + $0x1c0] sm:$0xff] }
  0x4b   : > { %687 = vmatpush2.msra.mxu0 %v628_v46  ;;  %v797_v46 = vld [vmem:[%s5206_s4 + $0x68] sm:$0xff] }
  0x4c   : > { %688 = vmatprep.subr.mxu0 %v627_v47  ;;  %v950_v47 = vld [vmem:[%s5208_s6 + $0x68] sm:$0xff]  ;;  %878 = vmatprep.subr.mxu1 %v797_v46  ;;  %v992_v46 = vld [vmem:[%s5208_s6 + $0x1b8] sm:$0xff] }
  0x4d   : > { %689 = vmatpush2.msra.mxu0 %v626_v48  ;;  %v796_v48 = vld [vmem:[%s5206_s4 + $0x60] sm:$0xff] }
  0x4e   : > { %690 = vmatprep.subr.mxu0 %v625_v49  ;;  %v949_v49 = vld [vmem:[%s5208_s6 + $0x60] sm:$0xff]  ;;  %879 = vmatpush1.msra.mxu1 %v796_v48  ;;  %v991_v48 = vld [vmem:[%s5208_s6 + $0x1b0] sm:$0xff] }
  0x4f   : > { %691 = vmatpush2.msra.mxu0 %v624_v50  ;;  %v795_v50 = vld [vmem:[%s5206_s4 + $0x58] sm:$0xff] }
  0x50   : > { %692 = vmatprep.subr.mxu0 %v623_v51  ;;  %v948_v51 = vld [vmem:[%s5208_s6 + $0x58] sm:$0xff]  ;;  %880 = vmatprep.subr.mxu1 %v795_v50  ;;  %v990_v50 = vld [vmem:[%s5208_s6 + $0x1a8] sm:$0xff] }
  0x51   : > { %693 = vmatpush2.msra.mxu0 %v622_v52  ;;  %v794_v52 = vld [vmem:[%s5206_s4 + $0x50] sm:$0xff] }
  0x52   : > { %694 = vmatprep.subr.mxu0 %v621_v53  ;;  %v947_v53 = vld [vmem:[%s5208_s6 + $0x50] sm:$0xff]  ;;  %881 = vmatpush1.msra.mxu1 %v794_v52  ;;  %v989_v52 = vld [vmem:[%s5208_s6 + $0x1a0] sm:$0xff] }
  0x53   : > { %695 = vmatpush2.msra.mxu0 %v620_v54  ;;  %v793_v54 = vld [vmem:[%s5206_s4 + $0x48] sm:$0xff] }
  0x54   : > { %696 = vmatprep.subr.mxu0 %v619_v55  ;;  %v946_v55 = vld [vmem:[%s5208_s6 + $0x48] sm:$0xff]  ;;  %882 = vmatprep.subr.mxu1 %v793_v54  ;;  %v988_v54 = vld [vmem:[%s5208_s6 + $0x198] sm:$0xff] }
  0x55   : > { %697 = vmatpush2.msra.mxu0 %v618_v56  ;;  %v792_v56 = vld [vmem:[%s5206_s4 + $0x40] sm:$0xff] }
  0x56   : > { %698 = vmatprep.subr.mxu0 %v617_v57  ;;  %v945_v57 = vld [vmem:[%s5208_s6 + $0x40] sm:$0xff]  ;;  %883 = vmatpush1.msra.mxu1 %v792_v56  ;;  %v987_v56 = vld [vmem:[%s5208_s6 + $0x190] sm:$0xff] }
  0x57   : > { %699 = vmatpush2.msra.mxu0 %v616_v58  ;;  %v791_v58 = vld [vmem:[%s5206_s4 + $0x38] sm:$0xff] }
  0x58   : > { %700 = vmatprep.subr.mxu0 %v615_v59  ;;  %v944_v59 = vld [vmem:[%s5208_s6 + $0x38] sm:$0xff]  ;;  %884 = vmatprep.subr.mxu1 %v791_v58  ;;  %v986_v58 = vld [vmem:[%s5208_s6 + $0x188] sm:$0xff] }
  0x59   : > { %701 = vmatpush2.msra.mxu0 %v614_v60  ;;  %v790_v60 = vld [vmem:[%s5206_s4 + $0x30] sm:$0xff] }
  0x5a   : > { %702 = vmatprep.subr.mxu0 %v613_v61  ;;  %v943_v61 = vld [vmem:[%s5208_s6 + $0x30] sm:$0xff]  ;;  %885 = vmatpush1.msra.mxu1 %v790_v60  ;;  %v985_v60 = vld [vmem:[%s5208_s6 + $0x180] sm:$0xff] }
  0x5b   : > { %703 = vmatpush2.msra.mxu0 %v612_v62  ;;  %v789_v62 = vld [vmem:[%s5206_s4 + $0x28] sm:$0xff] }
  0x5c   : > { %704 = vmatprep.subr.mxu0 %v611_v63  ;;  %v942_v63 = vld [vmem:[%s5208_s6 + $0x28] sm:$0xff]  ;;  %886 = vmatprep.subr.mxu1 %v789_v62  ;;  %v984_v62 = vld [vmem:[%s5208_s6 + $0x178] sm:$0xff] }
  0x5d   : > { %705 = vmatpush2.msra.mxu0 %v610_v0  ;;  %v788_v0 = vld [vmem:[%s5206_s4 + $0x20] sm:$0xff] }
  0x5e   : > { %707 = vmatmul.mubr.f32.vlgmr.msra.gmra.mxu0 %v574_v1  ;;  %1013 = vmatprep.subr.mxu0 %v968_v12  ;;  %v941_v1 = vld [vmem:[%s5208_s6 + $0x20] sm:$0xff] }
  0x5f   : > { %712 = vmatprep.mubr.f32.mxu0 %v577_v2  ;;  %1014 = vmatpush1.msra.mxu0 %v967_v14  ;;  %v787_v2 = vld [vmem:[%s5206_s4 + $0x18] sm:$0xff]  ;;  %v784_v12 = vld [vmem:[%s5206_s4] sm:$0xff] }
  0x60   : > { %1015 = vmatprep.subr.mxu0 %v966_v16  ;;  %887 = vmatpush1.msra.mxu1 %v788_v0  ;;  %v847_v14 = vld [vmem:[%s5206_s4 + $0x1f8] sm:$0xff]  ;;  %v846_v16 = vld [vmem:[%s5206_s4 + $0x1f0] sm:$0xff] }
  0x61   : > { %1016 = vmatpush1.msra.mxu0 %v965_v18  ;;  %888 = vmatprep.subr.mxu1 %v787_v2  ;;  %v845_v18 = vld [vmem:[%s5206_s4 + $0x1e8] sm:$0xff]  ;;  %v983_v0 = vld [vmem:[%s5208_s6 + $0x170] sm:$0xff] }
  0x62   : > { %713 = vmatmul.mubr.f32.gmra.mxu0 %v576_v3  ;;  %1017 = vmatprep.subr.mxu0 %v964_v20  ;;  %v940_v3 = vld [vmem:[%s5208_s6 + $0x18] sm:$0xff]  ;;  %v844_v20 = vld [vmem:[%s5206_s4 + $0x1e0] sm:$0xff]  ;;  %v982_v2 = vld [vmem:[%s5208_s6 + $0x168] sm:$0xff] }
  0x63   : > { %1018 = vmatpush1.msra.mxu0 %v963_v22  ;;  %v843_v22 = vld [vmem:[%s5206_s4 + $0x1d8] sm:$0xff] }
  0x64   : > { %1019 = vmatprep.subr.mxu0 %v962_v23  ;;  %v996_v23 = vld [vmem:[%s5208_s6 + $0x1d8] sm:$0xff] }
  0x65   : > { %1020 = vmatpush1.msra.mxu0 %v961_v25  ;;  %v995_v25 = vld [vmem:[%s5208_s6 + $0x1d0] sm:$0xff] }
  0x66   : > { %1021 = vmatprep.subr.mxu0 %v960_v27  ;;  %v994_v27 = vld [vmem:[%s5208_s6 + $0x1c8] sm:$0xff] }
  0x67   : > { %1022 = vmatpush1.msra.mxu0 %v959_v29 }
  0x68   : > { %1023 = vmatprep.subr.mxu0 %v958_v31 }
  0x69   : > { %1024 = vmatpush1.msra.mxu0 %v957_v33 }
  0x6a   : > { %1025 = vmatprep.subr.mxu0 %v956_v35 }
  0x6b   : > { %1026 = vmatpush1.msra.mxu0 %v955_v37 }
  0x6c   : > { %1027 = vmatprep.subr.mxu0 %v954_v39 }
  0x6d   : > { %1028 = vmatpush1.msra.mxu0 %v953_v41 }
  0x6e   : > { %1029 = vmatprep.subr.mxu0 %v952_v43  ;;  %v839_v43 = vld [vmem:[%s5206_s4 + $0x1b8] sm:$0xff] }
  0x6f   : > { %1030 = vmatpush1.msra.mxu0 %v951_v45  ;;  %v838_v45 = vld [vmem:[%s5206_s4 + $0x1b0] sm:$0xff] }
  0x70   : > { %1031 = vmatprep.subr.mxu0 %v950_v47  ;;  %v837_v47 = vld [vmem:[%s5206_s4 + $0x1a8] sm:$0xff] }
  0x71   : > { %1032 = vmatpush1.msra.mxu0 %v949_v49  ;;  %v836_v49 = vld [vmem:[%s5206_s4 + $0x1a0] sm:$0xff] }
  0x72   : > { %1033 = vmatprep.subr.mxu0 %v948_v51  ;;  %v835_v51 = vld [vmem:[%s5206_s4 + $0x198] sm:$0xff] }
  0x73   : > { %1034 = vmatpush1.msra.mxu0 %v947_v53  ;;  %v834_v53 = vld [vmem:[%s5206_s4 + $0x190] sm:$0xff] }
  0x74   : > { %1035 = vmatprep.subr.mxu0 %v946_v55  ;;  %v833_v55 = vld [vmem:[%s5206_s4 + $0x188] sm:$0xff] }
  0x75   : > { %1036 = vmatpush1.msra.mxu0 %v945_v57  ;;  %v832_v57 = vld [vmem:[%s5206_s4 + $0x180] sm:$0xff] }
  0x76   : > { %1037 = vmatprep.subr.mxu0 %v944_v59  ;;  %v831_v59 = vld [vmem:[%s5206_s4 + $0x178] sm:$0xff] }
  0x77   : > { %1038 = vmatpush1.msra.mxu0 %v943_v61  ;;  %v830_v61 = vld [vmem:[%s5206_s4 + $0x170] sm:$0xff] }
  0x78   : > { %1039 = vmatprep.subr.mxu0 %v942_v63  ;;  %v829_v63 = vld [vmem:[%s5206_s4 + $0x168] sm:$0xff] }
  0x79   : > { %1040 = vmatpush1.msra.mxu0 %v941_v1  ;;  %v828_v1 = vld [vmem:[%s5206_s4 + $0x160] sm:$0xff] }
  0x7a   : > { %1041 = vmatprep.subr.mxu0 %v940_v3  ;;  %v827_v3 = vld [vmem:[%s5206_s4 + $0x158] sm:$0xff] }
 0x11e   : > { %v3512_v4 = vpop.f32.mrf.mxu0 }
 0x120   : > { %v3514_v5 = vpop.f32.mrf.mxu0 }
 0x121   : > { %v721_v6 = vadd.f32 %v3514_v5, %v3512_v4 }
 0x122   : > { %v3518_v7 = vpop.f32.mrf.mxu0 }
 0x123   : > { %722 = vadd.xlane.f32.xlu0 %v721_v6  ;;  %v786_v6 = vld [vmem:[%s5206_s4 + $0x10] sm:$0xff] }
 0x124   : > { %v3520_v8 = vpop.f32.mrf.mxu0  ;;  %889 = vmatpush1.msra.mxu1 %v786_v6  ;;  %v981_v6 = vld [vmem:[%s5208_s6 + $0x160] sm:$0xff] }
 0x125   : > { %v724_v9 = vadd.f32 %v3520_v8, %v3518_v7  ;;  %890 = vmatprep.subr.mxu1 %v785_v10  ;;  %v980_v10 = vld [vmem:[%s5208_s6 + $0x158] sm:$0xff] }
 0x126   : > { %891 = vmatpush1.msra.mxu1 %v784_v12  ;;  %v979_v12 = vld [vmem:[%s5208_s6 + $0x150] sm:$0xff] }
 0x127   : > { %725 = vadd.xlane.f32.xlu0 %v724_v9  ;;  %v939_v9 = vld [vmem:[%s5208_s6 + $0x10] sm:$0xff]  ;;  %892 = vmatprep.subr.mxu1 %v847_v14  ;;  %v978_v14 = vld [vmem:[%s5208_s6 + $0x148] sm:$0xff] }
 0x128   : > { %1042 = vmatpush1.msra.mxu0 %v939_v9  ;;  %893 = vmatpush2.msra.mxu1 %v846_v16  ;;  %v826_v9 = vld [vmem:[%s5206_s4 + $0x150] sm:$0xff]  ;;  %v977_v16 = vld [vmem:[%s5208_s6 + $0x140] sm:$0xff] }
 0x129   : > { %1043 = vmatprep.subr.mxu0 %v938_v11  ;;  %894 = vmatprep.subr.mxu1 %v845_v18  ;;  %v825_v11 = vld [vmem:[%s5206_s4 + $0x148] sm:$0xff]  ;;  %v976_v18 = vld [vmem:[%s5208_s6 + $0x138] sm:$0xff] }
 0x12a   : > { %1044 = vmatpush1.msra.mxu0 %v937_v13  ;;  %895 = vmatpush2.msra.mxu1 %v844_v20  ;;  %v824_v13 = vld [vmem:[%s5206_s4 + $0x140] sm:$0xff]  ;;  %v975_v20 = vld [vmem:[%s5208_s6 + $0x130] sm:$0xff] }
 0x12b   : > { %1045 = vmatprep.subr.mxu0 %v1000_v15  ;;  %896 = vmatprep.subr.mxu1 %v843_v22  ;;  %v823_v15 = vld [vmem:[%s5206_s4 + $0x138] sm:$0xff]  ;;  %v974_v22 = vld [vmem:[%s5208_s6 + $0x128] sm:$0xff] }
 0x12c   : > { %1046 = vmatpush2.msra.mxu0 %v999_v17  ;;  %897 = vmatpush2.msra.mxu1 %v842_v24  ;;  %v822_v17 = vld [vmem:[%s5206_s4 + $0x130] sm:$0xff]  ;;  %v973_v24 = vld [vmem:[%s5208_s6 + $0x120] sm:$0xff] }
 0x12d   : > { %1047 = vmatprep.subr.mxu0 %v998_v19  ;;  %898 = vmatprep.subr.mxu1 %v841_v26  ;;  %v821_v19 = vld [vmem:[%s5206_s4 + $0x128] sm:$0xff]  ;;  %v972_v26 = vld [vmem:[%s5208_s6 + $0x118] sm:$0xff] }
 0x12e   : > { %1048 = vmatpush2.msra.mxu0 %v997_v21  ;;  %899 = vmatpush2.msra.mxu1 %v840_v28  ;;  %v820_v21 = vld [vmem:[%s5206_s4 + $0x120] sm:$0xff]  ;;  %v971_v28 = vld [vmem:[%s5208_s6 + $0x110] sm:$0xff] }
 0x12f   : > { %1049 = vmatprep.subr.mxu0 %v996_v23  ;;  %900 = vmatprep.subr.mxu1 %v839_v43  ;;  %v819_v23 = vld [vmem:[%s5206_s4 + $0x118] sm:$0xff] }
 0x130   : > { %1050 = vmatpush2.msra.mxu0 %v995_v25  ;;  %901 = vmatpush2.msra.mxu1 %v838_v45  ;;  %v818_v25 = vld [vmem:[%s5206_s4 + $0x110] sm:$0xff] }
 0x131   : > { %1051 = vmatprep.subr.mxu0 %v994_v27  ;;  %902 = vmatprep.subr.mxu1 %v837_v47  ;;  %v817_v27 = vld [vmem:[%s5206_s4 + $0x108] sm:$0xff]  ;;  %v719_v47 = vld [vmem:[%s5244_s21] sm:$0x3]  ;;  %s566_s21 = sand.u32 1, %s3152_s28  }
 0x132   : > { %1052 = vmatpush2.msra.mxu0 %v993_v44  ;;  %903 = vmatpush2.msra.mxu1 %v836_v49  ;;  %s5162_s0 = scalar_lea.sflag [#allocation4], %s566_s21 }
 0x133   : > { %1053 = vmatprep.subr.mxu0 %v992_v46  ;;  %904 = vmatprep.subr.mxu1 %v835_v51 }
 0x134   : > { %1054 = vmatpush2.msra.mxu0 %v991_v48  ;;  %905 = vmatpush2.msra.mxu1 %v834_v53  ;;  %v720_v48 = vld [vmem:[%s5245_s3] sm:$0x3] }
 0x135   : > { %1055 = vmatprep.subr.mxu0 %v990_v50  ;;  %906 = vmatprep.subr.mxu1 %v833_v55 }
 0x136   : > { %1056 = vmatpush2.msra.mxu0 %v989_v52  ;;  %907 = vmatpush2.msra.mxu1 %v832_v57 }
 0x137   : > { %1057 = vmatprep.subr.mxu0 %v988_v54  ;;  %908 = vmatprep.subr.mxu1 %v831_v59 }
 0x138   : > { %1058 = vmatpush2.msra.mxu0 %v987_v56  ;;  %909 = vmatpush2.msra.mxu1 %v830_v61 }
 0x139   : > { %1059 = vmatprep.subr.mxu0 %v986_v58  ;;  %910 = vmatprep.subr.mxu1 %v829_v63 }
 0x13a   : > { %1060 = vmatpush2.msra.mxu0 %v985_v60  ;;  %911 = vmatpush2.msra.mxu1 %v828_v1  ;;  %v1117_v1 = vld [vmem:[%s5210_s8 + $0xd8] sm:$0xff] }
 0x13b   : > { %1061 = vmatprep.subr.mxu0 %v984_v62  ;;  %912 = vmatprep.subr.mxu1 %v827_v3  ;;  %v1116_v3 = vld [vmem:[%s5210_s8 + $0xd0] sm:$0xff] }
 0x13c   : > { %1062 = vmatpush2.msra.mxu0 %v983_v0  ;;  %913 = vmatpush2.msra.mxu1 %v826_v9  ;;  %v1114_v9 = vld [vmem:[%s5210_s8 + $0xc0] sm:$0xff] }
 0x13d   : > { %1063 = vmatprep.subr.mxu0 %v982_v2  ;;  %914 = vmatprep.subr.mxu1 %v825_v11  ;;  %v1112_v11 = vld [vmem:[%s5210_s8 + $0xb0] sm:$0xff] }
 0x13e   : > { %1064 = vmatpush2.msra.mxu0 %v981_v6  ;;  %915 = vmatpush2.msra.mxu1 %v824_v13  ;;  %v1115_v6 = vld [vmem:[%s5210_s8 + $0xc8] sm:$0xff]  ;;  %v1110_v13 = vld [vmem:[%s5210_s8 + $0xa0] sm:$0xff] }
 0x13f   : > { %1065 = vmatprep.subr.mxu0 %v980_v10  ;;  %916 = vmatprep.subr.mxu1 %v823_v15  ;;  %v1113_v10 = vld [vmem:[%s5210_s8 + $0xb8] sm:$0xff]  ;;  %v1108_v15 = vld [vmem:[%s5210_s8 + $0x90] sm:$0xff] }
 0x140   : > { %1066 = vmatpush2.msra.mxu0 %v979_v12  ;;  %917 = vmatpush2.msra.mxu1 %v822_v17  ;;  %v1111_v12 = vld [vmem:[%s5210_s8 + $0xa8] sm:$0xff]  ;;  %v1106_v17 = vld [vmem:[%s5210_s8 + $0x80] sm:$0xff] }
 0x141   : > { %1067 = vmatprep.subr.mxu0 %v978_v14  ;;  %918 = vmatprep.subr.mxu1 %v821_v19  ;;  %v1109_v14 = vld [vmem:[%s5210_s8 + $0x98] sm:$0xff]  ;;  %v1104_v19 = vld [vmem:[%s5210_s8 + $0x70] sm:$0xff] }
 0x142   : > { %1068 = vmatpush2.msra.mxu0 %v977_v16  ;;  %919 = vmatpush2.msra.mxu1 %v820_v21  ;;  %v1107_v16 = vld [vmem:[%s5210_s8 + $0x88] sm:$0xff]  ;;  %v1102_v21 = vld [vmem:[%s5210_s8 + $0x60] sm:$0xff] }
 0x143   : > { %1069 = vmatprep.subr.mxu0 %v976_v18  ;;  %920 = vmatprep.subr.mxu1 %v819_v23  ;;  %v1105_v18 = vld [vmem:[%s5210_s8 + $0x78] sm:$0xff]  ;;  %v1100_v23 = vld [vmem:[%s5210_s8 + $0x50] sm:$0xff] }
 0x144   : > { %1070 = vmatpush2.msra.mxu0 %v975_v20  ;;  %921 = vmatpush2.msra.mxu1 %v818_v25  ;;  %v1103_v20 = vld [vmem:[%s5210_s8 + $0x68] sm:$0xff]  ;;  %v1098_v25 = vld [vmem:[%s5210_s8 + $0x40] sm:$0xff] }
 0x145   : > { %1071 = vmatprep.subr.mxu0 %v974_v22  ;;  %922 = vmatprep.subr.mxu1 %v817_v27  ;;  %v1101_v22 = vld [vmem:[%s5210_s8 + $0x58] sm:$0xff]  ;;  %v1096_v27 = vld [vmem:[%s5210_s8 + $0x30] sm:$0xff] }
 0x146   : > { %1072 = vmatpush2.msra.mxu0 %v973_v24  ;;  %v1099_v24 = vld [vmem:[%s5210_s8 + $0x48] sm:$0xff] }
 0x147   : > { %1073 = vmatprep.subr.mxu0 %v972_v26  ;;  %v1097_v26 = vld [vmem:[%s5210_s8 + $0x38] sm:$0xff] }
 0x148   : > { %1074 = vmatpush2.msra.mxu0 %v971_v28  ;;  %v1095_v28 = vld [vmem:[%s5210_s8 + $0x28] sm:$0xff] }
 0x1ac   : > { %v723_v29 = vpop.xlane.xlu0 %722 }
 0x1ad   : > { %v728_v30 = vmul.f32 0.00390625, %v723_v29  ;;  %v816_v29 = vld [vmem:[%s5206_s4 + $0x100] sm:$0xff] }
 0x1ae   : > { %923 = vmatpush2.msra.mxu1 %v816_v29  ;;  %v1094_v29 = vld [vmem:[%s5210_s8 + $0x20] sm:$0xff] }
 0x1af   : > { %v3762_v31 = vsub.f32 %v3512_v4, %v728_v30  ;;  %v3765_v32 = vsub.f32 %v3514_v5, %v728_v30  ;;  %v970_v30 = vld [vmem:[%s5208_s6 + $0x108] sm:$0xff] }
 0x1b0   : > { %v726_v33 = vpop.xlane.xlu0 %725  ;;  %1075 = vmatprep.subr.mxu0 %v970_v30  ;;  %v1093_v30 = vld [vmem:[%s5210_s8 + $0x18] sm:$0xff] }
 0x1b1   : > { %v729_v34 = vmul.f32 0.00390625, %v726_v33  ;;  %v734_v35 = vmul.f32 %v3762_v31, %v3762_v31  ;;  %v735_v36 = vmul.f32 %v3765_v32, %v3765_v32  ;;  %v969_v33 = vld [vmem:[%s5208_s6 + $0x100] sm:$0xff] }
 0x1b2   : > { %1076 = vmatpush2.msra.mxu0 %v969_v33  ;;  %v1092_v33 = vld [vmem:[%s5210_s8 + $0x10] sm:$0xff] }
 0x1b3   : > { %v3772_v37 = vsub.f32 %v3518_v7, %v729_v34  ;;  %v3775_v38 = vsub.f32 %v3520_v8, %v729_v34  ;;  %v738_v39 = vadd.f32 %v735_v36, %v734_v35  ;;  %v1121_v34 = vld [vmem:[%s5210_s8 + $0xf8] sm:$0xff] }
 0x1b4   : > { %1166 = vmatprep.subr.mxu1 %v1121_v34  ;;  %v1091_v34 = vld [vmem:[%s5210_s8 + $0x8] sm:$0xff] }
 0x1b5   : > { %739 = vadd.xlane.f32.xlu1 %v738_v39  ;;  %v736_v40 = vmul.f32 %v3772_v37, %v3772_v37  ;;  %v737_v41 = vmul.f32 %v3775_v38, %v3775_v38 }
 0x1b7   : > { %v741_v42 = vadd.f32 %v737_v41, %v736_v40 }
 0x1b9   : > { %742 = vadd.xlane.f32.xlu1 %v741_v42  ;;  %v755_v42 = vlaneseq }
 0x1bb   : > { %v3931_v44 = vshrl.u32 %v755_v42, 7  ;;  %v1149_v42 = vld [vmem:[%s5210_s8 + $0x1d8] sm:$0xff] }
 0x1bd   : > { %v3934_v45 = vsub.s32 1, %v3931_v44  ;;  %v3937_v46 = vsub.s32 0, %v3931_v44 }
 0x1bf   : > { %v762_v49 = vrot.slane %v719_v47, %v3934_v45  ;;  %v758_v50 = vrot.slane %v719_v47, %v3937_v46  ;;  %v777_v53 = vrot.slane %v720_v48, %v3934_v45  ;;  %v773_v55 = vrot.slane %v720_v48, %v3937_v46  ;;  %v1147_v47 = vld [vmem:[%s5210_s8 + $0x1c8] sm:$0xff]  ;;  %v1146_v48 = vld [vmem:[%s5210_s8 + $0x1c0] sm:$0xff] }
 0x23e   : > { %v740_v35 = vpop.xlane.xlu1 %739 }
 0x23f   : > { %v744_v36 = vmul.f32 0.00390625, %v740_v35  ;;  %v1090_v35 = vld [vmem:[%s5210_s8] sm:$0xff] }
 0x241   : > { %v746_v39 = vadd.f32 1e-05, %v744_v36  ;;  %v1153_v36 = vld [vmem:[%s5210_s8 + $0x1f8] sm:$0xff] }
 0x242   : > { %v743_v40 = vpop.xlane.xlu1 %742 }
 0x243   : > { %3056 = vrsqrt.f32 %v746_v39  ;;  %v745_v41 = vmul.f32 0.00390625, %v743_v40  ;;  %v1152_v39 = vld [vmem:[%s5210_s8 + $0x1f0] sm:$0xff]  ;;  %v1151_v40 = vld [vmem:[%s5210_s8 + $0x1e8] sm:$0xff] }
 0x245   : > { %v747_v43 = vadd.f32 1e-05, %v745_v41  ;;  %v1150_v41 = vld [vmem:[%s5210_s8 + $0x1e0] sm:$0xff] }
 0x247   : > { %3058 = vrsqrt.f32 %v747_v43  ;;  %v1148_v43 = vld [vmem:[%s5210_s8 + $0x1d0] sm:$0xff] }
 0x250   : > { %v3057_v51 = vpop.eup %3056 }
 0x251   : > { %v751_v52 = vmul.f32 %v3057_v51, %v3765_v32  ;;  %v750_v54 = vmul.f32 %v3057_v51, %v3762_v31  ;;  %v1120_v32 = vld [vmem:[%s5210_s8 + $0xf0] sm:$0xff]  ;;  %v1119_v31 = vld [vmem:[%s5210_s8 + $0xe8] sm:$0xff] }
 0x252   : > { %v1143_v51 = vld [vmem:[%s5210_s8 + $0x1a8] sm:$0xff] }
 0x253   : > { %v766_v56 = vmul.f32 %v762_v49, %v751_v52  ;;  %v765_v57 = vmul.f32 %v758_v50, %v750_v54  ;;  %v1142_v52 = vld [vmem:[%s5210_s8 + $0x1a0] sm:$0xff]  ;;  %v1140_v54 = vld [vmem:[%s5210_s8 + $0x190] sm:$0xff] }
 0x254   : > { %v3059_v58 = vpop.eup %3058 }
 0x255   : > { %v781_v59 = vadd.f32 %v777_v53, %v766_v56  ;;  %v3951_v60 = vadd.f32 %v773_v55, %v765_v57  ;;  %v753_v61 = vmul.f32 %v3059_v58, %v3775_v38  ;;  %v752_v62 = vmul.f32 %v3059_v58, %v3772_v37  ;;  %v1118_v37 = vld [vmem:[%s5210_s8 + $0xe0] sm:$0xff]  ;;  %v1137_v57 = vld [vmem:[%s5210_s8 + $0x178] sm:$0xff]  ;;  %v1136_v58 = vld [vmem:[%s5210_s8 + $0x170] sm:$0xff] }
 0x256   : > { %v1138_v56 = vld [vmem:[%s5210_s8 + $0x180] sm:$0xff] }
 0x257   : > { %924 = vmatprep.mubr.f32.mxu1 %v781_v59  ;;  %1077 = vmatprep.mubr.f32.mxu0 %v781_v59  ;;  %v768_v63 = vmul.f32 %v762_v49, %v753_v61  ;;  %v767_v0 = vmul.f32 %v758_v50, %v752_v62  ;;  %v1145_v49 = vld [vmem:[%s5210_s8 + $0x1b8] sm:$0xff]  ;;  %v1144_v50 = vld [vmem:[%s5210_s8 + $0x1b0] sm:$0xff]  ;;  %v1134_v61 = vld [vmem:[%s5210_s8 + $0x160] sm:$0xff] }
 0x258   : > { %925 = vmatmul.mubr.f32.vlgmr.msra.gmra.mxu1 %v3951_v60  ;;  %1078 = vmatmul.mubr.f32.vlgmr.msra.gmra.mxu0 %v3951_v60  ;;  %v1133_v62 = vld [vmem:[%s5210_s8 + $0x158] sm:$0xff] }
 0x259   : > { %1167 = vmatpush1.msra.mxu1 %v1120_v32  ;;  %v3966_v38 = vadd.f32 %v777_v53, %v768_v63  ;;  %v3971_v2 = vadd.f32 %v773_v55, %v767_v0  ;;  %v1141_v53 = vld [vmem:[%s5210_s8 + $0x198] sm:$0xff]  ;;  %v1139_v55 = vld [vmem:[%s5210_s8 + $0x188] sm:$0xff]  ;;  %v1132_v32 = vld [vmem:[%s5210_s8 + $0x150] sm:$0xff] }
 0x25a   : > { %1168 = vmatprep.subr.mxu1 %v1119_v31  ;;  %v1131_v31 = vld [vmem:[%s5210_s8 + $0x148] sm:$0xff]  ;;  %v1130_v63 = vld [vmem:[%s5210_s8 + $0x140] sm:$0xff]  ;;  %v1129_v0 = vld [vmem:[%s5210_s8 + $0x138] sm:$0xff] }
 0x25b   : > { %1169 = vmatpush1.msra.mxu1 %v1118_v37  ;;  %930 = vmatprep.mubr.f32.mxu1 %v3966_v38  ;;  %v1128_v37 = vld [vmem:[%s5210_s8 + $0x130] sm:$0xff] }
 0x25c   : > { %1083 = vmatprep.mubr.f32.mxu0 %v3966_v38  ;;  %1170 = vmatprep.subr.mxu1 %v1117_v1  ;;  %v1127_v1 = vld [vmem:[%s5210_s8 + $0x128] sm:$0xff] }
 0x25d   : > { %931 = vmatmul.mubr.f32.gmra.mxu1 %v3971_v2  ;;  %1084 = vmatmul.mubr.f32.gmra.mxu0 %v3971_v2 }
 0x25e   : > { %1171 = vmatpush1.msra.mxu1 %v1116_v3  ;;  %1230 = vmatprep.mubr.f32.mxu1 %v781_v59  ;;  %v1135_v59 = vld [vmem:[%s5210_s8 + $0x168] sm:$0xff]  ;;  %v1126_v3 = vld [vmem:[%s5210_s8 + $0x120] sm:$0xff] }
 0x25f   : > { %1172 = vmatprep.subr.mxu1 %v1115_v6  ;;  %v1125_v6 = vld [vmem:[%s5210_s8 + $0x118] sm:$0xff] }
 0x260   : > { %1173 = vmatpush1.msra.mxu1 %v1114_v9  ;;  %v1124_v9 = vld [vmem:[%s5210_s8 + $0x110] sm:$0xff] }
 0x261   : > { %1174 = vmatprep.subr.mxu1 %v1113_v10  ;;  %v1123_v10 = vld [vmem:[%s5210_s8 + $0x108] sm:$0xff] }
 0x262   : > { %1175 = vmatpush1.msra.mxu1 %v1112_v11  ;;  %v1122_v11 = vld [vmem:[%s5210_s8 + $0x100] sm:$0xff] }
 0x263   : > { %1176 = vmatprep.subr.mxu1 %v1111_v12  ;;  %v4160_v12 = vld [vmem:[%s5207_s5] sm:$0x3] }
 0x264   : > { %1177 = vmatpush1.msra.mxu1 %v1110_v13  ;;  %v1001_v13 = vld [vmem:[%s5209_s7] sm:$0x3] }
 0x265   : > { %1178 = vmatprep.subr.mxu1 %v1109_v14  ;;  %v853_v14 = vrot.slane %v4160_v12, %v3937_v46 }
 0x266   : > { %1179 = vmatpush1.msra.mxu1 %v1108_v15  ;;  %v1006_v15 = vrot.slane %v1001_v13, %v3937_v46 }
 0x267   : > { %1180 = vmatprep.subr.mxu1 %v1107_v16 }
 0x268   : > { %1181 = vmatpush1.msra.mxu1 %v1106_v17 }
 0x269   : > { %1182 = vmatprep.subr.mxu1 %v1105_v18 }
 0x26a   : > { %1183 = vmatpush1.msra.mxu1 %v1104_v19 }
 0x26b   : > { %1184 = vmatprep.subr.mxu1 %v1103_v20 }
 0x26c   : > { %1185 = vmatpush1.msra.mxu1 %v1102_v21 }
 0x26d   : > { %1186 = vmatprep.subr.mxu1 %v1101_v22 }
 0x26e   : > { %1187 = vmatpush1.msra.mxu1 %v1100_v23 }
 0x26f   : > { %1188 = vmatprep.subr.mxu1 %v1099_v24 }
 0x270   : > { %1189 = vmatpush1.msra.mxu1 %v1098_v25 }
 0x271   : > { %1190 = vmatprep.subr.mxu1 %v1097_v26  ;;  %v1154_v26 = vld [vmem:[%s5211_s9] sm:$0x3] }
 0x272   : > { %1191 = vmatpush1.msra.mxu1 %v1096_v27 }
 0x273   : > { %1192 = vmatprep.subr.mxu1 %v1095_v28 }
 0x274   : > { %1193 = vmatpush1.msra.mxu1 %v1094_v29  ;;  %v1159_v29 = vrot.slane %v1154_v26, %v3937_v46 }
 0x275   : > { %1194 = vmatprep.subr.mxu1 %v1093_v30 }
 0x276   : > { %1195 = vmatpush1.msra.mxu1 %v1092_v33 }
 0x277   : > { %1196 = vmatprep.subr.mxu1 %v1091_v34 }
 0x278   : > { %1197 = vmatpush1.msra.mxu1 %v1090_v35 }
 0x279   : > { %1198 = vmatprep.subr.mxu1 %v1153_v36 }
 0x27a   : > { %1199 = vmatpush2.msra.mxu1 %v1152_v39 }
 0x27b   : > { %1200 = vmatprep.subr.mxu1 %v1151_v40 }
 0x27c   : > { %1201 = vmatpush2.msra.mxu1 %v1150_v41  ;;  %v1163_v41 = vrot.slane %v1154_v26, %v3934_v45 }
 0x27d   : > { %1202 = vmatprep.subr.mxu1 %v1149_v42 }
 0x27e   : > { %1203 = vmatpush2.msra.mxu1 %v1148_v43 }
 0x27f   : > { %1204 = vmatprep.subr.mxu1 %v1147_v47 }
 0x280   : > { %1205 = vmatpush2.msra.mxu1 %v1146_v48 }
 0x281   : > { %1206 = vmatprep.subr.mxu1 %v1145_v49 }
 0x282   : > { %1207 = vmatpush2.msra.mxu1 %v1144_v50 }
 0x283   : > { %1208 = vmatprep.subr.mxu1 %v1143_v51 }
 0x284   : > { %1209 = vmatpush2.msra.mxu1 %v1142_v52 }
 0x285   : > { %1210 = vmatprep.subr.mxu1 %v1141_v53 }
 0x286   : > { %1211 = vmatpush2.msra.mxu1 %v1140_v54 }
 0x287   : > { %1212 = vmatprep.subr.mxu1 %v1139_v55 }
 0x288   : > { %1213 = vmatpush2.msra.mxu1 %v1138_v56 }
 0x289   : > { %1214 = vmatprep.subr.mxu1 %v1137_v57 }
 0x28a   : > { %1215 = vmatpush2.msra.mxu1 %v1136_v58 }
 0x28b   : > { %1216 = vmatprep.subr.mxu1 %v1135_v59 }
 0x28c   : > { %1217 = vmatpush2.msra.mxu1 %v1134_v61 }
 0x28d   : > { %1218 = vmatprep.subr.mxu1 %v1133_v62 }
 0x28e   : > { %1219 = vmatpush2.msra.mxu1 %v1132_v32 }
 0x28f   : > { %1220 = vmatprep.subr.mxu1 %v1131_v31 }
 0x290   : > { %1221 = vmatpush2.msra.mxu1 %v1130_v63 }
 0x291   : > { %1222 = vmatprep.subr.mxu1 %v1129_v0 }
 0x292   : > { %1223 = vmatpush2.msra.mxu1 %v1128_v37 }
 0x293   : > { %1224 = vmatprep.subr.mxu1 %v1127_v1 }
 0x294   : > { %1225 = vmatpush2.msra.mxu1 %v1126_v3 }
 0x295   : > { %1226 = vmatprep.subr.mxu1 %v1125_v6 }
 0x296   : > { %1227 = vmatpush2.msra.mxu1 %v1124_v9 }
 0x297   : > { %1228 = vmatprep.subr.mxu1 %v1123_v10 }
 0x298   : > { %1229 = vmatpush2.msra.mxu1 %v1122_v11 }
 0x299   : > { %1231 = vmatmul.mubr.f32.vlgmr.msra.gmra.mxu1 %v3951_v60  ;;  %v4169_v60 = vrot.slane %v1001_v13, %v3934_v45 }
 0x29a   : > { %1236 = vmatprep.mubr.f32.mxu1 %v3966_v38 }
 0x29d   : > { %1237 = vmatmul.mubr.f32.gmra.mxu1 %v3971_v2 }
 0x318   : > { %v926_v38 = vpop.f32.mrf.mxu1  ;;  %v1079_v16 = vpop.f32.mrf.mxu0 }
 0x319   : > { %v927_v2 = vadd.f32 %v926_v38, %v853_v14  ;;  %v1080_v17 = vadd.f32 %v1079_v16, %v1006_v15 }
 0x31a   : > { %v4171_v18 = vpop.f32.mrf.mxu1  ;;  %v1081_v19 = vpop.f32.mrf.mxu0 }
 0x31b   : > { %v4174_v20 = vadd.f32 %v1081_v19, %v4169_v60  ;;  %1443 = vrot.lane.b32.xlu1 %v1080_v17, %s3162_s18  ;;  %2962 = vmatprep.mubr.msk.f32.mxu0 %vm1243_vm0, %v927_v2 }
 0x31d   : > { %v1085_v21 = vpop.f32.mrf.mxu0  ;;  %v932_v22 = vpop.f32.mrf.mxu1 }
 0x31e   : > { %v1086_v23 = vadd.f32 %v1085_v21, %v1006_v15  ;;  %v933_v24 = vadd.f32 %v932_v22, %v853_v14 }
 0x31f   : > { %1439 = vrot.lane.b32.xlu1 %v927_v2, %s3162_s18  ;;  %v4186_v25 = vpop.f32.mrf.mxu1  ;;  %v4215_v48 = vpop.f32.mrf.mxu0 }
 0x320   : > { %1445 = vrot.lane.b32.xlu0 %v1086_v23, %s3162_s18  ;;  %2958 = vmatprep.subr.msk.mxu0 %vm1243_vm0, %v1086_v23 }
 0x321   : > { %2959 = vmatpush3.xpose.msk.msra.mxu0 %vm1243_vm0, %v1086_v23 }
 0x322   : > { %2960 = vmatprep.subr.msk.mxu0 %vm1243_vm0, %v1080_v17 }
 0x323   : > { %1441 = vrot.lane.b32.xlu1 %v933_v24, %s3162_s18 }
 0x325   : > { %2961 = vmatpush3.xpose.msk.msra.mxu0 %vm1243_vm0, %v1080_v17 }
 0x328   : > { %2963 = vmatmul.mubr.msk.f32.vlgmr.msra.gmra.mxu0 %vm1243_vm0, %v933_v24 }
 0x359   : > { %v1232_v27 = vpop.f32.mrf.mxu1 }
 0x35a   : > { %v4194_v34 = vadd.f32 %v1232_v27, %v1159_v29 }
 0x35b   : > { %v1234_v28 = vpop.f32.mrf.mxu1 }
 0x35c   : > { %v4209_v47 = vadd.f32 %v1234_v28, %v1163_v41 }
 0x35d   : > { %v1238_v30 = vpop.f32.mrf.mxu1 }
 0x35e   : > { %v4192_v33 = vadd.f32 %v1238_v30, %v1159_v29 }
 0x35f   : > { %v1240_v40 = vpop.f32.mrf.mxu1 }
 0x360   : > { %2965 = vmatprep.subr.mxu1 %v4192_v33  ;;  %v4205_v42 = vadd.f32 %v1240_v40, %v1163_v41 }
 0x361   : > { %2966 = vmatpush3.msra.mxu1 %v4192_v33 }
 0x362   : > { %2967 = vmatprep.subr.mxu1 %v4194_v34 }
 0x363   : > { %2968 = vmatpush3.msra.mxu1 %v4194_v34 }
 0x38d   : > { %v1444_v35 = vpop.permute.xlu1 %1443 }
 0x391   : > { %v1440_v36 = vpop.permute.xlu1 %1439 }
 0x392   : > { %v1446_v39 = vpop.permute.xlu0 %1445  ;;  %2976 = vmatprep.mubr.msk.f32.mxu0 %vm1243_vm0, %v1440_v36 }
 0x393   : > { %2972 = vmatprep.subr.msk.mxu0 %vm1243_vm0, %v1446_v39 }
 0x394   : > { %2973 = vmatpush3.xpose.msk.msra.mxu0 %vm1243_vm0, %v1446_v39  ;;  %v857_v39 = vrot.slane %v4160_v12, %v3934_v45 }
 0x395   : > { %2974 = vmatprep.subr.msk.mxu0 %vm1243_vm0, %v1444_v35  ;;  %v1442_v43 = vpop.permute.xlu1 %1441 }
 0x396   : > { %v935_v12 = vadd.f32 %v4186_v25, %v857_v39 }
 0x398   : > { %2975 = vmatpush3.xpose.msk.msra.mxu0 %vm1243_vm0, %v1444_v35 }
 0x399   : > { %2993 = vmatprep.subr.mxu0 %v4205_v42 }
 0x39b   : > { %2977 = vmatmul.mubr.msk.f32.vlgmr.msra.gmra.mxu0 %vm1243_vm0, %v1442_v43  ;;  %v929_v43 = vadd.f32 %v4171_v18, %v857_v39 }
 0x39c   : > { %2994 = vmatpush3.msra.mxu0 %v4205_v42 }
 0x39d   : > { %2995 = vmatprep.subr.mxu0 %v4209_v47 }
 0x39e   : > { %2996 = vmatpush3.msra.mxu0 %v4209_v47 }
 0x3e8   : > { %v2964_v49 = vpop.f32.mrf.mxu0 }
 0x3e9   : > { %v1332_v50 = vmul.f32 0.125, %v2964_v49 }
 0x3ea   : > { %v1322_v51 = vpop.f32.mrf.mxu0 }
 0x3eb   : > { %v1331_v52 = vmul.f32 0.125, %v1322_v51  ;;  %v1337_v53 = vsel %vm1333_vm1, %v1332_v50, -inf }
 0x3ec   : > { %1338 = vmax.xlane.f32.xlu1 %v1337_v53 }
 0x3ed   : > { %v1334_v54 = vsel %vm1333_vm1, %v1331_v52, -inf }
 0x3ee   : > { %1335 = vmax.xlane.f32.xlu0 %v1334_v54 }
 0x45b   : > { %v2978_v55 = vpop.f32.mrf.mxu0 }
 0x45c   : > { %v1531_v58 = vmul.f32 0.125, %v2978_v55 }
 0x45d   : > { %v1521_v56 = vpop.f32.mrf.mxu0 }
 0x45e   : > { %v1530_v57 = vmul.f32 0.125, %v1521_v56  ;;  %v1535_v61 = vsel %vm1333_vm1, %v1531_v58, -inf }
 0x460   : > { %v1532_v59 = vsel %vm1333_vm1, %v1530_v57, -inf }
 0x461   : > { %1533 = vmax.xlane.f32.xlu0 %v1532_v59 }
 0x465   : > { %1536 = vmax.xlane.f32.xlu0 %v1535_v61 }
 0x475   : > { %v1339_v62 = vpop.xlane.xlu1 %1338 }
 0x476   : > { %v1341_v32 = vsub.f32 %v1332_v50, %v1339_v62 }
 0x477   : > { %v1336_v31 = vpop.xlane.xlu0 %1335 }
 0x478   : > { %v1344_v63 = vmul.f32 1.442695, %v1341_v32  ;;  %v1340_v0 = vsub.f32 %v1331_v52, %v1336_v31 }
 0x47a   : > { %3060 = vpow2.f32 %v1344_v63  ;;  %v1342_v37 = vmul.f32 1.442695, %v1340_v0 }
 0x47c   : > { %3062 = vpow2.f32 %v1342_v37 }
 0x487   : > { %v3061_v1 = vpop.eup %3060 }
 0x488   : > { %v1349_v3 = vsel %vm1333_vm1, %v3061_v1, 0.0 }
 0x489   : > { %v3063_v6 = vpop.eup %3062  ;;  %1350 = vadd.xlane.f32.xlu1 %v1349_v3 }
 0x48a   : > { %v1346_v9 = vsel %vm1333_vm1, %v3063_v6, 0.0 }
 0x48b   : > { %1347 = vadd.xlane.f32.xlu0 %v1346_v9 }
 0x4ea   : > { %v1534_v10 = vpop.xlane.xlu0 %1533 }
 0x4eb   : > { %v1538_v11 = vsub.f32 %v1530_v57, %v1534_v10 }
 0x4ed   : > { %v1540_v13 = vmul.f32 1.442695, %v1538_v11 }
 0x4ee   : > { %v1537_v14 = vpop.xlane.xlu0 %1536 }
 0x4ef   : > { %3064 = vpow2.f32 %v1540_v13  ;;  %v1539_v15 = vsub.f32 %v1531_v58, %v1537_v14 }
 0x4f1   : > { %v1542_v38 = vmul.f32 1.442695, %v1539_v15 }
 0x4f3   : > { %3066 = vpow2.f32 %v1542_v38 }
 0x4fc   : > { %v3065_v16 = vpop.eup %3064 }
 0x4fd   : > { %v1544_v2 = vsel %vm1333_vm1, %v3065_v16, 0.0 }
 0x4fe   : > { %1545 = vadd.xlane.f32.xlu0 %v1544_v2 }
 0x500   : > { %v3067_v17 = vpop.eup %3066 }
 0x501   : > { %v1547_v19 = vsel %vm1333_vm1, %v3067_v17, 0.0 }
 0x502   : > { %1548 = vadd.xlane.f32.xlu1 %v1547_v19 }
 0x512   : > { %v1351_v21 = vpop.xlane.xlu1 %1350 }
 0x513   : > { %1556 = vrot.lane.b32.xlu1 %v4194_v34, %s3162_s18  ;;  %3068 = vrcp.f32 %v1351_v21 }
 0x514   : > { %1558 = vrot.lane.b32.xlu0 %v4192_v33, %s3162_s18  ;;  %v1348_v22 = vpop.xlane.xlu0 %1347  ;;  %v1088_v33 = vadd.f32 %v4215_v48, %v4169_v60 }
 0x515   : > { %3070 = vrcp.f32 %v1348_v22 }
 0x520   : > { %v3069_v23 = vpop.eup %3068 }
 0x521   : > { %v1355_v27 = vmul.f32 %v3069_v23, %v3061_v1 }
 0x522   : > { %v3071_v24 = vpop.eup %3070 }
 0x523   : > { %v1354_v26 = vmul.f32 %v3071_v24, %v3063_v6 }
 0x525   : > { %2969 = vmatprep.mubr.msk.f32.mxu1 %vm1333_vm1, %v1354_v26 }
 0x526   : > { %2970 = vmatmul.mubr.msk.f32.vlgmr.msra.gmra.mxu1 %vm1333_vm1, %v1355_v27 }
 0x587   : > { %v1546_v28 = vpop.xlane.xlu0 %1545 }
 0x588   : > { %3072 = vrcp.f32 %v1546_v28 }
 0x58b   : > { %v1559_v29 = vpop.permute.xlu0 %1558  ;;  %v1549_v30 = vpop.xlane.xlu1 %1548 }
 0x58c   : > { %3074 = vrcp.f32 %v1549_v30  ;;  %2979 = vmatprep.subr.mxu1 %v1559_v29 }
 0x58d   : > { %2980 = vmatpush3.msra.mxu1 %v1559_v29 }
 0x58f   : > { %v1557_v34 = vpop.permute.xlu1 %1556 }
 0x590   : > { %2981 = vmatprep.subr.mxu1 %v1557_v34 }
 0x591   : > { %2982 = vmatpush3.msra.mxu1 %v1557_v34 }
 0x592   : > { %2986 = vmatprep.subr.msk.mxu1 %vm1243_vm0, %v1088_v33 }
 0x595   : > { %v3073_v35 = vpop.eup %3072 }
 0x596   : > { %v1552_v36 = vmul.f32 %v3073_v35, %v3065_v16 }
 0x598   : > { %2983 = vmatprep.mubr.msk.f32.mxu1 %vm1333_vm1, %v1552_v36 }
 0x599   : > { %v3075_v40 = vpop.eup %3074 }
 0x59a   : > { %v1553_v41 = vmul.f32 %v3075_v40, %v3067_v17 }
 0x59c   : > { %2984 = vmatmul.mubr.msk.f32.vlgmr.msra.gmra.mxu1 %vm1333_vm1, %v1553_v41 }
 0x59d   : > { %2987 = vmatpush3.xpose.msk.msra.mxu1 %vm1243_vm0, %v1088_v33  ;;  %2990 = vmatprep.mubr.msk.f32.mxu1 %vm1243_vm0, %v929_v43 }
 0x59e   : > { %2988 = vmatprep.subr.msk.mxu1 %vm1243_vm0, %v4174_v20 }
 0x5a1   : > { %2989 = vmatpush3.xpose.msk.msra.mxu1 %vm1243_vm0, %v4174_v20 }
 0x5a4   : > { %2991 = vmatmul.mubr.msk.f32.vlgmr.msra.gmra.mxu1 %vm1243_vm0, %v935_v12 }
 0x5e6   : > { %v2971_v60 = vpop.f32.mrf.mxu1 }
 0x5e7   : > { %1438 = vst.msk [vmem:[#allocation2 + $0x10] sm:$0xff] %vm1243_vm0, %v2971_v60 }
 0x5e8   : > { %v1428_v18 = vpop.f32.mrf.mxu1 }
 0x5e9   : > { %1437 = vst.msk [vmem:[#allocation2] sm:$0xff] %vm1243_vm0, %v1428_v18 }
 0x65c   : > { %v4249_v48 = vpop.f32.mrf.mxu1 }
 0x65e   : > { %v1634_v49 = vpop.f32.mrf.mxu1 }
 0x664   : > { %v2992_v50 = vpop.f32.mrf.mxu1 }
 0x665   : > { %v1742_v51 = vmul.f32 0.125, %v2992_v50 }
 0x666   : > { %v1732_v52 = vpop.f32.mrf.mxu1 }
 0x667   : > { %v1741_v53 = vmul.f32 0.125, %v1732_v52  ;;  %v1746_v54 = vsel %vm1333_vm1, %v1742_v51, -inf }
 0x668   : > { %1747 = vmax.xlane.f32.xlu0 %v1746_v54 }
 0x669   : > { %v1743_v25 = vsel %vm1333_vm1, %v1741_v53, -inf }
 0x66a   : > { %1744 = vmax.xlane.f32.xlu1 %v1743_v25 }
 0x6f1   : > { %v1748_v55 = vpop.xlane.xlu0 %1747 }
 0x6f2   : > { %v1750_v56 = vsub.f32 %v1742_v51, %v1748_v55 }
 0x6f3   : > { %v1745_v57 = vpop.xlane.xlu1 %1744 }
 0x6f4   : > { %v1753_v58 = vmul.f32 1.442695, %v1750_v56  ;;  %v1749_v59 = vsub.f32 %v1741_v53, %v1745_v57  ;;  %v2195_v56 = vld [vmem:[%s5214_s12 + $0x1e8] sm:$0xff]  ;;  %v2197_v57 = vld [vmem:[%s5214_s12 + $0x1f8] sm:$0xff] }
 0x6f6   : > { %3076 = vpow2.f32 %v1753_v58  ;;  %v1751_v61 = vmul.f32 1.442695, %v1749_v59  ;;  %v2194_v58 = vld [vmem:[%s5214_s12 + $0x1e0] sm:$0xff]  ;;  %v2196_v59 = vld [vmem:[%s5214_s12 + $0x1f0] sm:$0xff] }
 0x6f8   : > { %3078 = vpow2.f32 %v1751_v61  ;;  %v2191_v61 = vld [vmem:[%s5214_s12 + $0x1c8] sm:$0xff] }
 0x703   : > { %v3077_v62 = vpop.eup %3076 }
 0x704   : > { %v1758_v32 = vsel %vm1333_vm1, %v3077_v62, 0.0 }
 0x705   : > { %v3079_v31 = vpop.eup %3078  ;;  %1759 = vadd.xlane.f32.xlu1 %v1758_v32  ;;  %v2190_v32 = vld [vmem:[%s5214_s12 + $0x1c0] sm:$0xff] }
 0x706   : > { %v1755_v63 = vsel %vm1333_vm1, %v3079_v31, 0.0 }
 0x707   : > { %1756 = vadd.xlane.f32.xlu0 %v1755_v63  ;;  %v2187_v63 = vld [vmem:[%s5214_s12 + $0x1a8] sm:$0xff] }
 0x716   : > { %1852 = vrot.lane.b32.xlu1 %v4174_v20, %s3162_s18 }
 0x71a   : > { %1848 = vrot.lane.b32.xlu1 %v929_v43, %s3162_s18 }
 0x71d   : > { %1854 = vrot.lane.b32.xlu0 %v1088_v33, %s3162_s18 }
 0x71e   : > { %1850 = vrot.lane.b32.xlu1 %v935_v12, %s3162_s18 }
 0x78e   : > { %v1760_v0 = vpop.xlane.xlu1 %1759 }
 0x78f   : > { %3080 = vrcp.f32 %v1760_v0  ;;  %v2189_v0 = vld [vmem:[%s5214_s12 + $0x1b8] sm:$0xff] }
 0x790   : > { %v1757_v37 = vpop.xlane.xlu0 %1756 }
 0x791   : > { %3082 = vrcp.f32 %v1757_v37  ;;  %v2186_v37 = vld [vmem:[%s5214_s12 + $0x1a0] sm:$0xff] }
 0x792   : > { %v1853_v3 = vpop.permute.xlu1 %1852 }
 0x794   : > { %v1855_v1 = vpop.permute.xlu0 %1854 }
 0x795   : > { %3000 = vmatprep.subr.msk.mxu0 %vm1243_vm0, %v1855_v1 }
 0x796   : > { %v1849_v20 = vpop.permute.xlu1 %1848 }
 0x79a   : > { %v1851_v13 = vpop.permute.xlu1 %1850 }
 0x79c   : > { %v3081_v6 = vpop.eup %3080 }
 0x79d   : > { %v1764_v11 = vmul.f32 %v3081_v6, %v3077_v62  ;;  %v2193_v62 = vld [vmem:[%s5214_s12 + $0x1d8] sm:$0xff] }
 0x79e   : > { %v3083_v9 = vpop.eup %3082  ;;  %v2185_v6 = vld [vmem:[%s5214_s12 + $0x198] sm:$0xff] }
 0x79f   : > { %v1763_v10 = vmul.f32 %v3083_v9, %v3079_v31  ;;  %v2192_v31 = vld [vmem:[%s5214_s12 + $0x1d0] sm:$0xff]  ;;  %v2182_v9 = vld [vmem:[%s5214_s12 + $0x180] sm:$0xff] }
 0x7a1   : > { %2997 = vmatprep.mubr.msk.f32.mxu0 %vm1333_vm1, %v1763_v10  ;;  %v2184_v10 = vld [vmem:[%s5214_s12 + $0x190] sm:$0xff] }
 0x7a2   : > { %2998 = vmatmul.mubr.msk.f32.vlgmr.msra.gmra.mxu0 %vm1333_vm1, %v1764_v11  ;;  %v2179_v11 = vld [vmem:[%s5214_s12 + $0x168] sm:$0xff] }
 0x7a3   : > { %3001 = vmatpush3.xpose.msk.msra.mxu0 %vm1243_vm0, %v1855_v1  ;;  %3004 = vmatprep.mubr.msk.f32.mxu0 %vm1243_vm0, %v1849_v20  ;;  %v2188_v1 = vld [vmem:[%s5214_s12 + $0x1b0] sm:$0xff]  ;;  %v2181_v20 = vld [vmem:[%s5214_s12 + $0x178] sm:$0xff] }
 0x7a4   : > { %3002 = vmatprep.subr.msk.mxu0 %vm1243_vm0, %v1853_v3 }
 0x7a7   : > { %3003 = vmatpush3.xpose.msk.msra.mxu0 %vm1243_vm0, %v1853_v3  ;;  %v2183_v3 = vld [vmem:[%s5214_s12 + $0x188] sm:$0xff] }
 0x7a8   : > { %2361 = vmatprep.subr.mxu0 %v2197_v57  ;;  %v2142_v57 = vld [vmem:[%s5214_s12 + $0x40] sm:$0xff] }
 0x7aa   : > { %3005 = vmatmul.mubr.msk.f32.vlgmr.msra.gmra.mxu0 %vm1243_vm0, %v1851_v13  ;;  %v2178_v13 = vld [vmem:[%s5214_s12 + $0x160] sm:$0xff] }
 0x7ab   : > { %2362 = vmatpush1.msra.mxu0 %v2196_v59  ;;  %v2139_v59 = vld [vmem:[%s5214_s12 + $0x28] sm:$0xff] }
 0x7ac   : > { %2363 = vmatprep.subr.mxu0 %v2193_v62  ;;  %v2138_v62 = vld [vmem:[%s5214_s12 + $0x20] sm:$0xff] }
 0x7ad   : > { %2364 = vmatpush1.msra.mxu0 %v2192_v31  ;;  %v2135_v31 = vld [vmem:[%s5214_s12 + $0x8] sm:$0xff] }
 0x7ae   : > { %2365 = vmatprep.subr.mxu0 %v2189_v0  ;;  %v2134_v0 = vld [vmem:[%s5214_s12] sm:$0xff] }
 0x7af   : > { %2366 = vmatpush1.msra.mxu0 %v2188_v1  ;;  %v2259_v1 = vld [vmem:[%s5214_s12 + $0x3e8] sm:$0xff] }
 0x7b0   : > { %2367 = vmatprep.subr.mxu0 %v2185_v6  ;;  %v2258_v6 = vld [vmem:[%s5214_s12 + $0x3e0] sm:$0xff] }
 0x7b1   : > { %2368 = vmatpush1.msra.mxu0 %v2184_v10  ;;  %v2255_v10 = vld [vmem:[%s5214_s12 + $0x3c8] sm:$0xff] }
 0x7b2   : > { %2369 = vmatprep.subr.mxu0 %v2181_v20  ;;  %v2254_v20 = vld [vmem:[%s5214_s12 + $0x3c0] sm:$0xff] }
 0x862   : > { %v2999_v14 = vpop.f32.mrf.mxu0 }
 0x863   : > { %1847 = vst.msk [vmem:[#allocation2 + $0x18] sm:$0xff] %vm1243_vm0, %v2999_v14  ;;  %v2180_v14 = vld [vmem:[%s5214_s12 + $0x170] sm:$0xff] }
 0x864   : > { %v1837_v15 = vpop.f32.mrf.mxu0  ;;  %2370 = vmatpush1.msra.mxu0 %v2180_v14  ;;  %v2251_v14 = vld [vmem:[%s5214_s12 + $0x3a8] sm:$0xff] }
 0x865   : > { %1846 = vst.msk [vmem:[#allocation2 + $0x8] sm:$0xff] %vm1243_vm0, %v1837_v15  ;;  %v2175_v15 = vld [vmem:[%s5214_s12 + $0x148] sm:$0xff] }
 0x86a   : > { %v3006_v38 = vpop.f32.mrf.mxu0 }
 0x86b   : > { %v1940_v16 = vmul.f32 0.125, %v3006_v38  ;;  %v2177_v38 = vld [vmem:[%s5214_s12 + $0x158] sm:$0xff] }
 0x86c   : > { %v1930_v2 = vpop.f32.mrf.mxu0  ;;  %2371 = vmatprep.subr.mxu0 %v2177_v38 }
 0x86d   : > { %v1939_v17 = vmul.f32 0.125, %v1930_v2  ;;  %v1944_v19 = vsel %vm1333_vm1, %v1940_v16, -inf  ;;  %v2176_v2 = vld [vmem:[%s5214_s12 + $0x150] sm:$0xff] }
 0x86e   : > { %1945 = vmax.xlane.f32.xlu1 %v1944_v19  ;;  %v2173_v19 = vld [vmem:[%s5214_s12 + $0x138] sm:$0xff]  ;;  %2372 = vmatpush1.msra.mxu0 %v2176_v2 }
 0x86f   : > { %v1941_v21 = vsel %vm1333_vm1, %v1939_v17, -inf  ;;  %2373 = vmatprep.subr.mxu0 %v2173_v19 }
 0x870   : > { %1942 = vmax.xlane.f32.xlu0 %v1941_v21  ;;  %v2170_v21 = vld [vmem:[%s5214_s12 + $0x120] sm:$0xff] }
 0x87f   : > { %1965 = vrot.lane.b32.xlu1 %v4209_v47, %s3162_s18 }
 0x883   : > { %1645 = vrot.lane.b32.xlu1 %v1634_v49, %s3162_s18 }
 0x8f7   : > { %v1946_v22 = vpop.xlane.xlu1 %1945 }
 0x8f8   : > { %v1948_v23 = vsub.f32 %v1940_v16, %v1946_v22  ;;  %v2174_v16 = vld [vmem:[%s5214_s12 + $0x140] sm:$0xff]  ;;  %v2172_v22 = vld [vmem:[%s5214_s12 + $0x130] sm:$0xff] }
 0x8f9   : > { %v1943_v24 = vpop.xlane.xlu0 %1942  ;;  %2374 = vmatpush1.msra.mxu0 %v2172_v22 }
 0x8fa   : > { %v1951_v26 = vmul.f32 1.442695, %v1948_v23  ;;  %v1947_v27 = vsub.f32 %v1939_v17, %v1943_v24  ;;  %v2171_v17 = vld [vmem:[%s5214_s12 + $0x128] sm:$0xff]  ;;  %v2169_v24 = vld [vmem:[%s5214_s12 + $0x118] sm:$0xff] }
 0x8fb   : > { %v1966_v28 = vpop.permute.xlu1 %1965  ;;  %v2167_v23 = vld [vmem:[%s5214_s12 + $0x108] sm:$0xff]  ;;  %2375 = vmatprep.subr.mxu0 %v2169_v24 }
 0x8fc   : > { %3084 = vpow2.f32 %v1951_v26  ;;  %v1949_v29 = vmul.f32 1.442695, %v1947_v27  ;;  %v2166_v26 = vld [vmem:[%s5214_s12 + $0x100] sm:$0xff]  ;;  %v2168_v27 = vld [vmem:[%s5214_s12 + $0x110] sm:$0xff] }
 0x8fd   : > { %2376 = vmatpush1.msra.mxu0 %v2168_v27 }
 0x8fe   : > { %3086 = vpow2.f32 %v1949_v29  ;;  %v2165_v29 = vld [vmem:[%s5214_s12 + $0xf8] sm:$0xff] }
 0x8ff   : > { %v1646_v30 = vpop.permute.xlu1 %1645  ;;  %2377 = vmatprep.subr.mxu0 %v2165_v29  ;;  %v2250_v29 = vld [vmem:[%s5214_s12 + $0x3a0] sm:$0xff] }
 0x900   : > { %1652 = vst.msk [vmem:[#allocation2] sm:$0xff] %vm1651_vm2, %v1646_v30  ;;  %v2162_v30 = vld [vmem:[%s5214_s12 + $0xe0] sm:$0xff] }
 0x907   : > { %v4289_v51 = vld [vmem:[#allocation2] sm:$0xff] }
 0x909   : > { %v3085_v34 = vpop.eup %3084 }
 0x90a   : > { %v1956_v33 = vsel %vm1333_vm1, %v3085_v34, 0.0 }
 0x90b   : > { %v3087_v35 = vpop.eup %3086  ;;  %1957 = vadd.xlane.f32.xlu0 %v1956_v33  ;;  %v2159_v33 = vld [vmem:[%s5214_s12 + $0xc8] sm:$0xff] }
 0x90c   : > { %v1953_v47 = vsel %vm1333_vm1, %v3087_v35, 0.0 }
 0x90f   : > { %1954 = vadd.xlane.f32.xlu0 %v1953_v47  ;;  %v2158_v47 = vld [vmem:[%s5214_s12 + $0xc0] sm:$0xff] }
 0x925   : > { %1967 = vrot.lane.b32.xlu0 %v4205_v42, %s3162_s18 }
 0x929   : > { %1647 = vrot.lane.b32.xlu0 %v4249_v48, %s3162_s18 }
 0x994   : > { %v1958_v36 = vpop.xlane.xlu0 %1957 }
 0x995   : > { %3088 = vrcp.f32 %v1958_v36  ;;  %v2160_v36 = vld [vmem:[%s5214_s12 + $0xd0] sm:$0xff] }
 0x998   : > { %v1955_v39 = vpop.xlane.xlu0 %1954 }
 0x999   : > { %3090 = vrcp.f32 %v1955_v39  ;;  %v2155_v39 = vld [vmem:[%s5214_s12 + $0xa8] sm:$0xff] }
 0x99c   : > { %v1968_v40 = vpop.permute.xlu0 %1967 }
 0x99d   : > { %3007 = vmatprep.subr.mxu1 %v1968_v40 }
 0x99e   : > { %3008 = vmatpush3.msra.mxu1 %v1968_v40  ;;  %v2157_v40 = vld [vmem:[%s5214_s12 + $0xb8] sm:$0xff] }
 0x99f   : > { %3009 = vmatprep.subr.mxu1 %v1966_v28 }
 0x9a0   : > { %3010 = vmatpush3.msra.mxu1 %v1966_v28  ;;  %v1648_v41 = vpop.permute.xlu0 %1647  ;;  %v2163_v28 = vld [vmem:[%s5214_s12 + $0xe8] sm:$0xff] }
 0x9a1   : > { %1653 = vst.msk [vmem:[#allocation2 + $0x10] sm:$0xff] %vm1651_vm2, %v1648_v41  ;;  %2284 = vmatprep.subr.mxu1 %v2195_v56  ;;  %v2154_v41 = vld [vmem:[%s5214_s12 + $0xa0] sm:$0xff]  ;;  %v2145_v56 = vld [vmem:[%s5214_s12 + $0x58] sm:$0xff] }
 0x9a2   : > { %v3089_v43 = vpop.eup %3088 }
 0x9a3   : > { %v1962_v18 = vmul.f32 %v3089_v43, %v3085_v34  ;;  %v2164_v34 = vld [vmem:[%s5214_s12 + $0xf0] sm:$0xff] }
 0x9a4   : > { %2378 = vmatpush1.msra.mxu0 %v2164_v34  ;;  %v2156_v43 = vld [vmem:[%s5214_s12 + $0xb0] sm:$0xff]  ;;  %v2246_v34 = vld [vmem:[%s5214_s12 + $0x380] sm:$0xff] }
 0x9a6   : > { %v3091_v12 = vpop.eup %3090 }
 0x9a7   : > { %v1961_v60 = vmul.f32 %v3091_v12, %v3087_v35  ;;  %v2161_v35 = vld [vmem:[%s5214_s12 + $0xd8] sm:$0xff]  ;;  %v2151_v12 = vld [vmem:[%s5214_s12 + $0x88] sm:$0xff] }
 0x9a8   : > { %v4295_v54 = vld [vmem:[#allocation2 + $0x10] sm:$0xff]  ;;  %2379 = vmatprep.subr.mxu0 %v2161_v35  ;;  %v2243_v35 = vld [vmem:[%s5214_s12 + $0x368] sm:$0xff] }
 0x9a9   : > { %3011 = vmatprep.mubr.msk.f32.mxu1 %vm1333_vm1, %v1961_v60  ;;  %2380 = vmatpush1.msra.mxu0 %v2160_v36  ;;  %v2153_v60 = vld [vmem:[%s5214_s12 + $0x98] sm:$0xff]  ;;  %v2242_v36 = vld [vmem:[%s5214_s12 + $0x360] sm:$0xff] }
 0x9aa   : > { %3012 = vmatmul.mubr.msk.f32.vlgmr.msra.gmra.mxu1 %vm1333_vm1, %v1962_v18  ;;  %2381 = vmatprep.subr.mxu0 %v2157_v40  ;;  %v2150_v18 = vld [vmem:[%s5214_s12 + $0x80] sm:$0xff]  ;;  %v2239_v40 = vld [vmem:[%s5214_s12 + $0x348] sm:$0xff] }
 0x9ab   : > { %2285 = vmatpush1.msra.mxu1 %v2194_v58  ;;  %2382 = vmatpush1.msra.mxu0 %v2156_v43  ;;  %v2144_v58 = vld [vmem:[%s5214_s12 + $0x50] sm:$0xff]  ;;  %v2238_v43 = vld [vmem:[%s5214_s12 + $0x340] sm:$0xff] }
 0x9ac   : > { %2286 = vmatprep.subr.mxu1 %v2191_v61  ;;  %2383 = vmatprep.subr.mxu0 %v2153_v60  ;;  %v2141_v61 = vld [vmem:[%s5214_s12 + $0x38] sm:$0xff]  ;;  %v2235_v60 = vld [vmem:[%s5214_s12 + $0x328] sm:$0xff] }
 0x9ad   : > { %2287 = vmatpush1.msra.mxu1 %v2190_v32  ;;  %v2140_v32 = vld [vmem:[%s5214_s12 + $0x30] sm:$0xff] }
 0x9ae   : > { %2288 = vmatprep.subr.mxu1 %v2187_v63  ;;  %v2137_v63 = vld [vmem:[%s5214_s12 + $0x18] sm:$0xff] }
 0x9af   : > { %2289 = vmatpush1.msra.mxu1 %v2186_v37  ;;  %v2136_v37 = vld [vmem:[%s5214_s12 + $0x10] sm:$0xff] }
 0x9b0   : > { %2290 = vmatprep.subr.mxu1 %v2183_v3  ;;  %v2261_v3 = vld [vmem:[%s5214_s12 + $0x3f8] sm:$0xff] }
 0x9b1   : > { %2291 = vmatpush1.msra.mxu1 %v2182_v9  ;;  %v2260_v9 = vld [vmem:[%s5214_s12 + $0x3f0] sm:$0xff] }
 0x9b2   : > { %2292 = vmatprep.subr.mxu1 %v2179_v11  ;;  %v2257_v11 = vld [vmem:[%s5214_s12 + $0x3d8] sm:$0xff] }
 0x9b3   : > { %2293 = vmatpush1.msra.mxu1 %v2178_v13  ;;  %v2256_v13 = vld [vmem:[%s5214_s12 + $0x3d0] sm:$0xff] }
 0x9b4   : > { %2294 = vmatprep.subr.mxu1 %v2175_v15  ;;  %v2253_v15 = vld [vmem:[%s5214_s12 + $0x3b8] sm:$0xff] }
 0x9b5   : > { %2295 = vmatpush1.msra.mxu1 %v2174_v16 }
 0x9b6   : > { %2296 = vmatprep.subr.mxu1 %v2171_v17 }
 0x9b7   : > { %2297 = vmatpush1.msra.mxu1 %v2170_v21 }
 0x9b8   : > { %2298 = vmatprep.subr.mxu1 %v2167_v23 }
 0x9b9   : > { %2299 = vmatpush1.msra.mxu1 %v2166_v26 }
 0x9ba   : > { %2300 = vmatprep.subr.mxu1 %v2163_v28 }
 0x9bb   : > { %2301 = vmatpush1.msra.mxu1 %v2162_v30  ;;  %v2249_v30 = vld [vmem:[%s5214_s12 + $0x398] sm:$0xff] }
 0x9bc   : > { %2302 = vmatprep.subr.mxu1 %v2159_v33  ;;  %v2248_v33 = vld [vmem:[%s5214_s12 + $0x390] sm:$0xff] }
 0x9bd   : > { %2303 = vmatpush1.msra.mxu1 %v2158_v47  ;;  %v2245_v47 = vld [vmem:[%s5214_s12 + $0x378] sm:$0xff] }
 0x9be   : > { %2304 = vmatprep.subr.mxu1 %v2155_v39  ;;  %v2244_v39 = vld [vmem:[%s5214_s12 + $0x370] sm:$0xff] }
 0x9bf   : > { %2305 = vmatpush1.msra.mxu1 %v2154_v41  ;;  %v2241_v41 = vld [vmem:[%s5214_s12 + $0x358] sm:$0xff] }
 0x9c0   : > { %2306 = vmatprep.subr.mxu1 %v2151_v12  ;;  %v2240_v12 = vld [vmem:[%s5214_s12 + $0x350] sm:$0xff] }
 0x9c1   : > { %2307 = vmatpush1.msra.mxu1 %v2150_v18  ;;  %v2237_v18 = vld [vmem:[%s5214_s12 + $0x338] sm:$0xff] }
 0xa6a   : > { %v3013_v42 = vpop.f32.mrf.mxu1 }
 0xa6c   : > { %v2043_v48 = vpop.f32.mrf.mxu1 }
 0xa6d   : > { %2054 = vrot.lane.b32.xlu1 %v2043_v48, %s3162_s18  ;;  %v2147_v48 = vld [vmem:[%s5214_s12 + $0x68] sm:$0xff] }
 0xa6e   : > { %2308 = vmatprep.subr.mxu1 %v2147_v48  ;;  %v2236_v48 = vld [vmem:[%s5214_s12 + $0x330] sm:$0xff] }
 0xa71   : > { %2056 = vrot.lane.b32.xlu1 %v3013_v42, %s3162_s18  ;;  %v2152_v42 = vld [vmem:[%s5214_s12 + $0x90] sm:$0xff]  ;;  %s2892_s18 = sshll.u32 %s566_s21, 5 }
 0xa72   : > { %2384 = vmatpush1.msra.mxu0 %v2152_v42  ;;  %v2234_v42 = vld [vmem:[%s5214_s12 + $0x320] sm:$0xff]  ;;  %s568_s22 = scalar_lea.vmem [#allocation3], %s2892_s18  ;;  %s3106_s18 = scalar_lea.vmem %s3105_s25, 1024 }
 0xa73   : > { %s2826_s19 = sshll.u32 %s568_s22, 4  ;;  %s5156_s19 = int_to_ptr.vmem [resolvable:$true] %s2826_s19 }
 0xa74   : > { %s3100_s20 = scalar_lea.vmem %s5156_s19, 512  ;;  %p3107_p0 = scmp.lt.s32.totalorder %s5156_s19, %s3105_s25 }
 0xa75   : > { %p3101_p11 = scmp.ne.s32.totalorder %s5156_s19, %s3100_s20  ;;  %p3108_p1 = scmp.lt.s32.totalorder %s3106_s18, %s3100_s20 }
 0xa77   : > { %p3102_p12 = pnand %p3101_p11, %p3299_p5  ;;  %p3109_p2 = por %p3108_p1, %p3107_p0 }
 0xa79   : > { %p3103_p13 = pneg %p3102_p12 }
 0xa7b   : > { %p3110_p3 = pnand %p3109_p2, %p3103_p13 }
 0xadf   : > { %v2055_v49 = vpop.permute.xlu1 %2054 }
 0xae0   : > { %2060 = vst.msk [vmem:[#allocation2 + $0x8] sm:$0xff] %vm1651_vm2, %v2055_v49  ;;  %v2149_v49 = vld [vmem:[%s5214_s12 + $0x78] sm:$0xff] }
 0xae1   : > { %2385 = vmatprep.subr.mxu0 %v2149_v49  ;;  %v2231_v49 = vld [vmem:[%s5214_s12 + $0x308] sm:$0xff] }
 0xae3   : > { %v2057_v50 = vpop.permute.xlu1 %2056 }
 0xae4   : > { %2061 = vst.msk [vmem:[#allocation2 + $0x18] sm:$0xff] %vm1651_vm2, %v2057_v50  ;;  %v2146_v50 = vld [vmem:[%s5214_s12 + $0x60] sm:$0xff] }
 0xae5   : > { %2309 = vmatpush1.msra.mxu1 %v2146_v50  ;;  %v2233_v50 = vld [vmem:[%s5214_s12 + $0x318] sm:$0xff] }
 0xae7   : > { %v4291_v52 = vld [vmem:[#allocation2 + $0x8] sm:$0xff] }
 0xae8   : > { %v2068_v53 = vadd.f32 %v4291_v52, %v4289_v51 }
 0xaea   : > { %2069 = vadd.xlane.f32.xlu0 %v2068_v53  ;;  %v2148_v53 = vld [vmem:[%s5214_s12 + $0x70] sm:$0xff] }
 0xaeb   : > { %v4297_v25 = vld [vmem:[#allocation2 + $0x18] sm:$0xff]  ;;  %2386 = vmatpush1.msra.mxu0 %v2148_v53  ;;  %v2230_v53 = vld [vmem:[%s5214_s12 + $0x300] sm:$0xff] }
 0xaec   : > { %v2071_v55 = vadd.f32 %v4297_v25, %v4295_v54  ;;  %2387 = vmatprep.subr.mxu0 %v2145_v56  ;;  %v2227_v56 = vld [vmem:[%s5214_s12 + $0x2e8] sm:$0xff] }
 0xaed   : > { %2388 = vmatpush1.msra.mxu0 %v2144_v58  ;;  %v2226_v58 = vld [vmem:[%s5214_s12 + $0x2e0] sm:$0xff] }
 0xaee   : > { %2072 = vadd.xlane.f32.xlu1 %v2071_v55  ;;  %v2143_v55 = vld [vmem:[%s5214_s12 + $0x48] sm:$0xff]  ;;  %2389 = vmatprep.subr.mxu0 %v2141_v61 }
 0xaef   : > { %2310 = vmatprep.subr.mxu1 %v2143_v55  ;;  %2390 = vmatpush1.msra.mxu0 %v2140_v32  ;;  %v2232_v55 = vld [vmem:[%s5214_s12 + $0x310] sm:$0xff]  ;;  %v2223_v61 = vld [vmem:[%s5214_s12 + $0x2c8] sm:$0xff]  ;;  %v2222_v32 = vld [vmem:[%s5214_s12 + $0x2c0] sm:$0xff] }
 0xaf0   : > { %2311 = vmatpush1.msra.mxu1 %v2142_v57  ;;  %2391 = vmatprep.subr.mxu0 %v2137_v63  ;;  %v2229_v57 = vld [vmem:[%s5214_s12 + $0x2f8] sm:$0xff]  ;;  %v2219_v63 = vld [vmem:[%s5214_s12 + $0x2a8] sm:$0xff] }
 0xaf1   : > { %2312 = vmatprep.subr.mxu1 %v2139_v59  ;;  %2392 = vmatpush1.msra.mxu0 %v2136_v37  ;;  %v2228_v59 = vld [vmem:[%s5214_s12 + $0x2f0] sm:$0xff]  ;;  %v2218_v37 = vld [vmem:[%s5214_s12 + $0x2a0] sm:$0xff] }
 0xaf2   : > { %2313 = vmatpush1.msra.mxu1 %v2138_v62  ;;  %2393 = vmatprep.subr.mxu0 %v2261_v3  ;;  %v2225_v62 = vld [vmem:[%s5214_s12 + $0x2d8] sm:$0xff]  ;;  %v2215_v3 = vld [vmem:[%s5214_s12 + $0x288] sm:$0xff] }
 0xaf3   : > { %2314 = vmatprep.subr.mxu1 %v2135_v31  ;;  %2394 = vmatpush2.msra.mxu0 %v2260_v9  ;;  %v2224_v31 = vld [vmem:[%s5214_s12 + $0x2d0] sm:$0xff]  ;;  %v2214_v9 = vld [vmem:[%s5214_s12 + $0x280] sm:$0xff] }
 0xaf4   : > { %2315 = vmatpush1.msra.mxu1 %v2134_v0  ;;  %2395 = vmatprep.subr.mxu0 %v2257_v11  ;;  %v2221_v0 = vld [vmem:[%s5214_s12 + $0x2b8] sm:$0xff]  ;;  %v2211_v11 = vld [vmem:[%s5214_s12 + $0x268] sm:$0xff] }
 0xaf5   : > { %2316 = vmatprep.subr.mxu1 %v2259_v1  ;;  %2396 = vmatpush2.msra.mxu0 %v2256_v13  ;;  %v2220_v1 = vld [vmem:[%s5214_s12 + $0x2b0] sm:$0xff]  ;;  %v2210_v13 = vld [vmem:[%s5214_s12 + $0x260] sm:$0xff] }
 0xaf6   : > { %2317 = vmatpush2.msra.mxu1 %v2258_v6  ;;  %2397 = vmatprep.subr.mxu0 %v2253_v15  ;;  %v2217_v6 = vld [vmem:[%s5214_s12 + $0x298] sm:$0xff]  ;;  %v2207_v15 = vld [vmem:[%s5214_s12 + $0x248] sm:$0xff] }
 0xaf7   : > { %2318 = vmatprep.subr.mxu1 %v2255_v10  ;;  %v2216_v10 = vld [vmem:[%s5214_s12 + $0x290] sm:$0xff] }
 0xaf8   : > { %2319 = vmatpush2.msra.mxu1 %v2254_v20  ;;  %v2213_v20 = vld [vmem:[%s5214_s12 + $0x278] sm:$0xff] }
 0xaf9   : > { %2320 = vmatprep.subr.mxu1 %v2251_v14  ;;  %v2212_v14 = vld [vmem:[%s5214_s12 + $0x270] sm:$0xff] }
 0xafa   : > { %2321 = vmatpush2.msra.mxu1 %v2250_v29  ;;  %v2200_v29 = vld [vmem:[%s5214_s12 + $0x210] sm:$0xff] }
 0xb73   : > { %v2070_v38 = vpop.xlane.xlu0 %2069 }
 0xb74   : > { %v2074_v16 = vmul.f32 0.00390625, %v2070_v38  ;;  %v2209_v38 = vld [vmem:[%s5214_s12 + $0x258] sm:$0xff] }
 0xb76   : > { %v4524_v2 = vsub.f32 %v4289_v51, %v2074_v16  ;;  %v4527_v17 = vsub.f32 %v4291_v52, %v2074_v16  ;;  %v2206_v16 = vld [vmem:[%s5214_s12 + $0x240] sm:$0xff] }
 0xb77   : > { %v2073_v19 = vpop.xlane.xlu1 %2072 }
 0xb78   : > { %v2075_v21 = vmul.f32 0.00390625, %v2073_v19  ;;  %v2080_v22 = vmul.f32 %v4524_v2, %v4524_v2  ;;  %v2081_v23 = vmul.f32 %v4527_v17, %v4527_v17  ;;  %v2208_v19 = vld [vmem:[%s5214_s12 + $0x250] sm:$0xff] }
 0xb7a   : > { %v4534_v24 = vsub.f32 %v4295_v54, %v2075_v21  ;;  %v4537_v26 = vsub.f32 %v4297_v25, %v2075_v21  ;;  %v2084_v27 = vadd.f32 %v2081_v23, %v2080_v22  ;;  %v2252_v54 = vld [vmem:[%s5214_s12 + $0x3b0] sm:$0xff]  ;;  %v2247_v25 = vld [vmem:[%s5214_s12 + $0x388] sm:$0xff]  ;;  %v2205_v22 = vld [vmem:[%s5214_s12 + $0x238] sm:$0xff] }
 0xb7b   : > { %2398 = vmatpush2.msra.mxu0 %v2252_v54  ;;  %2322 = vmatprep.subr.mxu1 %v2247_v25  ;;  %v2203_v21 = vld [vmem:[%s5214_s12 + $0x228] sm:$0xff]  ;;  %v2202_v23 = vld [vmem:[%s5214_s12 + $0x220] sm:$0xff]  ;;  %v2477_v54 = vld [vmem:[%s5216_s14 + $0xf8] sm:$0xff] }
 0xb7c   : > { %2085 = vadd.xlane.f32.xlu0 %v2084_v27  ;;  %v2082_v51 = vmul.f32 %v4534_v24, %v4534_v24  ;;  %v2083_v52 = vmul.f32 %v4537_v26, %v4537_v26  ;;  %2399 = vmatprep.subr.mxu0 %v2249_v30  ;;  %v2204_v27 = vld [vmem:[%s5214_s12 + $0x230] sm:$0xff]  ;;  %v2541_v25 = vld [vmem:[%s5216_s14 + $0x2f8] sm:$0xff] }
 0xb7d   : > { %2323 = vmatpush2.msra.mxu1 %v2246_v34  ;;  %2400 = vmatpush2.msra.mxu0 %v2248_v33 }
 0xb7e   : > { %v2087_v28 = vadd.f32 %v2083_v52, %v2082_v51  ;;  %2324 = vmatprep.subr.mxu1 %v2243_v35  ;;  %2401 = vmatprep.subr.mxu0 %v2245_v47  ;;  %v2199_v51 = vld [vmem:[%s5214_s12 + $0x208] sm:$0xff]  ;;  %v2201_v52 = vld [vmem:[%s5214_s12 + $0x218] sm:$0xff] }
 0xb7f   : > { %2325 = vmatpush2.msra.mxu1 %v2242_v36  ;;  %2402 = vmatpush2.msra.mxu0 %v2244_v39  ;;  %v2066_v39 = vld [vmem:[%s5212_s10] sm:$0x3] }
 0xb80   : > { %2088 = vadd.xlane.f32.xlu0 %v2087_v28  ;;  %2326 = vmatprep.subr.mxu1 %v2239_v40  ;;  %v2198_v28 = vld [vmem:[%s5214_s12 + $0x200] sm:$0xff] }
 0xb81   : > { %2403 = vmatprep.subr.mxu0 %v2241_v41  ;;  %2327 = vmatpush2.msra.mxu1 %v2238_v43  ;;  %v2067_v40 = vld [vmem:[%s5213_s11] sm:$0x3]  ;;  %v2104_v41 = vrot.slane %v2066_v39, %v3937_v46  ;;  %v2108_v43 = vrot.slane %v2066_v39, %v3934_v45 }
 0xb82   : > { %2404 = vmatpush2.msra.mxu0 %v2240_v12  ;;  %2328 = vmatprep.subr.mxu1 %v2235_v60  ;;  %v2522_v39 = vld [vmem:[%s5216_s14 + $0x260] sm:$0xff] }
 0xb83   : > { %2405 = vmatprep.subr.mxu0 %v2237_v18  ;;  %2329 = vmatpush2.msra.mxu1 %v2234_v42  ;;  %v2119_v18 = vrot.slane %v2067_v40, %v3937_v46  ;;  %v2123_v42 = vrot.slane %v2067_v40, %v3934_v45  ;;  %v2457_v40 = vld [vmem:[%s5216_s14 + $0x58] sm:$0xff] }
 0xb84   : > { %2406 = vmatpush2.msra.mxu0 %v2236_v48  ;;  %2330 = vmatprep.subr.mxu1 %v2231_v49 }
 0xb85   : > { %2407 = vmatprep.subr.mxu0 %v2233_v50  ;;  %2331 = vmatpush2.msra.mxu1 %v2230_v53 }
 0xb86   : > { %2408 = vmatpush2.msra.mxu0 %v2232_v55  ;;  %2332 = vmatprep.subr.mxu1 %v2227_v56 }
 0xb87   : > { %2409 = vmatprep.subr.mxu0 %v2229_v57  ;;  %2333 = vmatpush2.msra.mxu1 %v2226_v58 }
 0xb88   : > { %2410 = vmatpush2.msra.mxu0 %v2228_v59  ;;  %2334 = vmatprep.subr.mxu1 %v2223_v61 }
 0xb89   : > { %2411 = vmatprep.subr.mxu0 %v2225_v62  ;;  %2335 = vmatpush2.msra.mxu1 %v2222_v32  ;;  %v2540_v32 = vld [vmem:[%s5216_s14 + $0x2f0] sm:$0xff] }
 0xb8a   : > { %2412 = vmatpush2.msra.mxu0 %v2224_v31  ;;  %2336 = vmatprep.subr.mxu1 %v2219_v63 }
 0xb8b   : > { %2413 = vmatprep.subr.mxu0 %v2221_v0  ;;  %2337 = vmatpush2.msra.mxu1 %v2218_v37  ;;  %v2474_v0 = vld [vmem:[%s5216_s14 + $0xe0] sm:$0xff] }
 0xb8c   : > { %2414 = vmatpush2.msra.mxu0 %v2220_v1  ;;  %2338 = vmatprep.subr.mxu1 %v2215_v3  ;;  %v2538_v37 = vld [vmem:[%s5216_s14 + $0x2e0] sm:$0xff]  ;;  %v2472_v1 = vld [vmem:[%s5216_s14 + $0xd0] sm:$0xff] }
 0xb8d   : > { %2415 = vmatprep.subr.mxu0 %v2217_v6  ;;  %2339 = vmatpush2.msra.mxu1 %v2214_v9  ;;  %v2536_v3 = vld [vmem:[%s5216_s14 + $0x2d0] sm:$0xff]  ;;  %v2471_v6 = vld [vmem:[%s5216_s14 + $0xc8] sm:$0xff] }
 0xb8e   : > { %2416 = vmatpush2.msra.mxu0 %v2216_v10  ;;  %2340 = vmatprep.subr.mxu1 %v2211_v11  ;;  %v2535_v9 = vld [vmem:[%s5216_s14 + $0x2c8] sm:$0xff]  ;;  %v2470_v10 = vld [vmem:[%s5216_s14 + $0xc0] sm:$0xff] }
 0xb8f   : > { %2417 = vmatprep.subr.mxu0 %v2213_v20  ;;  %2341 = vmatpush2.msra.mxu1 %v2210_v13  ;;  %v2534_v11 = vld [vmem:[%s5216_s14 + $0x2c0] sm:$0xff]  ;;  %v2469_v20 = vld [vmem:[%s5216_s14 + $0xb8] sm:$0xff] }
 0xb90   : > { %2418 = vmatpush2.msra.mxu0 %v2212_v14  ;;  %2342 = vmatprep.subr.mxu1 %v2207_v15  ;;  %v2533_v13 = vld [vmem:[%s5216_s14 + $0x2b8] sm:$0xff]  ;;  %v2468_v14 = vld [vmem:[%s5216_s14 + $0xb0] sm:$0xff] }
 0xb91   : > { %2419 = vmatprep.subr.mxu0 %v2209_v38  ;;  %2343 = vmatpush2.msra.mxu1 %v2206_v16  ;;  %v2532_v15 = vld [vmem:[%s5216_s14 + $0x2b0] sm:$0xff]  ;;  %v2467_v38 = vld [vmem:[%s5216_s14 + $0xa8] sm:$0xff] }
 0xb92   : > { %2420 = vmatpush2.msra.mxu0 %v2208_v19  ;;  %2344 = vmatprep.subr.mxu1 %v2203_v21  ;;  %v2531_v16 = vld [vmem:[%s5216_s14 + $0x2a8] sm:$0xff]  ;;  %v2466_v19 = vld [vmem:[%s5216_s14 + $0xa0] sm:$0xff] }
 0xb93   : > { %2421 = vmatprep.subr.mxu0 %v2205_v22  ;;  %2345 = vmatpush2.msra.mxu1 %v2202_v23  ;;  %v2530_v21 = vld [vmem:[%s5216_s14 + $0x2a0] sm:$0xff]  ;;  %v2465_v22 = vld [vmem:[%s5216_s14 + $0x98] sm:$0xff] }
 0xb94   : > { %2422 = vmatpush2.msra.mxu0 %v2204_v27  ;;  %2346 = vmatprep.subr.mxu1 %v2199_v51  ;;  %v2529_v23 = vld [vmem:[%s5216_s14 + $0x298] sm:$0xff]  ;;  %v2464_v27 = vld [vmem:[%s5216_s14 + $0x90] sm:$0xff] }
 0xb95   : > { %2423 = vmatprep.subr.mxu0 %v2201_v52  ;;  %2347 = vmatpush2.msra.mxu1 %v2198_v28  ;;  %v2528_v51 = vld [vmem:[%s5216_s14 + $0x290] sm:$0xff]  ;;  %v2463_v52 = vld [vmem:[%s5216_s14 + $0x88] sm:$0xff] }
 0xb96   : > { %2424 = vmatpush2.msra.mxu0 %v2200_v29  ;;  %2586 = vmatprep.subr.mxu1 %v2477_v54  ;;  %v2527_v28 = vld [vmem:[%s5216_s14 + $0x288] sm:$0xff]  ;;  %v2462_v29 = vld [vmem:[%s5216_s14 + $0x80] sm:$0xff] }
 0xb97   : > { %2663 = vmatprep.subr.mxu0 %v2541_v25  ;;  %v2526_v54 = vld [vmem:[%s5216_s14 + $0x280] sm:$0xff]  ;;  %v2461_v25 = vld [vmem:[%s5216_s14 + $0x78] sm:$0xff] }
 0xc05   : > { %v2086_v30 = vpop.xlane.xlu0 %2085 }
 0xc06   : > { %v2090_v34 = vmul.f32 0.00390625, %v2086_v30  ;;  %v2525_v30 = vld [vmem:[%s5216_s14 + $0x278] sm:$0xff] }
 0xc08   : > { %v2092_v33 = vadd.f32 1e-05, %v2090_v34  ;;  %v2460_v34 = vld [vmem:[%s5216_s14 + $0x70] sm:$0xff] }
 0xc09   : > { %v2089_v35 = vpop.xlane.xlu0 %2088 }
 0xc0a   : > { %3092 = vrsqrt.f32 %v2092_v33  ;;  %v2091_v47 = vmul.f32 0.00390625, %v2089_v35  ;;  %v2524_v33 = vld [vmem:[%s5216_s14 + $0x270] sm:$0xff]  ;;  %v2459_v35 = vld [vmem:[%s5216_s14 + $0x68] sm:$0xff] }
 0xc0c   : > { %v2093_v36 = vadd.f32 1e-05, %v2091_v47  ;;  %v2523_v47 = vld [vmem:[%s5216_s14 + $0x268] sm:$0xff] }
 0xc0e   : > { %3094 = vrsqrt.f32 %v2093_v36  ;;  %v2458_v36 = vld [vmem:[%s5216_s14 + $0x60] sm:$0xff] }
 0xc17   : > { %v3093_v12 = vpop.eup %3092 }
 0xc18   : > { %v2097_v60 = vmul.f32 %v3093_v12, %v4527_v17  ;;  %v2096_v48 = vmul.f32 %v3093_v12, %v4524_v2  ;;  %v2476_v2 = vld [vmem:[%s5216_s14 + $0xf0] sm:$0xff] }
 0xc19   : > { %v2520_v12 = vld [vmem:[%s5216_s14 + $0x250] sm:$0xff] }
 0xc1a   : > { %v2112_v49 = vmul.f32 %v2108_v43, %v2097_v60  ;;  %v2111_v50 = vmul.f32 %v2104_v41, %v2096_v48  ;;  %v2455_v60 = vld [vmem:[%s5216_s14 + $0x48] sm:$0xff]  ;;  %v2518_v48 = vld [vmem:[%s5216_s14 + $0x240] sm:$0xff] }
 0xc1b   : > { %v3095_v53 = vpop.eup %3094 }
 0xc1c   : > { %v2127_v55 = vadd.f32 %v2123_v42, %v2112_v49  ;;  %v2126_v56 = vadd.f32 %v2119_v18, %v2111_v50  ;;  %v2099_v57 = vmul.f32 %v3095_v53, %v4537_v26  ;;  %v2098_v58 = vmul.f32 %v3095_v53, %v4534_v24  ;;  %v2539_v26 = vld [vmem:[%s5216_s14 + $0x2e8] sm:$0xff]  ;;  %v2453_v49 = vld [vmem:[%s5216_s14 + $0x38] sm:$0xff]  ;;  %v2452_v53 = vld [vmem:[%s5216_s14 + $0x30] sm:$0xff] }
 0xc1d   : > { %v2517_v50 = vld [vmem:[%s5216_s14 + $0x238] sm:$0xff] }
 0xc1e   : > { %v4726_v59 = vadd.f32 %v2127_v55, %v3514_v5  ;;  %v4729_v17 = vadd.f32 %v2126_v56, %v3512_v4  ;;  %v2114_v61 = vmul.f32 %v2108_v43, %v2099_v57  ;;  %v2113_v62 = vmul.f32 %v2104_v41, %v2098_v58  ;;  %v2475_v4 = vld [vmem:[%s5216_s14 + $0xe8] sm:$0xff]  ;;  %v2521_v41 = vld [vmem:[%s5216_s14 + $0x258] sm:$0xff]  ;;  %v2456_v43 = vld [vmem:[%s5216_s14 + $0x50] sm:$0xff] }
 0xc1f   : > { %v2516_v55 = vld [vmem:[%s5216_s14 + $0x230] sm:$0xff]  ;;  %v2451_v56 = vld [vmem:[%s5216_s14 + $0x28] sm:$0xff]  ;;  %v2450_v58 = vld [vmem:[%s5216_s14 + $0x20] sm:$0xff] }
 0xc20   : > { %2348 = vmatprep.mubr.f32.mxu1 %v4726_v59  ;;  %2425 = vmatprep.mubr.f32.mxu0 %v4726_v59  ;;  %v2129_v24 = vadd.f32 %v2123_v42, %v2114_v61  ;;  %v2128_v5 = vadd.f32 %v2119_v18, %v2113_v62  ;;  %v2519_v18 = vld [vmem:[%s5216_s14 + $0x248] sm:$0xff]  ;;  %v2454_v42 = vld [vmem:[%s5216_s14 + $0x40] sm:$0xff]  ;;  %v2449_v62 = vld [vmem:[%s5216_s14 + $0x18] sm:$0xff] }
 0xc21   : > { %2349 = vmatmul.mubr.f32.vlgmr.msra.gmra.mxu1 %v4729_v17  ;;  %2426 = vmatmul.mubr.f32.vlgmr.msra.gmra.mxu0 %v4729_v17  ;;  %v2515_v57 = vld [vmem:[%s5216_s14 + $0x228] sm:$0xff]  ;;  %v2514_v61 = vld [vmem:[%s5216_s14 + $0x220] sm:$0xff] }
 0xc22   : > { %v4748_v31 = vadd.f32 %v2129_v24, %v3520_v8  ;;  %v4751_v63 = vadd.f32 %v2128_v5, %v3518_v7  ;;  %2587 = vmatpush1.msra.mxu1 %v2476_v2  ;;  %2664 = vmatpush1.msra.mxu0 %v2540_v32  ;;  %v2473_v7 = vld [vmem:[%s5216_s14 + $0xd8] sm:$0xff]  ;;  %v2448_v32 = vld [vmem:[%s5216_s14 + $0x10] sm:$0xff]  ;;  %v2447_v5 = vld [vmem:[%s5216_s14 + $0x8] sm:$0xff] }
 0xc23   : > { %2588 = vmatprep.subr.mxu1 %v2475_v4  ;;  %2665 = vmatprep.subr.mxu0 %v2539_v26  ;;  %v2537_v8 = vld [vmem:[%s5216_s14 + $0x2d8] sm:$0xff]  ;;  %v2512_v24 = vld [vmem:[%s5216_s14 + $0x210] sm:$0xff]  ;;  %v2511_v4 = vld [vmem:[%s5216_s14 + $0x208] sm:$0xff] }
 0xc24   : > { %2354 = vmatprep.mubr.f32.mxu1 %v4748_v31  ;;  %2431 = vmatprep.mubr.f32.mxu0 %v4748_v31  ;;  %v2513_v2 = vld [vmem:[%s5216_s14 + $0x218] sm:$0xff]  ;;  %v2446_v26 = vld [vmem:[%s5216_s14] sm:$0xff] }
 0xc25   : > { %2355 = vmatmul.mubr.f32.gmra.mxu1 %v4751_v63  ;;  %2432 = vmatmul.mubr.f32.gmra.mxu0 %v4751_v63 }
 0xc26   : > { %2589 = vmatpush1.msra.mxu1 %v2474_v0  ;;  %2666 = vmatpush1.msra.mxu0 %v2538_v37  ;;  %v2510_v0 = vld [vmem:[%s5216_s14 + $0x200] sm:$0xff]  ;;  %v2509_v37 = vld [vmem:[%s5216_s14 + $0x1f8] sm:$0xff] }
 0xc27   : > { %2590 = vmatprep.subr.mxu1 %v2473_v7  ;;  %2667 = vmatprep.subr.mxu0 %v2537_v8  ;;  %v2573_v7 = vld [vmem:[%s5216_s14 + $0x3f8] sm:$0xff]  ;;  %v2508_v8 = vld [vmem:[%s5216_s14 + $0x1f0] sm:$0xff] }
 0xc28   : > { %2591 = vmatpush1.msra.mxu1 %v2472_v1  ;;  %2668 = vmatpush1.msra.mxu0 %v2536_v3  ;;  %v2572_v1 = vld [vmem:[%s5216_s14 + $0x3f0] sm:$0xff]  ;;  %v2507_v3 = vld [vmem:[%s5216_s14 + $0x1e8] sm:$0xff] }
 0xc29   : > { %2592 = vmatprep.subr.mxu1 %v2471_v6  ;;  %2669 = vmatprep.subr.mxu0 %v2535_v9  ;;  %v2571_v6 = vld [vmem:[%s5216_s14 + $0x3e8] sm:$0xff]  ;;  %v2506_v9 = vld [vmem:[%s5216_s14 + $0x1e0] sm:$0xff] }
 0xc2a   : > { %2593 = vmatpush1.msra.mxu1 %v2470_v10  ;;  %2670 = vmatpush1.msra.mxu0 %v2534_v11  ;;  %v2570_v10 = vld [vmem:[%s5216_s14 + $0x3e0] sm:$0xff]  ;;  %v2505_v11 = vld [vmem:[%s5216_s14 + $0x1d8] sm:$0xff] }
 0xc2b   : > { %2594 = vmatprep.subr.mxu1 %v2469_v20  ;;  %2671 = vmatprep.subr.mxu0 %v2533_v13  ;;  %v2569_v20 = vld [vmem:[%s5216_s14 + $0x3d8] sm:$0xff]  ;;  %v2504_v13 = vld [vmem:[%s5216_s14 + $0x1d0] sm:$0xff] }
 0xc2c   : > { %2595 = vmatpush1.msra.mxu1 %v2468_v14  ;;  %2672 = vmatpush1.msra.mxu0 %v2532_v15  ;;  %v2568_v14 = vld [vmem:[%s5216_s14 + $0x3d0] sm:$0xff]  ;;  %v2503_v15 = vld [vmem:[%s5216_s14 + $0x1c8] sm:$0xff] }
 0xc2d   : > { %2596 = vmatprep.subr.mxu1 %v2467_v38  ;;  %2673 = vmatprep.subr.mxu0 %v2531_v16  ;;  %v2567_v38 = vld [vmem:[%s5216_s14 + $0x3c8] sm:$0xff]  ;;  %v2502_v16 = vld [vmem:[%s5216_s14 + $0x1c0] sm:$0xff] }
 0xc2e   : > { %2597 = vmatpush1.msra.mxu1 %v2466_v19  ;;  %2674 = vmatpush1.msra.mxu0 %v2530_v21  ;;  %v2566_v19 = vld [vmem:[%s5216_s14 + $0x3c0] sm:$0xff]  ;;  %v2501_v21 = vld [vmem:[%s5216_s14 + $0x1b8] sm:$0xff] }
 0xc2f   : > { %2598 = vmatprep.subr.mxu1 %v2465_v22  ;;  %2675 = vmatprep.subr.mxu0 %v2529_v23  ;;  %v2565_v22 = vld [vmem:[%s5216_s14 + $0x3b8] sm:$0xff]  ;;  %v2500_v23 = vld [vmem:[%s5216_s14 + $0x1b0] sm:$0xff] }
 0xc30   : > { %2599 = vmatpush1.msra.mxu1 %v2464_v27  ;;  %2676 = vmatpush1.msra.mxu0 %v2528_v51  ;;  %v2564_v27 = vld [vmem:[%s5216_s14 + $0x3b0] sm:$0xff]  ;;  %v2499_v51 = vld [vmem:[%s5216_s14 + $0x1a8] sm:$0xff] }
 0xc31   : > { %2600 = vmatprep.subr.mxu1 %v2463_v52  ;;  %2677 = vmatprep.subr.mxu0 %v2527_v28  ;;  %v2563_v52 = vld [vmem:[%s5216_s14 + $0x3a8] sm:$0xff]  ;;  %v2498_v28 = vld [vmem:[%s5216_s14 + $0x1a0] sm:$0xff] }
 0xc32   : > { %2601 = vmatpush1.msra.mxu1 %v2462_v29  ;;  %2678 = vmatpush1.msra.mxu0 %v2526_v54  ;;  %v2562_v29 = vld [vmem:[%s5216_s14 + $0x3a0] sm:$0xff]  ;;  %v2497_v54 = vld [vmem:[%s5216_s14 + $0x198] sm:$0xff] }
 0xc33   : > { %2602 = vmatprep.subr.mxu1 %v2461_v25  ;;  %2679 = vmatprep.subr.mxu0 %v2525_v30  ;;  %v2561_v25 = vld [vmem:[%s5216_s14 + $0x398] sm:$0xff]  ;;  %v2496_v30 = vld [vmem:[%s5216_s14 + $0x190] sm:$0xff] }
 0xc34   : > { %2603 = vmatpush1.msra.mxu1 %v2460_v34  ;;  %2680 = vmatpush1.msra.mxu0 %v2524_v33  ;;  %v2560_v34 = vld [vmem:[%s5216_s14 + $0x390] sm:$0xff]  ;;  %v2495_v33 = vld [vmem:[%s5216_s14 + $0x188] sm:$0xff] }
 0xc35   : > { %2604 = vmatprep.subr.mxu1 %v2459_v35  ;;  %2681 = vmatprep.subr.mxu0 %v2523_v47  ;;  %v2559_v35 = vld [vmem:[%s5216_s14 + $0x388] sm:$0xff]  ;;  %v2494_v47 = vld [vmem:[%s5216_s14 + $0x180] sm:$0xff] }
 0xc36   : > { %2605 = vmatpush1.msra.mxu1 %v2458_v36  ;;  %2682 = vmatpush1.msra.mxu0 %v2522_v39  ;;  %v2558_v36 = vld [vmem:[%s5216_s14 + $0x380] sm:$0xff]  ;;  %v2493_v39 = vld [vmem:[%s5216_s14 + $0x178] sm:$0xff] }
 0xc37   : > { %2606 = vmatprep.subr.mxu1 %v2457_v40  ;;  %2683 = vmatprep.subr.mxu0 %v2521_v41  ;;  %v2557_v40 = vld [vmem:[%s5216_s14 + $0x378] sm:$0xff]  ;;  %v2492_v41 = vld [vmem:[%s5216_s14 + $0x170] sm:$0xff] }
 0xc38   : > { %2607 = vmatpush1.msra.mxu1 %v2456_v43  ;;  %2684 = vmatpush1.msra.mxu0 %v2520_v12  ;;  %v2556_v43 = vld [vmem:[%s5216_s14 + $0x370] sm:$0xff]  ;;  %v2491_v12 = vld [vmem:[%s5216_s14 + $0x168] sm:$0xff] }
 0xc39   : > { %2608 = vmatprep.subr.mxu1 %v2455_v60  ;;  %2685 = vmatprep.subr.mxu0 %v2519_v18  ;;  %v2555_v60 = vld [vmem:[%s5216_s14 + $0x368] sm:$0xff]  ;;  %v2490_v18 = vld [vmem:[%s5216_s14 + $0x160] sm:$0xff] }
 0xc3a   : > { %2609 = vmatpush1.msra.mxu1 %v2454_v42  ;;  %2686 = vmatpush1.msra.mxu0 %v2518_v48  ;;  %v2554_v42 = vld [vmem:[%s5216_s14 + $0x360] sm:$0xff]  ;;  %v2489_v48 = vld [vmem:[%s5216_s14 + $0x158] sm:$0xff] }
 0xc3b   : > { %2610 = vmatprep.subr.mxu1 %v2453_v49  ;;  %2687 = vmatprep.subr.mxu0 %v2517_v50  ;;  %v2553_v49 = vld [vmem:[%s5216_s14 + $0x358] sm:$0xff]  ;;  %v2488_v50 = vld [vmem:[%s5216_s14 + $0x150] sm:$0xff] }
 0xc3c   : > { %2611 = vmatpush1.msra.mxu1 %v2452_v53  ;;  %2688 = vmatpush1.msra.mxu0 %v2516_v55  ;;  %v2552_v53 = vld [vmem:[%s5216_s14 + $0x350] sm:$0xff]  ;;  %v2487_v55 = vld [vmem:[%s5216_s14 + $0x148] sm:$0xff] }
 0xc3d   : > { %2612 = vmatprep.subr.mxu1 %v2451_v56  ;;  %2689 = vmatprep.subr.mxu0 %v2515_v57  ;;  %v2551_v56 = vld [vmem:[%s5216_s14 + $0x348] sm:$0xff]  ;;  %v2486_v57 = vld [vmem:[%s5216_s14 + $0x140] sm:$0xff] }
 0xc3e   : > { %2613 = vmatpush1.msra.mxu1 %v2450_v58  ;;  %2690 = vmatpush1.msra.mxu0 %v2514_v61  ;;  %v2550_v58 = vld [vmem:[%s5216_s14 + $0x340] sm:$0xff]  ;;  %v2485_v61 = vld [vmem:[%s5216_s14 + $0x138] sm:$0xff] }
 0xc3f   : > { %2614 = vmatprep.subr.mxu1 %v2449_v62  ;;  %2691 = vmatprep.subr.mxu0 %v2513_v2  ;;  %v2549_v62 = vld [vmem:[%s5216_s14 + $0x338] sm:$0xff]  ;;  %v2484_v2 = vld [vmem:[%s5216_s14 + $0x130] sm:$0xff] }
 0xc40   : > { %2615 = vmatpush1.msra.mxu1 %v2448_v32  ;;  %2692 = vmatpush1.msra.mxu0 %v2512_v24  ;;  %v2548_v32 = vld [vmem:[%s5216_s14 + $0x330] sm:$0xff]  ;;  %v2483_v24 = vld [vmem:[%s5216_s14 + $0x128] sm:$0xff] }
 0xc41   : > { %2616 = vmatprep.subr.mxu1 %v2447_v5  ;;  %2693 = vmatprep.subr.mxu0 %v2511_v4  ;;  %v2547_v5 = vld [vmem:[%s5216_s14 + $0x328] sm:$0xff]  ;;  %v2482_v4 = vld [vmem:[%s5216_s14 + $0x120] sm:$0xff] }
 0xc42   : > { %2617 = vmatpush1.msra.mxu1 %v2446_v26  ;;  %2694 = vmatpush1.msra.mxu0 %v2510_v0  ;;  %v2546_v26 = vld [vmem:[%s5216_s14 + $0x320] sm:$0xff]  ;;  %v2481_v0 = vld [vmem:[%s5216_s14 + $0x118] sm:$0xff] }
 0xc43   : > { %2618 = vmatprep.subr.mxu1 %v2509_v37  ;;  %2695 = vmatprep.subr.mxu0 %v2573_v7  ;;  %v2545_v37 = vld [vmem:[%s5216_s14 + $0x318] sm:$0xff]  ;;  %v2480_v7 = vld [vmem:[%s5216_s14 + $0x110] sm:$0xff] }
 0xc44   : > { %2619 = vmatpush2.msra.mxu1 %v2508_v8  ;;  %2696 = vmatpush2.msra.mxu0 %v2572_v1  ;;  %v2544_v8 = vld [vmem:[%s5216_s14 + $0x310] sm:$0xff]  ;;  %v2479_v1 = vld [vmem:[%s5216_s14 + $0x108] sm:$0xff] }
 0xc45   : > { %2620 = vmatprep.subr.mxu1 %v2507_v3  ;;  %2697 = vmatprep.subr.mxu0 %v2571_v6  ;;  %v2543_v3 = vld [vmem:[%s5216_s14 + $0x308] sm:$0xff]  ;;  %v2478_v6 = vld [vmem:[%s5216_s14 + $0x100] sm:$0xff] }
 0xc46   : > { %2621 = vmatpush2.msra.mxu1 %v2506_v9  ;;  %2698 = vmatpush2.msra.mxu0 %v2570_v10  ;;  %v2542_v9 = vld [vmem:[%s5216_s14 + $0x300] sm:$0xff]  ;;  %v2274_v10 = vsub.s32 2, %v3931_v44 }
 0xc47   : > { %2622 = vmatprep.subr.mxu1 %v2505_v11  ;;  %2699 = vmatprep.subr.mxu0 %v2569_v20  ;;  %v2262_v11 = vld [vmem:[%s5215_s13] sm:$0xf]  ;;  %v2278_v20 = vsub.s32 3, %v3931_v44 }
 0xc48   : > { %2623 = vmatpush2.msra.mxu1 %v2504_v13  ;;  %2700 = vmatpush2.msra.mxu0 %v2568_v14  ;;  %v2267_v13 = vrot.slane %v2262_v11, %v3937_v46  ;;  %v2275_v14 = vrot.slane %v2262_v11, %v2274_v10 }
 0xc49   : > { %2624 = vmatprep.subr.mxu1 %v2503_v15  ;;  %2701 = vmatprep.subr.mxu0 %v2567_v38  ;;  %v2271_v15 = vrot.slane %v2262_v11, %v3934_v45  ;;  %v2279_v38 = vrot.slane %v2262_v11, %v2278_v20 }
 0xc4a   : > { %2625 = vmatpush2.msra.mxu1 %v2502_v16  ;;  %2702 = vmatpush2.msra.mxu0 %v2566_v19 }
 0xc4b   : > { %2626 = vmatprep.subr.mxu1 %v2501_v21  ;;  %2703 = vmatprep.subr.mxu0 %v2565_v22 }
 0xc4c   : > { %2627 = vmatpush2.msra.mxu1 %v2500_v23  ;;  %2704 = vmatpush2.msra.mxu0 %v2564_v27 }
 0xc4d   : > { %2628 = vmatprep.subr.mxu1 %v2499_v51  ;;  %2705 = vmatprep.subr.mxu0 %v2563_v52 }
 0xc4e   : > { %2629 = vmatpush2.msra.mxu1 %v2498_v28  ;;  %2706 = vmatpush2.msra.mxu0 %v2562_v29 }
 0xc4f   : > { %2630 = vmatprep.subr.mxu1 %v2497_v54  ;;  %2707 = vmatprep.subr.mxu0 %v2561_v25 }
 0xc50   : > { %2631 = vmatpush2.msra.mxu1 %v2496_v30  ;;  %2708 = vmatpush2.msra.mxu0 %v2560_v34 }
 0xc51   : > { %2632 = vmatprep.subr.mxu1 %v2495_v33  ;;  %2709 = vmatprep.subr.mxu0 %v2559_v35 }
 0xc52   : > { %2633 = vmatpush2.msra.mxu1 %v2494_v47  ;;  %2710 = vmatpush2.msra.mxu0 %v2558_v36 }
 0xc53   : > { %2634 = vmatprep.subr.mxu1 %v2493_v39  ;;  %2711 = vmatprep.subr.mxu0 %v2557_v40 }
 0xc54   : > { %2635 = vmatpush2.msra.mxu1 %v2492_v41  ;;  %2712 = vmatpush2.msra.mxu0 %v2556_v43 }
 0xc55   : > { %2636 = vmatprep.subr.mxu1 %v2491_v12  ;;  %2713 = vmatprep.subr.mxu0 %v2555_v60  ;;  %v2574_v60 = vld [vmem:[%s5217_s15] sm:$0x3] }
 0xc56   : > { %2637 = vmatpush2.msra.mxu1 %v2490_v18  ;;  %2714 = vmatpush2.msra.mxu0 %v2554_v42  ;;  %v2579_v18 = vrot.slane %v2574_v60, %v3937_v46  ;;  %v2583_v42 = vrot.slane %v2574_v60, %v3934_v45 }
 0xc57   : > { %2638 = vmatprep.subr.mxu1 %v2489_v48  ;;  %2715 = vmatprep.subr.mxu0 %v2553_v49 }
 0xc58   : > { %2639 = vmatpush2.msra.mxu1 %v2488_v50  ;;  %2716 = vmatpush2.msra.mxu0 %v2552_v53 }
 0xc59   : > { %2640 = vmatprep.subr.mxu1 %v2487_v55  ;;  %2717 = vmatprep.subr.mxu0 %v2551_v56 }
 0xc5a   : > { %2641 = vmatpush2.msra.mxu1 %v2486_v57  ;;  %2718 = vmatpush2.msra.mxu0 %v2550_v58 }
 0xc5b   : > { %2642 = vmatprep.subr.mxu1 %v2485_v61  ;;  %2719 = vmatprep.subr.mxu0 %v2549_v62 }
 0xc5c   : > { %2643 = vmatpush2.msra.mxu1 %v2484_v2  ;;  %2720 = vmatpush2.msra.mxu0 %v2548_v32 }
 0xc5d   : > { %2644 = vmatprep.subr.mxu1 %v2483_v24  ;;  %2721 = vmatprep.subr.mxu0 %v2547_v5 }
 0xc5e   : > { %2645 = vmatpush2.msra.mxu1 %v2482_v4  ;;  %2722 = vmatpush2.msra.mxu0 %v2546_v26 }
 0xc5f   : > { %2646 = vmatprep.subr.mxu1 %v2481_v0  ;;  %2723 = vmatprep.subr.mxu0 %v2545_v37 }
 0xc60   : > { %2647 = vmatpush2.msra.mxu1 %v2480_v7  ;;  %2724 = vmatpush2.msra.mxu0 %v2544_v8 }
 0xc61   : > { %2648 = vmatprep.subr.mxu1 %v2479_v1  ;;  %2725 = vmatprep.subr.mxu0 %v2543_v3 }
 0xc62   : > { %2649 = vmatpush2.msra.mxu1 %v2478_v6  ;;  %2726 = vmatpush2.msra.mxu0 %v2542_v9 }
 0xce1   : > { %v2350_v16 = vpop.f32.mrf.mxu1  ;;  %v2427_v19 = vpop.f32.mrf.mxu0 }
 0xce2   : > { %v2351_v21 = vadd.f32 %v2350_v16, %v2267_v13  ;;  %v2428_v22 = vadd.f32 %v2427_v19, %v2275_v14 }
 0xce3   : > { %v2352_v23 = vpop.f32.mrf.mxu1  ;;  %v2429_v27 = vpop.f32.mrf.mxu0 }
 0xce4   : > { %v2353_v51 = vadd.f32 %v2352_v23, %v2271_v15  ;;  %v2430_v52 = vadd.f32 %v2429_v27, %v2279_v38  ;;  %v2438_v30 = vmax.f32 %v2351_v21, 0.0  ;;  %v2440_v44 = vmax.f32 %v2428_v22, 0.0 }
 0xce5   : > { %v2356_v28 = vpop.f32.mrf.mxu1  ;;  %v2433_v29 = vpop.f32.mrf.mxu0 }
 0xce6   : > { %v2439_v54 = vmax.f32 %v2353_v51, 0.0  ;;  %v2441_v25 = vmax.f32 %v2430_v52, 0.0  ;;  %v2357_v34 = vadd.f32 %v2356_v28, %v2267_v13  ;;  %v2434_v33 = vadd.f32 %v2433_v29, %v2275_v14  ;;  %v2740_v52 = vld [vmem:[%s5218_s16] sm:$0x3] }
 0xce7   : > { %v2358_v35 = vpop.f32.mrf.mxu1  ;;  %v2435_v47 = vpop.f32.mrf.mxu0  ;;  %v2741_v28 = vld [vmem:[%s5219_s17] sm:$0x3]  ;;  %v2778_v29 = vrot.slane %v2740_v52, %v3937_v46 }
 0xce8   : > { %v2359_v36 = vadd.f32 %v2358_v35, %v2271_v15  ;;  %v2436_v39 = vadd.f32 %v2435_v47, %v2279_v38  ;;  %2650 = vmatprep.mubr.f32.mxu1 %v2439_v54  ;;  %2727 = vmatprep.mubr.f32.mxu0 %v2441_v25  ;;  %v2442_v43 = vmax.f32 %v2357_v34, 0.0  ;;  %v2444_v12 = vmax.f32 %v2434_v33, 0.0 }
 0xce9   : > { %2651 = vmatmul.mubr.f32.vlgmr.msra.gmra.mxu1 %v2438_v30  ;;  %2728 = vmatmul.mubr.f32.vlgmr.msra.gmra.mxu0 %v2440_v44  ;;  %v2782_v54 = vrot.slane %v2740_v52, %v3934_v45  ;;  %v2793_v30 = vrot.slane %v2741_v28, %v3937_v46  ;;  %v2797_v44 = vrot.slane %v2741_v28, %v3934_v45 }
 0xcea   : > { %v2443_v40 = vmax.f32 %v2359_v36, 0.0  ;;  %v2445_v41 = vmax.f32 %v2436_v39, 0.0 }
 0xcec   : > { %2656 = vmatprep.mubr.f32.mxu1 %v2443_v40  ;;  %2733 = vmatprep.mubr.f32.mxu0 %v2445_v41 }
 0xced   : > { %2657 = vmatmul.mubr.f32.gmra.mxu1 %v2442_v43  ;;  %2734 = vmatmul.mubr.f32.gmra.mxu0 %v2444_v12 }
 0xda9   : > { %v2652_v48 = vpop.f32.mrf.mxu1  ;;  %v2729_v49 = vpop.f32.mrf.mxu0 }
 0xdaa   : > { %v2653_v50 = vadd.f32 %v2652_v48, %v2579_v18 }
 0xdab   : > { %v2654_v53 = vpop.f32.mrf.mxu1  ;;  %v2731_v55 = vpop.f32.mrf.mxu0 }
 0xdac   : > { %v2655_v56 = vadd.f32 %v2654_v53, %v2583_v42  ;;  %v2730_v61 = vadd.f32 %v2729_v49, %v2653_v50 }
 0xdad   : > { %v2658_v57 = vpop.f32.mrf.mxu1  ;;  %v2735_v58 = vpop.f32.mrf.mxu0 }
 0xdae   : > { %v2732_v62 = vadd.f32 %v2731_v55, %v2655_v56  ;;  %v2659_v2 = vadd.f32 %v2658_v57, %v2579_v18 }
 0xdaf   : > { %v2660_v32 = vpop.f32.mrf.mxu1  ;;  %v2737_v4 = vpop.f32.mrf.mxu0 }
 0xdb0   : > { %v2661_v24 = vadd.f32 %v2660_v32, %v2583_v42  ;;  %v2742_v5 = vadd.f32 %v2732_v62, %v2730_v61  ;;  %v2736_v26 = vadd.f32 %v2735_v58, %v2659_v2 }
 0xdb2   : > { %v2738_v0 = vadd.f32 %v2737_v4, %v2661_v24  ;;  %2743 = vadd.xlane.f32.xlu0 %v2742_v5 }
 0xdb4   : > { %v2745_v37 = vadd.f32 %v2738_v0, %v2736_v26 }
 0xdb6   : > { %2746 = vadd.xlane.f32.xlu1 %v2745_v37 }
 0xe3b   : > { %v2744_v7 = vpop.xlane.xlu0 %2743 }
 0xe3c   : > { %v2748_v8 = vmul.f32 0.00390625, %v2744_v7 }
 0xe3e   : > { %v2750_v1 = vsub.f32 %v2730_v61, %v2748_v8  ;;  %v2751_v3 = vsub.f32 %v2732_v62, %v2748_v8 }
 0xe3f   : > { %v2747_v6 = vpop.xlane.xlu1 %2746 }
 0xe40   : > { %v2749_v9 = vmul.f32 0.00390625, %v2747_v6  ;;  %v2754_v10 = vmul.f32 %v2750_v1, %v2750_v1  ;;  %v2755_v11 = vmul.f32 %v2751_v3, %v2751_v3 }
 0xe42   : > { %v2752_v20 = vsub.f32 %v2736_v26, %v2749_v9  ;;  %v2753_v13 = vsub.f32 %v2738_v0, %v2749_v9  ;;  %v2758_v14 = vadd.f32 %v2755_v11, %v2754_v10 }
 0xe44   : > { %2759 = vadd.xlane.f32.xlu0 %v2758_v14  ;;  %v2756_v15 = vmul.f32 %v2752_v20, %v2752_v20  ;;  %v2757_v38 = vmul.f32 %v2753_v13, %v2753_v13 }
 0xe46   : > { %v2761_v16 = vadd.f32 %v2757_v38, %v2756_v15 }
 0xe48   : > { %2762 = vadd.xlane.f32.xlu1 %v2761_v16 }
 0xecd   : > { %v2760_v19 = vpop.xlane.xlu0 %2759 }
 0xece   : > { %v2764_v21 = vmul.f32 0.00390625, %v2760_v19 }
 0xed0   : > { %v2766_v22 = vadd.f32 1e-05, %v2764_v21 }
 0xed1   : > { %v2763_v23 = vpop.xlane.xlu1 %2762 }
 0xed2   : > { %3096 = vrsqrt.f32 %v2766_v22  ;;  %v2765_v27 = vmul.f32 0.00390625, %v2763_v23 }
 0xed4   : > { %v2767_v51 = vadd.f32 1e-05, %v2765_v27 }
 0xed6   : > { %3098 = vrsqrt.f32 %v2767_v51 }
 0xedf   : > { %v3097_v25 = vpop.eup %3096 }
 0xee0   : > { %v2770_v34 = vmul.f32 %v3097_v25, %v2750_v1  ;;  %v2771_v33 = vmul.f32 %v3097_v25, %v2751_v3 }
 0xee2   : > { %v2785_v35 = vmul.f32 %v2778_v29, %v2770_v34  ;;  %v2786_v47 = vmul.f32 %v2782_v54, %v2771_v33 }
 0xee3   : > { %v3099_v36 = vpop.eup %3098 }
 0xee4   : > { %v2800_v39 = vadd.f32 %v2793_v30, %v2785_v35  ;;  %v2801_v40 = vadd.f32 %v2797_v44, %v2786_v47  ;;  %v2772_v41 = vmul.f32 %v3099_v36, %v2752_v20  ;;  %v2773_v43 = vmul.f32 %v3099_v36, %v2753_v13 }
 0xee6   : > { %v2804_v12 = vadd.f32 %v2800_v39, %v4729_v17  ;;  %v2805_v60 = vadd.f32 %v2801_v40, %v4726_v59  ;;  %v2787_v46 = vmul.f32 %v2778_v29, %v2772_v41  ;;  %v2788_v18 = vmul.f32 %v2782_v54, %v2773_v43 }
 0xee8   : > { %v2802_v45 = vadd.f32 %v2793_v30, %v2787_v46  ;;  %v2803_v42 = vadd.f32 %v2797_v44, %v2788_v18  ;;  %2808 = vst [vmem:[%s568_s22] sm:$0xff] %v2804_v12  ;;  %2809 = vst [vmem:[%s568_s22 + $0x8] sm:$0xff] %v2805_v60 }
 0xeea   : > { %v2806_v59 = vadd.f32 %v2802_v45, %v4751_v63  ;;  %v2807_v17 = vadd.f32 %v2803_v42, %v4748_v31 }
 0xeec   : > { %2810 = vst [vmem:[%s568_s22 + $0x10] sm:$0xff] %v2806_v59  ;;  %2811 = vst [vmem:[%s568_s22 + $0x18] sm:$0xff] %v2807_v17 }
 0xeed   : > { %3113 = shalt.err (!%p3110_p3)
}
 0xeee   : > { %s3114_s21 = scalar_lea.hbm %s5154_s30, 512  ;;  %s3118_s29 = scalar_lea.hbm %s5246_s23, 1024 }
 0xeef   : > { %p3115_p4 = scmp.ne.s32.totalorder %s5154_s30, %s3114_s21  ;;  %p3119_p9 = scmp.lt.s32.totalorder %s5154_s30, %s5246_s23 }
 0xef0   : > { %p3120_p10 = scmp.lt.s32.totalorder %s3118_s29, %s3114_s21 }
 0xef1   : > { %p3116_p7 = pnand %p3115_p4, %p3299_p5 }
 0xef2   : > { %p3121_p11 = por %p3120_p10, %p3119_p9 }
 0xef3   : > { %p3117_p8 = pneg %p3116_p7 }
 0xef5   : > { %p3122_p12 = pnand %p3121_p11, %p3117_p8 }
 0xef7   : > { %3125 = shalt.err (!%p3122_p12)
}
 0xef8   : > { %s3164_s20 = smov 256   ;;  %s3165_s25 = smov 16  }
 0xef9   : > { %3014 = dma.vmem_to_hbm [thread:$0]  (%p3299_p5), %s5156_s19, 512, %s5154_s30, %s5162_s0, %s3164_s20, %s3164_s20, %s3165_s25  }
 0xefa PF: > { %s5247_s18 = sld [smem:[#allocation8_spill]] }
 0xefb   : > { %s5248_s27 = sld [smem:[#allocation6_spill]] }
 0xf00   : > { %p3020_p13 = scmp.ge.s32.totalorder %s5247_s18, 2 }
 0xf01   : > { %s2841_s3 = sand.u32 1, %s5248_s27  }
 0xf02   : > { %p3017_p0 = pnand %p3020_p13, %p3303_p6  ;;  %s2842_s21 = scalar_lea.sflag [#allocation4], %s2841_s3 }
 0xf04   : > { %p3018_p1 = pneg %p3017_p0 }
 0xf06   : > { %3143 = dma.done.wait (%p3018_p1), %s2842_s21, 512  }
 0xf07   : > { %3145 = vsyncadd (%p3018_p1), %s2842_s21, 4294966784  ;;  %s5250_s30 = sld [smem:[#allocation9_spill]]  ;;  %s5253_s27 = smov %s3152_s28 }
 0xf08   : > { %s5251_s29 = sld [smem:[#allocation7_spill]] }
 0xf09   : > { %s5252_s1 = sld [smem:[#allocation10_spill]] }
 0xf0d   : > { %p28_p2 = scmp.ge.s32.totalorder %s5250_s30, 4  }
 0xf0e   : > { %s5254_s28 = smov %s5251_s29 }
 0xf0f   : > { %s5255_s29 = smov %s5252_s1  ;;  %30 = sbr.rel (!%p28_p2) target bundleno = 9 (0x9), region = 127 }
 0xf14   :  { %2847 = vsyncpa [#allocation4], 1 }
 0xf15   :  { %2849 = vsyncpa [#allocation4 + $0x1], 1 }

</bundles_post_ra>
